<compile_context>
chip_gen: v7x
topology: tpu7x:2x2x1
jax: 0.10.0
libtpu: 0.0.40
codegen_flags: <defaults>
</compile_context>

<pallas_src>
import jax
import jax.numpy as jnp
from jax.experimental import pallas as pl
from jax.experimental.pallas import tpu as pltpu


# ---------------------------------------------------------------------------
# In-kernel math helpers (all f32, elementwise -> VPU/EUP).
# ---------------------------------------------------------------------------
def _layernorm(x, g, b, eps=1e-5):
    mean = jnp.mean(x, axis=-1, keepdims=True)
    cent = x - mean
    var = jnp.mean(cent * cent, axis=-1, keepdims=True)
    return cent * jax.lax.rsqrt(var + eps) * g + b


def _erf(x):
    # Abramowitz & Stegun 7.1.26, |err| <= 1.5e-7 -> matches nn.GELU()'s
    # exact-erf GELU to f32 precision.
    ax = jnp.abs(x)
    t = 1.0 / (1.0 + 0.3275911 * ax)
    poly = ((((1.061405429 * t - 1.453152027) * t + 1.421413741) * t
             - 0.284496736) * t + 0.254829592) * t
    y = 1.0 - poly * jnp.exp(-(ax * ax))
    return jnp.where(x < 0.0, -y, y)


def _gelu(x):
    return 0.5 * x * (1.0 + _erf(x * 0.7071067811865476))


# ---------------------------------------------------------------------------
# Kernel: one batch tile [TB, S, Din] -> Q values stored as [TB, S*A].
# ---------------------------------------------------------------------------
def _dqn_kernel(x_ref, pe_ref, emb_w_ref, evec_ref,
                qkv_w_ref, ao_w_ref, ff1_w_ref, ff2_w_ref,
                lvec_ref, ff1b_ref, h1_w_ref, h2_w_ref, hvec_ref,
                q_ref):
    TB, S, Din = x_ref.shape
    D = emb_w_ref.shape[1]
    L = qkv_w_ref.shape[0]
    A = q_ref.shape[1] // S
    N = TB * S
    H1 = h1_w_ref.shape[1]              # fused dueling hidden width (2 * D//2)
    A1 = h2_w_ref.shape[1]              # A + 1
    dt = qkv_w_ref.dtype                # MXU operand dtype (f32 or bf16)
    scale = float(D) ** -0.5            # single head -> head_dim == D

    def mm(h2d, w, b):
        # [N,K] @ [K,F] on the MXU (f32 accumulation) + [F] bias.
        out = jnp.dot(h2d.astype(w.dtype), w, preferred_element_type=jnp.float32)
        return out + b

    # --- embedding: Linear -> LayerNorm -> GELU, then positional encoding ---
    x2d = x_ref[...].reshape(N, Din)
    h = mm(x2d, emb_w_ref[...], evec_ref[0])
    h = _layernorm(h, evec_ref[1], evec_ref[2])
    h = _gelu(h) + pe_ref[...]                           # pe pre-tiled to [N, D]

    # --- transformer blocks (num_layers is small -> statically unrolled) ---
    for l in range(L):
        bq, bk, bv = lvec_ref[l, 0], lvec_ref[l, 1], lvec_ref[l, 2]
        b_ao, g1, b1 = lvec_ref[l, 3], lvec_ref[l, 4], lvec_ref[l, 5]
        b_f2, g2, b2 = lvec_ref[l, 6], lvec_ref[l, 7], lvec_ref[l, 8]

        # single-head self-attention; q/k/v via statically-indexed weight slabs
        qh = mm(h, qkv_w_ref[l, 0], bq).reshape(TB, S, D)
        kh = mm(h, qkv_w_ref[l, 1], bk).reshape(TB, S, D)
        vh = mm(h, qkv_w_ref[l, 2], bv).reshape(TB, S, D)
        att = jnp.einsum('bqd,bkd->bqk', qh.astype(dt), kh.astype(dt),
                         preferred_element_type=jnp.float32) * scale
        att = att - jnp.max(att, axis=-1, keepdims=True)
        p = jnp.exp(att)
        p = p * pl.reciprocal(jnp.sum(p, axis=-1, keepdims=True), approx=True)
        ctx = jnp.einsum('bqk,bkd->bqd', p.astype(dt), vh.astype(dt),
                         preferred_element_type=jnp.float32).reshape(N, D)
        a = mm(ctx, ao_w_ref[l], b_ao)                   # attention out_proj
        h = _layernorm(h + a, g1, b1)

        # feed-forward: Linear(D, 2D) -> GELU -> Linear(2D, D)
        f = _gelu(mm(h, ff1_w_ref[l], ff1b_ref[l]))
        f = mm(f, ff2_w_ref[l], b_f2)
        h = _layernorm(h + f, g2, b2)

    # --- fused dueling heads: [adv_hidden | val_hidden] then a block-diagonal
    #     second layer producing [adv | val] in one matmul ---
    hid = jnp.maximum(mm(h, h1_w_ref[...], hvec_ref[0][:H1]), 0.0)
    av = mm(hid, h2_w_ref[...], hvec_ref[1][:A1])        # [N, A+1]
    adv = av[:, :A]
    val = av[:, A:]
    q = val + adv - jnp.mean(adv, axis=-1, keepdims=True)   # [N, A]

    # lane-dense store: pack the S time steps along lanes -> [TB, S*A]
    q3 = q.reshape(TB, S, A)
    q_ref[...] = jnp.concatenate([q3[:, t, :] for t in range(S)],
                                 axis=-1).astype(q_ref.dtype)


# ---------------------------------------------------------------------------
# Wrapper: parameter packing + pallas_call.
# ---------------------------------------------------------------------------
def _positional_encoding(seq_len, d_model):
    pos = jnp.arange(seq_len, dtype=jnp.float32)[:, None]
    div = jnp.exp(jnp.arange(0, d_model, 2, dtype=jnp.float32)
                  * (-jnp.log(10000.0) / d_model))
    pe = jnp.zeros((seq_len, d_model), jnp.float32)
    pe = pe.at[:, 0::2].set(jnp.sin(pos * div))
    pe = pe.at[:, 1::2].set(jnp.cos(pos * div))
    return pe                                             # [S, D]


def enhanced_transformer_dqn_forward(x, params, *, batch_tile=None,
                                     mxu_dtype=jnp.float32):
    """Matches EnhancedTransformerDQN.forward (eval-mode dropout). x: [B,S,Din]."""
    f32 = jnp.float32
    x = jnp.asarray(x, f32)
    B, S, Din = x.shape
    D = params["emb_w"].shape[0]
    A = params["adv2_w"].shape[0]
    blocks = params["blocks"]

    # Batch tiling: one grid step for small B (the grid is a serial loop on
    # v5e/v6e); multi-step grids keep sublane-aligned output tiles for the
    # lane-dense [TB, S*A] output block.
    if batch_tile is None:
        TB = min(B, 128)
    else:
        TB = max(1, min(int(batch_tile), B))
    if TB != B and TB % 8 != 0:
        TB = max(8, (TB // 8) * 8)
    pad = (-B) % TB
    Bp = B + pad
    if pad:
        x = jnp.concatenate([x, jnp.zeros((pad, S, Din), x.dtype)], axis=0)

    def t(w):      # PyTorch Linear stores [out, in] -> transpose for x @ W
        return jnp.asarray(w, f32).T

    def v(a):
        return jnp.asarray(a, f32).reshape(-1)

    # Positional encoding, pre-tiled over the batch tile -> [TB*S, D].
    pe_t = jnp.tile(_positional_encoding(S, D), (TB, 1))

    # Embedding.
    emb_w = t(params["emb_w"]).astype(mxu_dtype)                          # [Din, D]
    evec = jnp.stack([v(params["emb_b"]),
                      v(params["emb_ln_g"]), v(params["emb_ln_b"])])      # [3, D]

    # Per-layer weights, stacked so they stay VMEM-resident across the grid.
    def qkv_split(blk):
        w = jnp.asarray(blk["in_proj_w"], f32)                            # [3D, D]
        return jnp.stack([w[:D].T, w[D:2 * D].T, w[2 * D:].T])            # [3, D, D]

    def layer_vecs(blk):
        ipb = jnp.asarray(blk["in_proj_b"], f32)
        return jnp.stack([ipb[:D], ipb[D:2 * D], ipb[2 * D:],
                          v(blk["out_proj_b"]),
                          v(blk["ln1_g"]), v(blk["ln1_b"]),
                          v(blk["ff2_b"]),
                          v(blk["ln2_g"]), v(blk["ln2_b"])])              # [9, D]

    qkv_w = jnp.stack([qkv_split(b_) for b_ in blocks]).astype(mxu_dtype)     # [L,3,D,D]
    ao_w = jnp.stack([t(b_["out_proj_w"]) for b_ in blocks]).astype(mxu_dtype)  # [L,D,D]
    ff1_w = jnp.stack([t(b_["ff1_w"]) for b_ in blocks]).astype(mxu_dtype)      # [L,D,2D]
    ff2_w = jnp.stack([t(b_["ff2_w"]) for b_ in blocks]).astype(mxu_dtype)      # [L,2D,D]
    ff1_b = jnp.stack([v(b_["ff1_b"]) for b_ in blocks])                        # [L,2D]
    lvec = jnp.stack([layer_vecs(b_) for b_ in blocks])                         # [L,9,D]

    # Fused dueling heads: [adv_hidden | val_hidden], block-diagonal 2nd layer.
    h1_w = jnp.concatenate([t(params["adv1_w"]), t(params["val1_w"])],
                           axis=1).astype(mxu_dtype)                            # [D, H1]
    H1 = h1_w.shape[1]
    Dh = params["adv1_w"].shape[0]
    h2_w = jnp.zeros((H1, A + 1), f32)
    h2_w = h2_w.at[:Dh, :A].set(t(params["adv2_w"]))
    h2_w = h2_w.at[Dh:, A:].set(t(params["val2_w"]))
    h2_w = h2_w.astype(mxu_dtype)                                               # [H1, A+1]
    W2 = max(H1, A + 1)
    h1_b = jnp.zeros((W2,), f32).at[:H1].set(
        jnp.concatenate([v(params["adv1_b"]), v(params["val1_b"])]))
    h2_b = jnp.zeros((W2,), f32).at[:A + 1].set(
        jnp.concatenate([v(params["adv2_b"]), v(params["val2_b"])]))
    hvec = jnp.stack([h1_b, h2_b])                                              # [2, W2]

    kernel_inputs = (x, pe_t, emb_w, evec, qkv_w, ao_w, ff1_w, ff2_w,
                     lvec, ff1_b, h1_w, h2_w, hvec)

    in_specs = [pl.BlockSpec((TB, S, Din), lambda i: (i, 0, 0))]
    for a in kernel_inputs[1:]:
        nd = a.ndim
        in_specs.append(pl.BlockSpec(a.shape, lambda i, nd=nd: (0,) * nd))

    # Explicit VMEM budget (scoped default is only 16/32 MiB); weights are
    # resident (and still double-buffered by default), the batch tile streams.
    resident = sum(int(a.size) * a.dtype.itemsize for a in kernel_inputs[1:])
    streamed = 2 * (TB * S * Din + TB * S * A) * 4
    vmem_limit = int(min(64 << 20, max(16 << 20,
                                       2 * resident + streamed + (4 << 20))))

    q = pl.pallas_call(
        _dqn_kernel,
        out_shape=jax.ShapeDtypeStruct((Bp, S * A), jnp.float32),
        grid=(Bp // TB,),
        in_specs=in_specs,
        out_specs=pl.BlockSpec((TB, S * A), lambda i: (i, 0)),
        compiler_params=pltpu.CompilerParams(
            dimension_semantics=("parallel",),
            vmem_limit_bytes=vmem_limit),
    )(*kernel_inputs)
    return q.reshape(Bp, S, A)[:B]


# ---------------------------------------------------------------------------
# Pure-JAX (non-Pallas) reference forward for parity checking.
# ---------------------------------------------------------------------------
def _reference_forward(x, params):
    f32 = jnp.float32
    hp = jax.lax.Precision.HIGHEST
    x = jnp.asarray(x, f32)
    _, S, _ = x.shape
    D = params["emb_w"].shape[0]

    def lin(h, w, b):
        return jnp.dot(h, jnp.asarray(w, f32).T, precision=hp) + jnp.asarray(b, f32)

    def ln(h, g, b, eps=1e-5):
        m = jnp.mean(h, -1, keepdims=True)
        c = h - m
        var = jnp.mean(c * c, -1, keepdims=True)
        return c / jnp.sqrt(var + eps) * g + b

    h = jax.nn.gelu(ln(lin(x, params["emb_w"], params["emb_b"]),
                       params["emb_ln_g"], params["emb_ln_b"]), approximate=False)
    h = h + _positional_encoding(S, D)
    for blk in params["blocks"]:
        qkv = lin(h, blk["in_proj_w"], blk["in_proj_b"])
        q, k, vv = qkv[..., :D], qkv[..., D:2 * D], qkv[..., 2 * D:]
        s = jnp.einsum('bqd,bkd->bqk', q, k, precision=hp) / jnp.sqrt(float(D))
        p = jax.nn.softmax(s, axis=-1)
        ctx = jnp.einsum('bqk,bkd->bqd', p, vv, precision=hp)
        a = lin(ctx, blk["out_proj_w"], blk["out_proj_b"])
        h = ln(h + a, blk["ln1_g"], blk["ln1_b"])
        f = lin(jax.nn.gelu(lin(h, blk["ff1_w"], blk["ff1_b"]), approximate=False),
                blk["ff2_w"], blk["ff2_b"])
        h = ln(h + f, blk["ln2_g"], blk["ln2_b"])
    adv = lin(jnp.maximum(lin(h, params["adv1_w"], params["adv1_b"]), 0.0),
              params["adv2_w"], params["adv2_b"])
    val = lin(jnp.maximum(lin(h, params["val1_w"], params["val1_b"]), 0.0),
              params["val2_w"], params["val2_b"])
    return val + adv - jnp.mean(adv, axis=-1, keepdims=True)


# ---------------------------------------------------------------------------
# Deterministic synthetic parameters mimicking the PyTorch module shapes.
# ---------------------------------------------------------------------------
def init_params(key, input_dim, action_dim, num_layers):
    D = input_dim
    Dh = D // 2
    keys = iter(jax.random.split(key, 64))
    f32 = jnp.float32

    def linear(out_d, in_d):
        bound = float(in_d) ** -0.5
        w = jax.random.uniform(next(keys), (out_d, in_d), f32, -bound, bound)
        b = jax.random.uniform(next(keys), (out_d,), f32, -bound, bound)
        return w, b

    emb_w, emb_b = linear(D, D)

    blocks = []
    for _ in range(num_layers):
        xavier = (6.0 / (4.0 * D)) ** 0.5
        in_proj_w = jax.random.uniform(next(keys), (3 * D, D), f32, -xavier, xavier)
        in_proj_b = jnp.zeros((3 * D,), f32)
        out_proj_w, out_proj_b = linear(D, D)
        ff1_w, ff1_b = linear(2 * D, D)
        ff2_w, ff2_b = linear(D, 2 * D)
        blocks.append(dict(
            in_proj_w=in_proj_w, in_proj_b=in_proj_b,
            out_proj_w=out_proj_w, out_proj_b=out_proj_b,
            ln1_g=jnp.ones((D,), f32), ln1_b=jnp.zeros((D,), f32),
            ff1_w=ff1_w, ff1_b=ff1_b, ff2_w=ff2_w, ff2_b=ff2_b,
            ln2_g=jnp.ones((D,), f32), ln2_b=jnp.zeros((D,), f32)))

    adv1_w, adv1_b = linear(Dh, D)
    adv2_w, adv2_b = linear(action_dim, Dh)
    val1_w, val1_b = linear(Dh, D)
    val2_w, val2_b = linear(1, Dh)

    return {
        "emb_w": emb_w, "emb_b": emb_b,
        "emb_ln_g": jnp.ones((D,), f32), "emb_ln_b": jnp.zeros((D,), f32),
        "blocks": blocks,
        "adv1_w": adv1_w, "adv1_b": adv1_b, "adv2_w": adv2_w, "adv2_b": adv2_b,
        "val1_w": val1_w, "val1_b": val1_b, "val2_w": val2_w, "val2_b": val2_b,
    }


if __name__ == "__main__":
    input_dim = 32          # embed_dim == input_dim in the module
    action_dim = 4
    seq_len = 8
    num_layers = 2
    batch = 8

    key = jax.random.PRNGKey(0)
    k_x, k_p = jax.random.split(key)
    x = jax.random.normal(k_x, (batch, seq_len, input_dim), dtype=jnp.float32)
    params = init_params(k_p, input_dim, action_dim, num_layers)

    # f32 MXU operands (parity reference path).
    q_f32 = enhanced_transformer_dqn_forward(x, params, mxu_dtype=jnp.float32)
    # bf16 MXU operands (recommended v6e/v7x config; f32 accumulation, f32
    # LayerNorm / softmax / GELU math).
    q_bf16 = enhanced_transformer_dqn_forward(x, params, mxu_dtype=jnp.bfloat16)
    q_ref = _reference_forward(x, params)
    jax.block_until_ready((q_f32, q_bf16, q_ref))

    assert q_f32.shape == (batch, seq_len, action_dim)
    assert q_bf16.shape == (batch, seq_len, action_dim)
    assert bool(jnp.all(jnp.isfinite(q_f32)))
    assert bool(jnp.all(jnp.isfinite(q_bf16)))
    err = float(jnp.max(jnp.abs(q_f32 - q_ref)))
    assert err < 5e-2, f"f32 path parity error too large: {err}"
    print("KERNEL_OK")
</pallas_src>

<mosaic_0001>
module attributes {stable_mosaic.version = 11 : i64} {
  func.func @_dqn_kernel(%arg0: i32, %arg1: memref<8x8x32xf32, #tpu.memory_space<vmem>>, %arg2: memref<64x32xf32, #tpu.memory_space<vmem>>, %arg3: memref<32x32xf32, #tpu.memory_space<vmem>>, %arg4: memref<3x32xf32, #tpu.memory_space<vmem>>, %arg5: memref<2x3x32x32xf32, #tpu.memory_space<vmem>>, %arg6: memref<2x32x32xf32, #tpu.memory_space<vmem>>, %arg7: memref<2x32x64xf32, #tpu.memory_space<vmem>>, %arg8: memref<2x64x32xf32, #tpu.memory_space<vmem>>, %arg9: memref<2x9x32xf32, #tpu.memory_space<vmem>>, %arg10: memref<2x64xf32, #tpu.memory_space<vmem>>, %arg11: memref<32x32xf32, #tpu.memory_space<vmem>>, %arg12: memref<32x5xf32, #tpu.memory_space<vmem>>, %arg13: memref<2x32xf32, #tpu.memory_space<vmem>>, %arg14: memref<8x32xf32, #tpu.memory_space<vmem>>) attributes {dimension_semantics = [#tpu.dimension_semantics<parallel>], iteration_bounds = array<i64: 1>, scalar_prefetch = 0 : i64, scratch_operands = 0 : i64, tpu.core_type = #tpu.core_type<tc>, window_params = [{transform_indices = @transform_0, window_bounds = array<i64: 8, 8, 32>}, {pipeline_mode = #tpu.pipeline_mode<synchronous>, transform_indices = @transform_1, window_bounds = array<i64: 64, 32>}, {pipeline_mode = #tpu.pipeline_mode<synchronous>, transform_indices = @transform_2, window_bounds = array<i64: 32, 32>}, {pipeline_mode = #tpu.pipeline_mode<synchronous>, transform_indices = @transform_3, window_bounds = array<i64: 3, 32>}, {pipeline_mode = #tpu.pipeline_mode<synchronous>, transform_indices = @transform_4, window_bounds = array<i64: 2, 3, 32, 32>}, {pipeline_mode = #tpu.pipeline_mode<synchronous>, transform_indices = @transform_5, window_bounds = array<i64: 2, 32, 32>}, {pipeline_mode = #tpu.pipeline_mode<synchronous>, transform_indices = @transform_6, window_bounds = array<i64: 2, 32, 64>}, {pipeline_mode = #tpu.pipeline_mode<synchronous>, transform_indices = @transform_7, window_bounds = array<i64: 2, 64, 32>}, {pipeline_mode = #tpu.pipeline_mode<synchronous>, transform_indices = @transform_8, window_bounds = array<i64: 2, 9, 32>}, {pipeline_mode = #tpu.pipeline_mode<synchronous>, transform_indices = @transform_9, window_bounds = array<i64: 2, 64>}, {pipeline_mode = #tpu.pipeline_mode<synchronous>, transform_indices = @transform_10, window_bounds = array<i64: 32, 32>}, {pipeline_mode = #tpu.pipeline_mode<synchronous>, transform_indices = @transform_11, window_bounds = array<i64: 32, 5>}, {pipeline_mode = #tpu.pipeline_mode<synchronous>, transform_indices = @transform_12, window_bounds = array<i64: 2, 32>}, {transform_indices = @transform_13, window_bounds = array<i64: 8, 32>}]} {
    %c0 = arith.constant 0 : index
    %c0_0 = arith.constant 0 : index
    %c0_1 = arith.constant 0 : index
    %0 = vector.load %arg1[%c0, %c0_0, %c0_1] : memref<8x8x32xf32, #tpu.memory_space<vmem>>, vector<8x8x32xf32>
    %1 = vector.shape_cast %0 : vector<8x8x32xf32> to vector<64x32xf32>
    %c0_2 = arith.constant 0 : index
    %c0_3 = arith.constant 0 : index
    %2 = vector.load %arg3[%c0_2, %c0_3] : memref<32x32xf32, #tpu.memory_space<vmem>>, vector<32x32xf32>
    %c0_4 = arith.constant 0 : index
    %c0_5 = arith.constant 0 : index
    %3 = vector.load %arg4[%c0_4, %c0_5] : memref<3x32xf32, #tpu.memory_space<vmem>>, vector<1x32xf32>
    %4 = vector.shape_cast %3 : vector<1x32xf32> to vector<32xf32>
    %cst = arith.constant dense<0.000000e+00> : vector<64x32xf32>
    %5 = tpu.matmul %1, %2, %cst {dimension_numbers = #tpu.dot_dimension_numbers<[1], [0], [0], [1], [0, 0, 1, 1], [], []>} : vector<64x32xf32>, vector<32x32xf32>, vector<64x32xf32> -> vector<64x32xf32>
    %6 = vector.shape_cast %4 : vector<32xf32> to vector<1x32xf32>
    %7 = vector.broadcast %6 : vector<1x32xf32> to vector<64x32xf32>
    %8 = arith.addf %5, %7 : vector<64x32xf32>
    %c1 = arith.constant 1 : index
    %c0_6 = arith.constant 0 : index
    %9 = vector.load %arg4[%c1, %c0_6] : memref<3x32xf32, #tpu.memory_space<vmem>>, vector<1x32xf32>
    %10 = vector.shape_cast %9 : vector<1x32xf32> to vector<32xf32>
    %c2 = arith.constant 2 : index
    %c0_7 = arith.constant 0 : index
    %11 = vector.load %arg4[%c2, %c0_7] : memref<3x32xf32, #tpu.memory_space<vmem>>, vector<1x32xf32>
    %12 = vector.shape_cast %11 : vector<1x32xf32> to vector<32xf32>
    %cst_8 = arith.constant dense<0.000000e+00> : vector<64xf32>
    %13 = vector.multi_reduction <add>, %8, %cst_8 [1] : vector<64x32xf32> to vector<64xf32>
    %14 = vector.shape_cast %13 : vector<64xf32> to vector<64x1xf32>
    %cst_9 = arith.constant 3.200000e+01 : f32
    %15 = vector.broadcast %cst_9 : f32 to vector<64x1xf32>
    %16 = arith.divf %14, %15 : vector<64x1xf32>
    %17 = vector.broadcast %16 : vector<64x1xf32> to vector<64x32xf32>
    %18 = arith.subf %8, %17 : vector<64x32xf32>
    %19 = arith.mulf %18, %18 : vector<64x32xf32>
    %cst_10 = arith.constant dense<0.000000e+00> : vector<64xf32>
    %20 = vector.multi_reduction <add>, %19, %cst_10 [1] : vector<64x32xf32> to vector<64xf32>
    %21 = vector.shape_cast %20 : vector<64xf32> to vector<64x1xf32>
    %cst_11 = arith.constant 3.200000e+01 : f32
    %22 = vector.broadcast %cst_11 : f32 to vector<64x1xf32>
    %23 = arith.divf %21, %22 : vector<64x1xf32>
    %cst_12 = arith.constant 9.99999974E-6 : f32
    %24 = vector.broadcast %cst_12 : f32 to vector<64x1xf32>
    %25 = arith.addf %23, %24 : vector<64x1xf32>
    %26 = math.rsqrt %25 : vector<64x1xf32>
    %27 = vector.broadcast %26 : vector<64x1xf32> to vector<64x32xf32>
    %28 = arith.mulf %18, %27 : vector<64x32xf32>
    %29 = vector.shape_cast %10 : vector<32xf32> to vector<1x32xf32>
    %30 = vector.broadcast %29 : vector<1x32xf32> to vector<64x32xf32>
    %31 = arith.mulf %28, %30 : vector<64x32xf32>
    %32 = vector.shape_cast %12 : vector<32xf32> to vector<1x32xf32>
    %33 = vector.broadcast %32 : vector<1x32xf32> to vector<64x32xf32>
    %34 = arith.addf %31, %33 : vector<64x32xf32>
    %cst_13 = arith.constant 5.000000e-01 : f32
    %35 = vector.broadcast %cst_13 : f32 to vector<64x32xf32>
    %36 = arith.mulf %35, %34 : vector<64x32xf32>
    %cst_14 = arith.constant 0.707106769 : f32
    %37 = vector.broadcast %cst_14 : f32 to vector<64x32xf32>
    %38 = arith.mulf %34, %37 : vector<64x32xf32>
    %39 = math.absf %38 : vector<64x32xf32>
    %cst_15 = arith.constant 0.327591091 : f32
    %40 = vector.broadcast %cst_15 : f32 to vector<64x32xf32>
    %41 = arith.mulf %40, %39 : vector<64x32xf32>
    %cst_16 = arith.constant 1.000000e+00 : f32
    %42 = vector.broadcast %cst_16 : f32 to vector<64x32xf32>
    %43 = arith.addf %42, %41 : vector<64x32xf32>
    %cst_17 = arith.constant 1.000000e+00 : f32
    %44 = vector.broadcast %cst_17 : f32 to vector<64x32xf32>
    %45 = arith.divf %44, %43 : vector<64x32xf32>
    %cst_18 = arith.constant 1.06140542 : f32
    %46 = vector.broadcast %cst_18 : f32 to vector<64x32xf32>
    %47 = arith.mulf %46, %45 : vector<64x32xf32>
    %cst_19 = arith.constant 1.45315206 : f32
    %48 = vector.broadcast %cst_19 : f32 to vector<64x32xf32>
    %49 = arith.subf %47, %48 : vector<64x32xf32>
    %50 = arith.mulf %49, %45 : vector<64x32xf32>
    %cst_20 = arith.constant 1.42141378 : f32
    %51 = vector.broadcast %cst_20 : f32 to vector<64x32xf32>
    %52 = arith.addf %50, %51 : vector<64x32xf32>
    %53 = arith.mulf %52, %45 : vector<64x32xf32>
    %cst_21 = arith.constant 0.284496725 : f32
    %54 = vector.broadcast %cst_21 : f32 to vector<64x32xf32>
    %55 = arith.subf %53, %54 : vector<64x32xf32>
    %56 = arith.mulf %55, %45 : vector<64x32xf32>
    %cst_22 = arith.constant 0.254829586 : f32
    %57 = vector.broadcast %cst_22 : f32 to vector<64x32xf32>
    %58 = arith.addf %56, %57 : vector<64x32xf32>
    %59 = arith.mulf %58, %45 : vector<64x32xf32>
    %60 = arith.mulf %39, %39 : vector<64x32xf32>
    %cst_23 = arith.constant 0.000000e+00 : f32
    %61 = vector.broadcast %cst_23 : f32 to vector<64x32xf32>
    %62 = arith.subf %61, %60 : vector<64x32xf32>
    %63 = math.exp %62 : vector<64x32xf32>
    %64 = arith.mulf %59, %63 : vector<64x32xf32>
    %cst_24 = arith.constant 1.000000e+00 : f32
    %65 = vector.broadcast %cst_24 : f32 to vector<64x32xf32>
    %66 = arith.subf %65, %64 : vector<64x32xf32>
    %cst_25 = arith.constant 0.000000e+00 : f32
    %67 = vector.broadcast %cst_25 : f32 to vector<64x32xf32>
    %68 = arith.cmpf olt, %38, %67 : vector<64x32xf32>
    %cst_26 = arith.constant 0.000000e+00 : f32
    %69 = vector.broadcast %cst_26 : f32 to vector<64x32xf32>
    %70 = arith.subf %69, %66 : vector<64x32xf32>
    %71 = arith.select %68, %70, %66 : vector<64x32xi1>, vector<64x32xf32>
    %cst_27 = arith.constant 1.000000e+00 : f32
    %72 = vector.broadcast %cst_27 : f32 to vector<64x32xf32>
    %73 = arith.addf %72, %71 : vector<64x32xf32>
    %74 = arith.mulf %36, %73 : vector<64x32xf32>
    %c0_28 = arith.constant 0 : index
    %c0_29 = arith.constant 0 : index
    %75 = vector.load %arg2[%c0_28, %c0_29] : memref<64x32xf32, #tpu.memory_space<vmem>>, vector<64x32xf32>
    %76 = arith.addf %74, %75 : vector<64x32xf32>
    %c0_30 = arith.constant 0 : index
    %c0_31 = arith.constant 0 : index
    %c0_32 = arith.constant 0 : index
    %77 = vector.load %arg9[%c0_30, %c0_31, %c0_32] : memref<2x9x32xf32, #tpu.memory_space<vmem>>, vector<1x1x32xf32>
    %78 = vector.shape_cast %77 : vector<1x1x32xf32> to vector<32xf32>
    %c0_33 = arith.constant 0 : index
    %c1_34 = arith.constant 1 : index
    %c0_35 = arith.constant 0 : index
    %79 = vector.load %arg9[%c0_33, %c1_34, %c0_35] : memref<2x9x32xf32, #tpu.memory_space<vmem>>, vector<1x1x32xf32>
    %80 = vector.shape_cast %79 : vector<1x1x32xf32> to vector<32xf32>
    %c0_36 = arith.constant 0 : index
    %c2_37 = arith.constant 2 : index
    %c0_38 = arith.constant 0 : index
    %81 = vector.load %arg9[%c0_36, %c2_37, %c0_38] : memref<2x9x32xf32, #tpu.memory_space<vmem>>, vector<1x1x32xf32>
    %82 = vector.shape_cast %81 : vector<1x1x32xf32> to vector<32xf32>
    %c0_39 = arith.constant 0 : index
    %c3 = arith.constant 3 : index
    %c0_40 = arith.constant 0 : index
    %83 = vector.load %arg9[%c0_39, %c3, %c0_40] : memref<2x9x32xf32, #tpu.memory_space<vmem>>, vector<1x1x32xf32>
    %84 = vector.shape_cast %83 : vector<1x1x32xf32> to vector<32xf32>
    %c0_41 = arith.constant 0 : index
    %c4 = arith.constant 4 : index
    %c0_42 = arith.constant 0 : index
    %85 = vector.load %arg9[%c0_41, %c4, %c0_42] : memref<2x9x32xf32, #tpu.memory_space<vmem>>, vector<1x1x32xf32>
    %86 = vector.shape_cast %85 : vector<1x1x32xf32> to vector<32xf32>
    %c0_43 = arith.constant 0 : index
    %c5 = arith.constant 5 : index
    %c0_44 = arith.constant 0 : index
    %87 = vector.load %arg9[%c0_43, %c5, %c0_44] : memref<2x9x32xf32, #tpu.memory_space<vmem>>, vector<1x1x32xf32>
    %88 = vector.shape_cast %87 : vector<1x1x32xf32> to vector<32xf32>
    %c0_45 = arith.constant 0 : index
    %c6 = arith.constant 6 : index
    %c0_46 = arith.constant 0 : index
    %89 = vector.load %arg9[%c0_45, %c6, %c0_46] : memref<2x9x32xf32, #tpu.memory_space<vmem>>, vector<1x1x32xf32>
    %90 = vector.shape_cast %89 : vector<1x1x32xf32> to vector<32xf32>
    %c0_47 = arith.constant 0 : index
    %c7 = arith.constant 7 : index
    %c0_48 = arith.constant 0 : index
    %91 = vector.load %arg9[%c0_47, %c7, %c0_48] : memref<2x9x32xf32, #tpu.memory_space<vmem>>, vector<1x1x32xf32>
    %92 = vector.shape_cast %91 : vector<1x1x32xf32> to vector<32xf32>
    %c0_49 = arith.constant 0 : index
    %c8 = arith.constant 8 : index
    %c0_50 = arith.constant 0 : index
    %93 = vector.load %arg9[%c0_49, %c8, %c0_50] : memref<2x9x32xf32, #tpu.memory_space<vmem>>, vector<1x1x32xf32>
    %94 = vector.shape_cast %93 : vector<1x1x32xf32> to vector<32xf32>
    %c0_51 = arith.constant 0 : index
    %c0_52 = arith.constant 0 : index
    %c0_53 = arith.constant 0 : index
    %c0_54 = arith.constant 0 : index
    %95 = vector.load %arg5[%c0_51, %c0_52, %c0_53, %c0_54] : memref<2x3x32x32xf32, #tpu.memory_space<vmem>>, vector<1x1x32x32xf32>
    %96 = vector.shape_cast %95 : vector<1x1x32x32xf32> to vector<32x32xf32>
    %cst_55 = arith.constant dense<0.000000e+00> : vector<64x32xf32>
    %97 = tpu.matmul %76, %96, %cst_55 {dimension_numbers = #tpu.dot_dimension_numbers<[1], [0], [0], [1], [0, 0, 1, 1], [], []>} : vector<64x32xf32>, vector<32x32xf32>, vector<64x32xf32> -> vector<64x32xf32>
    %98 = vector.shape_cast %78 : vector<32xf32> to vector<1x32xf32>
    %99 = vector.broadcast %98 : vector<1x32xf32> to vector<64x32xf32>
    %100 = arith.addf %97, %99 : vector<64x32xf32>
    %101 = vector.shape_cast %100 : vector<64x32xf32> to vector<8x8x32xf32>
    %c0_56 = arith.constant 0 : index
    %c1_57 = arith.constant 1 : index
    %c0_58 = arith.constant 0 : index
    %c0_59 = arith.constant 0 : index
    %102 = vector.load %arg5[%c0_56, %c1_57, %c0_58, %c0_59] : memref<2x3x32x32xf32, #tpu.memory_space<vmem>>, vector<1x1x32x32xf32>
    %103 = vector.shape_cast %102 : vector<1x1x32x32xf32> to vector<32x32xf32>
    %cst_60 = arith.constant dense<0.000000e+00> : vector<64x32xf32>
    %104 = tpu.matmul %76, %103, %cst_60 {dimension_numbers = #tpu.dot_dimension_numbers<[1], [0], [0], [1], [0, 0, 1, 1], [], []>} : vector<64x32xf32>, vector<32x32xf32>, vector<64x32xf32> -> vector<64x32xf32>
    %105 = vector.shape_cast %80 : vector<32xf32> to vector<1x32xf32>
    %106 = vector.broadcast %105 : vector<1x32xf32> to vector<64x32xf32>
    %107 = arith.addf %104, %106 : vector<64x32xf32>
    %108 = vector.shape_cast %107 : vector<64x32xf32> to vector<8x8x32xf32>
    %c0_61 = arith.constant 0 : index
    %c2_62 = arith.constant 2 : index
    %c0_63 = arith.constant 0 : index
    %c0_64 = arith.constant 0 : index
    %109 = vector.load %arg5[%c0_61, %c2_62, %c0_63, %c0_64] : memref<2x3x32x32xf32, #tpu.memory_space<vmem>>, vector<1x1x32x32xf32>
    %110 = vector.shape_cast %109 : vector<1x1x32x32xf32> to vector<32x32xf32>
    %cst_65 = arith.constant dense<0.000000e+00> : vector<64x32xf32>
    %111 = tpu.matmul %76, %110, %cst_65 {dimension_numbers = #tpu.dot_dimension_numbers<[1], [0], [0], [1], [0, 0, 1, 1], [], []>} : vector<64x32xf32>, vector<32x32xf32>, vector<64x32xf32> -> vector<64x32xf32>
    %112 = vector.shape_cast %82 : vector<32xf32> to vector<1x32xf32>
    %113 = vector.broadcast %112 : vector<1x32xf32> to vector<64x32xf32>
    %114 = arith.addf %111, %113 : vector<64x32xf32>
    %115 = vector.shape_cast %114 : vector<64x32xf32> to vector<8x8x32xf32>
    "tpu.trace_start"() <{level = 10 : i32, message = "bqd,bkd->bqk"}> : () -> ()
    %cst_66 = arith.constant dense<0.000000e+00> : vector<8x8x8xf32>
    %116 = tpu.matmul %101, %108, %cst_66 {dimension_numbers = #tpu.dot_dimension_numbers<[2], [2], [1], [1], [0, 0, 0, 1, 1, 1], [0], [0]>} : vector<8x8x32xf32>, vector<8x8x32xf32>, vector<8x8x8xf32> -> vector<8x8x8xf32>
    "tpu.trace_stop"() : () -> ()
    %cst_67 = arith.constant 0.176776692 : f32
    %117 = vector.broadcast %cst_67 : f32 to vector<8x8x8xf32>
    %118 = arith.mulf %116, %117 : vector<8x8x8xf32>
    %cst_68 = arith.constant dense<0xFF800000> : vector<8x8xf32>
    %119 = vector.multi_reduction <maximumf>, %118, %cst_68 [2] : vector<8x8x8xf32> to vector<8x8xf32>
    %120 = vector.shape_cast %119 : vector<8x8xf32> to vector<8x8x1xf32>
    %121 = vector.broadcast %120 : vector<8x8x1xf32> to vector<8x8x8xf32>
    %122 = arith.subf %118, %121 : vector<8x8x8xf32>
    %123 = math.exp %122 : vector<8x8x8xf32>
    %cst_69 = arith.constant dense<0.000000e+00> : vector<8x8xf32>
    %124 = vector.multi_reduction <add>, %123, %cst_69 [2] : vector<8x8x8xf32> to vector<8x8xf32>
    %125 = vector.shape_cast %124 : vector<8x8xf32> to vector<8x8x1xf32>
    %126 = tpu.reciprocal %125 {approx = true} : vector<8x8x1xf32> -> vector<8x8x1xf32>
    %127 = vector.broadcast %126 : vector<8x8x1xf32> to vector<8x8x8xf32>
    %128 = arith.mulf %123, %127 : vector<8x8x8xf32>
    "tpu.trace_start"() <{level = 10 : i32, message = "bqk,bkd->bqd"}> : () -> ()
    %cst_70 = arith.constant dense<0.000000e+00> : vector<8x8x32xf32>
    %129 = tpu.matmul %128, %115, %cst_70 {dimension_numbers = #tpu.dot_dimension_numbers<[2], [1], [1], [2], [0, 0, 0, 1, 1, 2], [0], [0]>} : vector<8x8x8xf32>, vector<8x8x32xf32>, vector<8x8x32xf32> -> vector<8x8x32xf32>
    "tpu.trace_stop"() : () -> ()
    %130 = vector.shape_cast %129 : vector<8x8x32xf32> to vector<64x32xf32>
    %c0_71 = arith.constant 0 : index
    %c0_72 = arith.constant 0 : index
    %c0_73 = arith.constant 0 : index
    %131 = vector.load %arg6[%c0_71, %c0_72, %c0_73] : memref<2x32x32xf32, #tpu.memory_space<vmem>>, vector<1x32x32xf32>
    %132 = vector.shape_cast %131 : vector<1x32x32xf32> to vector<32x32xf32>
    %cst_74 = arith.constant dense<0.000000e+00> : vector<64x32xf32>
    %133 = tpu.matmul %130, %132, %cst_74 {dimension_numbers = #tpu.dot_dimension_numbers<[1], [0], [0], [1], [0, 0, 1, 1], [], []>} : vector<64x32xf32>, vector<32x32xf32>, vector<64x32xf32> -> vector<64x32xf32>
    %134 = vector.shape_cast %84 : vector<32xf32> to vector<1x32xf32>
    %135 = vector.broadcast %134 : vector<1x32xf32> to vector<64x32xf32>
    %136 = arith.addf %133, %135 : vector<64x32xf32>
    %137 = arith.addf %76, %136 : vector<64x32xf32>
    %cst_75 = arith.constant dense<0.000000e+00> : vector<64xf32>
    %138 = vector.multi_reduction <add>, %137, %cst_75 [1] : vector<64x32xf32> to vector<64xf32>
    %139 = vector.shape_cast %138 : vector<64xf32> to vector<64x1xf32>
    %cst_76 = arith.constant 3.200000e+01 : f32
    %140 = vector.broadcast %cst_76 : f32 to vector<64x1xf32>
    %141 = arith.divf %139, %140 : vector<64x1xf32>
    %142 = vector.broadcast %141 : vector<64x1xf32> to vector<64x32xf32>
    %143 = arith.subf %137, %142 : vector<64x32xf32>
    %144 = arith.mulf %143, %143 : vector<64x32xf32>
    %cst_77 = arith.constant dense<0.000000e+00> : vector<64xf32>
    %145 = vector.multi_reduction <add>, %144, %cst_77 [1] : vector<64x32xf32> to vector<64xf32>
    %146 = vector.shape_cast %145 : vector<64xf32> to vector<64x1xf32>
    %cst_78 = arith.constant 3.200000e+01 : f32
    %147 = vector.broadcast %cst_78 : f32 to vector<64x1xf32>
    %148 = arith.divf %146, %147 : vector<64x1xf32>
    %cst_79 = arith.constant 9.99999974E-6 : f32
    %149 = vector.broadcast %cst_79 : f32 to vector<64x1xf32>
    %150 = arith.addf %148, %149 : vector<64x1xf32>
    %151 = math.rsqrt %150 : vector<64x1xf32>
    %152 = vector.broadcast %151 : vector<64x1xf32> to vector<64x32xf32>
    %153 = arith.mulf %143, %152 : vector<64x32xf32>
    %154 = vector.shape_cast %86 : vector<32xf32> to vector<1x32xf32>
    %155 = vector.broadcast %154 : vector<1x32xf32> to vector<64x32xf32>
    %156 = arith.mulf %153, %155 : vector<64x32xf32>
    %157 = vector.shape_cast %88 : vector<32xf32> to vector<1x32xf32>
    %158 = vector.broadcast %157 : vector<1x32xf32> to vector<64x32xf32>
    %159 = arith.addf %156, %158 : vector<64x32xf32>
    %c0_80 = arith.constant 0 : index
    %c0_81 = arith.constant 0 : index
    %c0_82 = arith.constant 0 : index
    %160 = vector.load %arg7[%c0_80, %c0_81, %c0_82] : memref<2x32x64xf32, #tpu.memory_space<vmem>>, vector<1x32x64xf32>
    %161 = vector.shape_cast %160 : vector<1x32x64xf32> to vector<32x64xf32>
    %c0_83 = arith.constant 0 : index
    %c0_84 = arith.constant 0 : index
    %162 = vector.load %arg10[%c0_83, %c0_84] : memref<2x64xf32, #tpu.memory_space<vmem>>, vector<1x64xf32>
    %163 = vector.shape_cast %162 : vector<1x64xf32> to vector<64xf32>
    %cst_85 = arith.constant dense<0.000000e+00> : vector<64x64xf32>
    %164 = tpu.matmul %159, %161, %cst_85 {dimension_numbers = #tpu.dot_dimension_numbers<[1], [0], [0], [1], [0, 0, 1, 1], [], []>} : vector<64x32xf32>, vector<32x64xf32>, vector<64x64xf32> -> vector<64x64xf32>
    %165 = vector.shape_cast %163 : vector<64xf32> to vector<1x64xf32>
    %166 = vector.broadcast %165 : vector<1x64xf32> to vector<64x64xf32>
    %167 = arith.addf %164, %166 : vector<64x64xf32>
    %cst_86 = arith.constant 5.000000e-01 : f32
    %168 = vector.broadcast %cst_86 : f32 to vector<64x64xf32>
    %169 = arith.mulf %168, %167 : vector<64x64xf32>
    %cst_87 = arith.constant 0.707106769 : f32
    %170 = vector.broadcast %cst_87 : f32 to vector<64x64xf32>
    %171 = arith.mulf %167, %170 : vector<64x64xf32>
    %172 = math.absf %171 : vector<64x64xf32>
    %cst_88 = arith.constant 0.327591091 : f32
    %173 = vector.broadcast %cst_88 : f32 to vector<64x64xf32>
    %174 = arith.mulf %173, %172 : vector<64x64xf32>
    %cst_89 = arith.constant 1.000000e+00 : f32
    %175 = vector.broadcast %cst_89 : f32 to vector<64x64xf32>
    %176 = arith.addf %175, %174 : vector<64x64xf32>
    %cst_90 = arith.constant 1.000000e+00 : f32
    %177 = vector.broadcast %cst_90 : f32 to vector<64x64xf32>
    %178 = arith.divf %177, %176 : vector<64x64xf32>
    %cst_91 = arith.constant 1.06140542 : f32
    %179 = vector.broadcast %cst_91 : f32 to vector<64x64xf32>
    %180 = arith.mulf %179, %178 : vector<64x64xf32>
    %cst_92 = arith.constant 1.45315206 : f32
    %181 = vector.broadcast %cst_92 : f32 to vector<64x64xf32>
    %182 = arith.subf %180, %181 : vector<64x64xf32>
    %183 = arith.mulf %182, %178 : vector<64x64xf32>
    %cst_93 = arith.constant 1.42141378 : f32
    %184 = vector.broadcast %cst_93 : f32 to vector<64x64xf32>
    %185 = arith.addf %183, %184 : vector<64x64xf32>
    %186 = arith.mulf %185, %178 : vector<64x64xf32>
    %cst_94 = arith.constant 0.284496725 : f32
    %187 = vector.broadcast %cst_94 : f32 to vector<64x64xf32>
    %188 = arith.subf %186, %187 : vector<64x64xf32>
    %189 = arith.mulf %188, %178 : vector<64x64xf32>
    %cst_95 = arith.constant 0.254829586 : f32
    %190 = vector.broadcast %cst_95 : f32 to vector<64x64xf32>
    %191 = arith.addf %189, %190 : vector<64x64xf32>
    %192 = arith.mulf %191, %178 : vector<64x64xf32>
    %193 = arith.mulf %172, %172 : vector<64x64xf32>
    %cst_96 = arith.constant 0.000000e+00 : f32
    %194 = vector.broadcast %cst_96 : f32 to vector<64x64xf32>
    %195 = arith.subf %194, %193 : vector<64x64xf32>
    %196 = math.exp %195 : vector<64x64xf32>
    %197 = arith.mulf %192, %196 : vector<64x64xf32>
    %cst_97 = arith.constant 1.000000e+00 : f32
    %198 = vector.broadcast %cst_97 : f32 to vector<64x64xf32>
    %199 = arith.subf %198, %197 : vector<64x64xf32>
    %cst_98 = arith.constant 0.000000e+00 : f32
    %200 = vector.broadcast %cst_98 : f32 to vector<64x64xf32>
    %201 = arith.cmpf olt, %171, %200 : vector<64x64xf32>
    %cst_99 = arith.constant 0.000000e+00 : f32
    %202 = vector.broadcast %cst_99 : f32 to vector<64x64xf32>
    %203 = arith.subf %202, %199 : vector<64x64xf32>
    %204 = arith.select %201, %203, %199 : vector<64x64xi1>, vector<64x64xf32>
    %cst_100 = arith.constant 1.000000e+00 : f32
    %205 = vector.broadcast %cst_100 : f32 to vector<64x64xf32>
    %206 = arith.addf %205, %204 : vector<64x64xf32>
    %207 = arith.mulf %169, %206 : vector<64x64xf32>
    %c0_101 = arith.constant 0 : index
    %c0_102 = arith.constant 0 : index
    %c0_103 = arith.constant 0 : index
    %208 = vector.load %arg8[%c0_101, %c0_102, %c0_103] : memref<2x64x32xf32, #tpu.memory_space<vmem>>, vector<1x64x32xf32>
    %209 = vector.shape_cast %208 : vector<1x64x32xf32> to vector<64x32xf32>
    %cst_104 = arith.constant dense<0.000000e+00> : vector<64x32xf32>
    %210 = tpu.matmul %207, %209, %cst_104 {dimension_numbers = #tpu.dot_dimension_numbers<[1], [0], [0], [1], [0, 0, 1, 1], [], []>} : vector<64x64xf32>, vector<64x32xf32>, vector<64x32xf32> -> vector<64x32xf32>
    %211 = vector.shape_cast %90 : vector<32xf32> to vector<1x32xf32>
    %212 = vector.broadcast %211 : vector<1x32xf32> to vector<64x32xf32>
    %213 = arith.addf %210, %212 : vector<64x32xf32>
    %214 = arith.addf %159, %213 : vector<64x32xf32>
    %cst_105 = arith.constant dense<0.000000e+00> : vector<64xf32>
    %215 = vector.multi_reduction <add>, %214, %cst_105 [1] : vector<64x32xf32> to vector<64xf32>
    %216 = vector.shape_cast %215 : vector<64xf32> to vector<64x1xf32>
    %cst_106 = arith.constant 3.200000e+01 : f32
    %217 = vector.broadcast %cst_106 : f32 to vector<64x1xf32>
    %218 = arith.divf %216, %217 : vector<64x1xf32>
    %219 = vector.broadcast %218 : vector<64x1xf32> to vector<64x32xf32>
    %220 = arith.subf %214, %219 : vector<64x32xf32>
    %221 = arith.mulf %220, %220 : vector<64x32xf32>
    %cst_107 = arith.constant dense<0.000000e+00> : vector<64xf32>
    %222 = vector.multi_reduction <add>, %221, %cst_107 [1] : vector<64x32xf32> to vector<64xf32>
    %223 = vector.shape_cast %222 : vector<64xf32> to vector<64x1xf32>
    %cst_108 = arith.constant 3.200000e+01 : f32
    %224 = vector.broadcast %cst_108 : f32 to vector<64x1xf32>
    %225 = arith.divf %223, %224 : vector<64x1xf32>
    %cst_109 = arith.constant 9.99999974E-6 : f32
    %226 = vector.broadcast %cst_109 : f32 to vector<64x1xf32>
    %227 = arith.addf %225, %226 : vector<64x1xf32>
    %228 = math.rsqrt %227 : vector<64x1xf32>
    %229 = vector.broadcast %228 : vector<64x1xf32> to vector<64x32xf32>
    %230 = arith.mulf %220, %229 : vector<64x32xf32>
    %231 = vector.shape_cast %92 : vector<32xf32> to vector<1x32xf32>
    %232 = vector.broadcast %231 : vector<1x32xf32> to vector<64x32xf32>
    %233 = arith.mulf %230, %232 : vector<64x32xf32>
    %234 = vector.shape_cast %94 : vector<32xf32> to vector<1x32xf32>
    %235 = vector.broadcast %234 : vector<1x32xf32> to vector<64x32xf32>
    %236 = arith.addf %233, %235 : vector<64x32xf32>
    %c1_110 = arith.constant 1 : index
    %c0_111 = arith.constant 0 : index
    %c0_112 = arith.constant 0 : index
    %237 = vector.load %arg9[%c1_110, %c0_111, %c0_112] : memref<2x9x32xf32, #tpu.memory_space<vmem>>, vector<1x1x32xf32>
    %238 = vector.shape_cast %237 : vector<1x1x32xf32> to vector<32xf32>
    %c1_113 = arith.constant 1 : index
    %c1_114 = arith.constant 1 : index
    %c0_115 = arith.constant 0 : index
    %239 = vector.load %arg9[%c1_113, %c1_114, %c0_115] : memref<2x9x32xf32, #tpu.memory_space<vmem>>, vector<1x1x32xf32>
    %240 = vector.shape_cast %239 : vector<1x1x32xf32> to vector<32xf32>
    %c1_116 = arith.constant 1 : index
    %c2_117 = arith.constant 2 : index
    %c0_118 = arith.constant 0 : index
    %241 = vector.load %arg9[%c1_116, %c2_117, %c0_118] : memref<2x9x32xf32, #tpu.memory_space<vmem>>, vector<1x1x32xf32>
    %242 = vector.shape_cast %241 : vector<1x1x32xf32> to vector<32xf32>
    %c1_119 = arith.constant 1 : index
    %c3_120 = arith.constant 3 : index
    %c0_121 = arith.constant 0 : index
    %243 = vector.load %arg9[%c1_119, %c3_120, %c0_121] : memref<2x9x32xf32, #tpu.memory_space<vmem>>, vector<1x1x32xf32>
    %244 = vector.shape_cast %243 : vector<1x1x32xf32> to vector<32xf32>
    %c1_122 = arith.constant 1 : index
    %c4_123 = arith.constant 4 : index
    %c0_124 = arith.constant 0 : index
    %245 = vector.load %arg9[%c1_122, %c4_123, %c0_124] : memref<2x9x32xf32, #tpu.memory_space<vmem>>, vector<1x1x32xf32>
    %246 = vector.shape_cast %245 : vector<1x1x32xf32> to vector<32xf32>
    %c1_125 = arith.constant 1 : index
    %c5_126 = arith.constant 5 : index
    %c0_127 = arith.constant 0 : index
    %247 = vector.load %arg9[%c1_125, %c5_126, %c0_127] : memref<2x9x32xf32, #tpu.memory_space<vmem>>, vector<1x1x32xf32>
    %248 = vector.shape_cast %247 : vector<1x1x32xf32> to vector<32xf32>
    %c1_128 = arith.constant 1 : index
    %c6_129 = arith.constant 6 : index
    %c0_130 = arith.constant 0 : index
    %249 = vector.load %arg9[%c1_128, %c6_129, %c0_130] : memref<2x9x32xf32, #tpu.memory_space<vmem>>, vector<1x1x32xf32>
    %250 = vector.shape_cast %249 : vector<1x1x32xf32> to vector<32xf32>
    %c1_131 = arith.constant 1 : index
    %c7_132 = arith.constant 7 : index
    %c0_133 = arith.constant 0 : index
    %251 = vector.load %arg9[%c1_131, %c7_132, %c0_133] : memref<2x9x32xf32, #tpu.memory_space<vmem>>, vector<1x1x32xf32>
    %252 = vector.shape_cast %251 : vector<1x1x32xf32> to vector<32xf32>
    %c1_134 = arith.constant 1 : index
    %c8_135 = arith.constant 8 : index
    %c0_136 = arith.constant 0 : index
    %253 = vector.load %arg9[%c1_134, %c8_135, %c0_136] : memref<2x9x32xf32, #tpu.memory_space<vmem>>, vector<1x1x32xf32>
    %254 = vector.shape_cast %253 : vector<1x1x32xf32> to vector<32xf32>
    %c1_137 = arith.constant 1 : index
    %c0_138 = arith.constant 0 : index
    %c0_139 = arith.constant 0 : index
    %c0_140 = arith.constant 0 : index
    %255 = vector.load %arg5[%c1_137, %c0_138, %c0_139, %c0_140] : memref<2x3x32x32xf32, #tpu.memory_space<vmem>>, vector<1x1x32x32xf32>
    %256 = vector.shape_cast %255 : vector<1x1x32x32xf32> to vector<32x32xf32>
    %cst_141 = arith.constant dense<0.000000e+00> : vector<64x32xf32>
    %257 = tpu.matmul %236, %256, %cst_141 {dimension_numbers = #tpu.dot_dimension_numbers<[1], [0], [0], [1], [0, 0, 1, 1], [], []>} : vector<64x32xf32>, vector<32x32xf32>, vector<64x32xf32> -> vector<64x32xf32>
    %258 = vector.shape_cast %238 : vector<32xf32> to vector<1x32xf32>
    %259 = vector.broadcast %258 : vector<1x32xf32> to vector<64x32xf32>
    %260 = arith.addf %257, %259 : vector<64x32xf32>
    %261 = vector.shape_cast %260 : vector<64x32xf32> to vector<8x8x32xf32>
    %c1_142 = arith.constant 1 : index
    %c1_143 = arith.constant 1 : index
    %c0_144 = arith.constant 0 : index
    %c0_145 = arith.constant 0 : index
    %262 = vector.load %arg5[%c1_142, %c1_143, %c0_144, %c0_145] : memref<2x3x32x32xf32, #tpu.memory_space<vmem>>, vector<1x1x32x32xf32>
    %263 = vector.shape_cast %262 : vector<1x1x32x32xf32> to vector<32x32xf32>
    %cst_146 = arith.constant dense<0.000000e+00> : vector<64x32xf32>
    %264 = tpu.matmul %236, %263, %cst_146 {dimension_numbers = #tpu.dot_dimension_numbers<[1], [0], [0], [1], [0, 0, 1, 1], [], []>} : vector<64x32xf32>, vector<32x32xf32>, vector<64x32xf32> -> vector<64x32xf32>
    %265 = vector.shape_cast %240 : vector<32xf32> to vector<1x32xf32>
    %266 = vector.broadcast %265 : vector<1x32xf32> to vector<64x32xf32>
    %267 = arith.addf %264, %266 : vector<64x32xf32>
    %268 = vector.shape_cast %267 : vector<64x32xf32> to vector<8x8x32xf32>
    %c1_147 = arith.constant 1 : index
    %c2_148 = arith.constant 2 : index
    %c0_149 = arith.constant 0 : index
    %c0_150 = arith.constant 0 : index
    %269 = vector.load %arg5[%c1_147, %c2_148, %c0_149, %c0_150] : memref<2x3x32x32xf32, #tpu.memory_space<vmem>>, vector<1x1x32x32xf32>
    %270 = vector.shape_cast %269 : vector<1x1x32x32xf32> to vector<32x32xf32>
    %cst_151 = arith.constant dense<0.000000e+00> : vector<64x32xf32>
    %271 = tpu.matmul %236, %270, %cst_151 {dimension_numbers = #tpu.dot_dimension_numbers<[1], [0], [0], [1], [0, 0, 1, 1], [], []>} : vector<64x32xf32>, vector<32x32xf32>, vector<64x32xf32> -> vector<64x32xf32>
    %272 = vector.shape_cast %242 : vector<32xf32> to vector<1x32xf32>
    %273 = vector.broadcast %272 : vector<1x32xf32> to vector<64x32xf32>
    %274 = arith.addf %271, %273 : vector<64x32xf32>
    %275 = vector.shape_cast %274 : vector<64x32xf32> to vector<8x8x32xf32>
    "tpu.trace_start"() <{level = 10 : i32, message = "bqd,bkd->bqk"}> : () -> ()
    %cst_152 = arith.constant dense<0.000000e+00> : vector<8x8x8xf32>
    %276 = tpu.matmul %261, %268, %cst_152 {dimension_numbers = #tpu.dot_dimension_numbers<[2], [2], [1], [1], [0, 0, 0, 1, 1, 1], [0], [0]>} : vector<8x8x32xf32>, vector<8x8x32xf32>, vector<8x8x8xf32> -> vector<8x8x8xf32>
    "tpu.trace_stop"() : () -> ()
    %cst_153 = arith.constant 0.176776692 : f32
    %277 = vector.broadcast %cst_153 : f32 to vector<8x8x8xf32>
    %278 = arith.mulf %276, %277 : vector<8x8x8xf32>
    %cst_154 = arith.constant dense<0xFF800000> : vector<8x8xf32>
    %279 = vector.multi_reduction <maximumf>, %278, %cst_154 [2] : vector<8x8x8xf32> to vector<8x8xf32>
    %280 = vector.shape_cast %279 : vector<8x8xf32> to vector<8x8x1xf32>
    %281 = vector.broadcast %280 : vector<8x8x1xf32> to vector<8x8x8xf32>
    %282 = arith.subf %278, %281 : vector<8x8x8xf32>
    %283 = math.exp %282 : vector<8x8x8xf32>
    %cst_155 = arith.constant dense<0.000000e+00> : vector<8x8xf32>
    %284 = vector.multi_reduction <add>, %283, %cst_155 [2] : vector<8x8x8xf32> to vector<8x8xf32>
    %285 = vector.shape_cast %284 : vector<8x8xf32> to vector<8x8x1xf32>
    %286 = tpu.reciprocal %285 {approx = true} : vector<8x8x1xf32> -> vector<8x8x1xf32>
    %287 = vector.broadcast %286 : vector<8x8x1xf32> to vector<8x8x8xf32>
    %288 = arith.mulf %283, %287 : vector<8x8x8xf32>
    "tpu.trace_start"() <{level = 10 : i32, message = "bqk,bkd->bqd"}> : () -> ()
    %cst_156 = arith.constant dense<0.000000e+00> : vector<8x8x32xf32>
    %289 = tpu.matmul %288, %275, %cst_156 {dimension_numbers = #tpu.dot_dimension_numbers<[2], [1], [1], [2], [0, 0, 0, 1, 1, 2], [0], [0]>} : vector<8x8x8xf32>, vector<8x8x32xf32>, vector<8x8x32xf32> -> vector<8x8x32xf32>
    "tpu.trace_stop"() : () -> ()
    %290 = vector.shape_cast %289 : vector<8x8x32xf32> to vector<64x32xf32>
    %c1_157 = arith.constant 1 : index
    %c0_158 = arith.constant 0 : index
    %c0_159 = arith.constant 0 : index
    %291 = vector.load %arg6[%c1_157, %c0_158, %c0_159] : memref<2x32x32xf32, #tpu.memory_space<vmem>>, vector<1x32x32xf32>
    %292 = vector.shape_cast %291 : vector<1x32x32xf32> to vector<32x32xf32>
    %cst_160 = arith.constant dense<0.000000e+00> : vector<64x32xf32>
    %293 = tpu.matmul %290, %292, %cst_160 {dimension_numbers = #tpu.dot_dimension_numbers<[1], [0], [0], [1], [0, 0, 1, 1], [], []>} : vector<64x32xf32>, vector<32x32xf32>, vector<64x32xf32> -> vector<64x32xf32>
    %294 = vector.shape_cast %244 : vector<32xf32> to vector<1x32xf32>
    %295 = vector.broadcast %294 : vector<1x32xf32> to vector<64x32xf32>
    %296 = arith.addf %293, %295 : vector<64x32xf32>
    %297 = arith.addf %236, %296 : vector<64x32xf32>
    %cst_161 = arith.constant dense<0.000000e+00> : vector<64xf32>
    %298 = vector.multi_reduction <add>, %297, %cst_161 [1] : vector<64x32xf32> to vector<64xf32>
    %299 = vector.shape_cast %298 : vector<64xf32> to vector<64x1xf32>
    %cst_162 = arith.constant 3.200000e+01 : f32
    %300 = vector.broadcast %cst_162 : f32 to vector<64x1xf32>
    %301 = arith.divf %299, %300 : vector<64x1xf32>
    %302 = vector.broadcast %301 : vector<64x1xf32> to vector<64x32xf32>
    %303 = arith.subf %297, %302 : vector<64x32xf32>
    %304 = arith.mulf %303, %303 : vector<64x32xf32>
    %cst_163 = arith.constant dense<0.000000e+00> : vector<64xf32>
    %305 = vector.multi_reduction <add>, %304, %cst_163 [1] : vector<64x32xf32> to vector<64xf32>
    %306 = vector.shape_cast %305 : vector<64xf32> to vector<64x1xf32>
    %cst_164 = arith.constant 3.200000e+01 : f32
    %307 = vector.broadcast %cst_164 : f32 to vector<64x1xf32>
    %308 = arith.divf %306, %307 : vector<64x1xf32>
    %cst_165 = arith.constant 9.99999974E-6 : f32
    %309 = vector.broadcast %cst_165 : f32 to vector<64x1xf32>
    %310 = arith.addf %308, %309 : vector<64x1xf32>
    %311 = math.rsqrt %310 : vector<64x1xf32>
    %312 = vector.broadcast %311 : vector<64x1xf32> to vector<64x32xf32>
    %313 = arith.mulf %303, %312 : vector<64x32xf32>
    %314 = vector.shape_cast %246 : vector<32xf32> to vector<1x32xf32>
    %315 = vector.broadcast %314 : vector<1x32xf32> to vector<64x32xf32>
    %316 = arith.mulf %313, %315 : vector<64x32xf32>
    %317 = vector.shape_cast %248 : vector<32xf32> to vector<1x32xf32>
    %318 = vector.broadcast %317 : vector<1x32xf32> to vector<64x32xf32>
    %319 = arith.addf %316, %318 : vector<64x32xf32>
    %c1_166 = arith.constant 1 : index
    %c0_167 = arith.constant 0 : index
    %c0_168 = arith.constant 0 : index
    %320 = vector.load %arg7[%c1_166, %c0_167, %c0_168] : memref<2x32x64xf32, #tpu.memory_space<vmem>>, vector<1x32x64xf32>
    %321 = vector.shape_cast %320 : vector<1x32x64xf32> to vector<32x64xf32>
    %c1_169 = arith.constant 1 : index
    %c0_170 = arith.constant 0 : index
    %322 = vector.load %arg10[%c1_169, %c0_170] : memref<2x64xf32, #tpu.memory_space<vmem>>, vector<1x64xf32>
    %323 = vector.shape_cast %322 : vector<1x64xf32> to vector<64xf32>
    %cst_171 = arith.constant dense<0.000000e+00> : vector<64x64xf32>
    %324 = tpu.matmul %319, %321, %cst_171 {dimension_numbers = #tpu.dot_dimension_numbers<[1], [0], [0], [1], [0, 0, 1, 1], [], []>} : vector<64x32xf32>, vector<32x64xf32>, vector<64x64xf32> -> vector<64x64xf32>
    %325 = vector.shape_cast %323 : vector<64xf32> to vector<1x64xf32>
    %326 = vector.broadcast %325 : vector<1x64xf32> to vector<64x64xf32>
    %327 = arith.addf %324, %326 : vector<64x64xf32>
    %cst_172 = arith.constant 5.000000e-01 : f32
    %328 = vector.broadcast %cst_172 : f32 to vector<64x64xf32>
    %329 = arith.mulf %328, %327 : vector<64x64xf32>
    %cst_173 = arith.constant 0.707106769 : f32
    %330 = vector.broadcast %cst_173 : f32 to vector<64x64xf32>
    %331 = arith.mulf %327, %330 : vector<64x64xf32>
    %332 = math.absf %331 : vector<64x64xf32>
    %cst_174 = arith.constant 0.327591091 : f32
    %333 = vector.broadcast %cst_174 : f32 to vector<64x64xf32>
    %334 = arith.mulf %333, %332 : vector<64x64xf32>
    %cst_175 = arith.constant 1.000000e+00 : f32
    %335 = vector.broadcast %cst_175 : f32 to vector<64x64xf32>
    %336 = arith.addf %335, %334 : vector<64x64xf32>
    %cst_176 = arith.constant 1.000000e+00 : f32
    %337 = vector.broadcast %cst_176 : f32 to vector<64x64xf32>
    %338 = arith.divf %337, %336 : vector<64x64xf32>
    %cst_177 = arith.constant 1.06140542 : f32
    %339 = vector.broadcast %cst_177 : f32 to vector<64x64xf32>
    %340 = arith.mulf %339, %338 : vector<64x64xf32>
    %cst_178 = arith.constant 1.45315206 : f32
    %341 = vector.broadcast %cst_178 : f32 to vector<64x64xf32>
    %342 = arith.subf %340, %341 : vector<64x64xf32>
    %343 = arith.mulf %342, %338 : vector<64x64xf32>
    %cst_179 = arith.constant 1.42141378 : f32
    %344 = vector.broadcast %cst_179 : f32 to vector<64x64xf32>
    %345 = arith.addf %343, %344 : vector<64x64xf32>
    %346 = arith.mulf %345, %338 : vector<64x64xf32>
    %cst_180 = arith.constant 0.284496725 : f32
    %347 = vector.broadcast %cst_180 : f32 to vector<64x64xf32>
    %348 = arith.subf %346, %347 : vector<64x64xf32>
    %349 = arith.mulf %348, %338 : vector<64x64xf32>
    %cst_181 = arith.constant 0.254829586 : f32
    %350 = vector.broadcast %cst_181 : f32 to vector<64x64xf32>
    %351 = arith.addf %349, %350 : vector<64x64xf32>
    %352 = arith.mulf %351, %338 : vector<64x64xf32>
    %353 = arith.mulf %332, %332 : vector<64x64xf32>
    %cst_182 = arith.constant 0.000000e+00 : f32
    %354 = vector.broadcast %cst_182 : f32 to vector<64x64xf32>
    %355 = arith.subf %354, %353 : vector<64x64xf32>
    %356 = math.exp %355 : vector<64x64xf32>
    %357 = arith.mulf %352, %356 : vector<64x64xf32>
    %cst_183 = arith.constant 1.000000e+00 : f32
    %358 = vector.broadcast %cst_183 : f32 to vector<64x64xf32>
    %359 = arith.subf %358, %357 : vector<64x64xf32>
    %cst_184 = arith.constant 0.000000e+00 : f32
    %360 = vector.broadcast %cst_184 : f32 to vector<64x64xf32>
    %361 = arith.cmpf olt, %331, %360 : vector<64x64xf32>
    %cst_185 = arith.constant 0.000000e+00 : f32
    %362 = vector.broadcast %cst_185 : f32 to vector<64x64xf32>
    %363 = arith.subf %362, %359 : vector<64x64xf32>
    %364 = arith.select %361, %363, %359 : vector<64x64xi1>, vector<64x64xf32>
    %cst_186 = arith.constant 1.000000e+00 : f32
    %365 = vector.broadcast %cst_186 : f32 to vector<64x64xf32>
    %366 = arith.addf %365, %364 : vector<64x64xf32>
    %367 = arith.mulf %329, %366 : vector<64x64xf32>
    %c1_187 = arith.constant 1 : index
    %c0_188 = arith.constant 0 : index
    %c0_189 = arith.constant 0 : index
    %368 = vector.load %arg8[%c1_187, %c0_188, %c0_189] : memref<2x64x32xf32, #tpu.memory_space<vmem>>, vector<1x64x32xf32>
    %369 = vector.shape_cast %368 : vector<1x64x32xf32> to vector<64x32xf32>
    %cst_190 = arith.constant dense<0.000000e+00> : vector<64x32xf32>
    %370 = tpu.matmul %367, %369, %cst_190 {dimension_numbers = #tpu.dot_dimension_numbers<[1], [0], [0], [1], [0, 0, 1, 1], [], []>} : vector<64x64xf32>, vector<64x32xf32>, vector<64x32xf32> -> vector<64x32xf32>
    %371 = vector.shape_cast %250 : vector<32xf32> to vector<1x32xf32>
    %372 = vector.broadcast %371 : vector<1x32xf32> to vector<64x32xf32>
    %373 = arith.addf %370, %372 : vector<64x32xf32>
    %374 = arith.addf %319, %373 : vector<64x32xf32>
    %cst_191 = arith.constant dense<0.000000e+00> : vector<64xf32>
    %375 = vector.multi_reduction <add>, %374, %cst_191 [1] : vector<64x32xf32> to vector<64xf32>
    %376 = vector.shape_cast %375 : vector<64xf32> to vector<64x1xf32>
    %cst_192 = arith.constant 3.200000e+01 : f32
    %377 = vector.broadcast %cst_192 : f32 to vector<64x1xf32>
    %378 = arith.divf %376, %377 : vector<64x1xf32>
    %379 = vector.broadcast %378 : vector<64x1xf32> to vector<64x32xf32>
    %380 = arith.subf %374, %379 : vector<64x32xf32>
    %381 = arith.mulf %380, %380 : vector<64x32xf32>
    %cst_193 = arith.constant dense<0.000000e+00> : vector<64xf32>
    %382 = vector.multi_reduction <add>, %381, %cst_193 [1] : vector<64x32xf32> to vector<64xf32>
    %383 = vector.shape_cast %382 : vector<64xf32> to vector<64x1xf32>
    %cst_194 = arith.constant 3.200000e+01 : f32
    %384 = vector.broadcast %cst_194 : f32 to vector<64x1xf32>
    %385 = arith.divf %383, %384 : vector<64x1xf32>
    %cst_195 = arith.constant 9.99999974E-6 : f32
    %386 = vector.broadcast %cst_195 : f32 to vector<64x1xf32>
    %387 = arith.addf %385, %386 : vector<64x1xf32>
    %388 = math.rsqrt %387 : vector<64x1xf32>
    %389 = vector.broadcast %388 : vector<64x1xf32> to vector<64x32xf32>
    %390 = arith.mulf %380, %389 : vector<64x32xf32>
    %391 = vector.shape_cast %252 : vector<32xf32> to vector<1x32xf32>
    %392 = vector.broadcast %391 : vector<1x32xf32> to vector<64x32xf32>
    %393 = arith.mulf %390, %392 : vector<64x32xf32>
    %394 = vector.shape_cast %254 : vector<32xf32> to vector<1x32xf32>
    %395 = vector.broadcast %394 : vector<1x32xf32> to vector<64x32xf32>
    %396 = arith.addf %393, %395 : vector<64x32xf32>
    %c0_196 = arith.constant 0 : index
    %c0_197 = arith.constant 0 : index
    %397 = vector.load %arg11[%c0_196, %c0_197] : memref<32x32xf32, #tpu.memory_space<vmem>>, vector<32x32xf32>
    %c0_198 = arith.constant 0 : index
    %c0_199 = arith.constant 0 : index
    %398 = vector.load %arg13[%c0_198, %c0_199] : memref<2x32xf32, #tpu.memory_space<vmem>>, vector<1x32xf32>
    %399 = vector.shape_cast %398 : vector<1x32xf32> to vector<32xf32>
    %cst_200 = arith.constant dense<0.000000e+00> : vector<64x32xf32>
    %400 = tpu.matmul %396, %397, %cst_200 {dimension_numbers = #tpu.dot_dimension_numbers<[1], [0], [0], [1], [0, 0, 1, 1], [], []>} : vector<64x32xf32>, vector<32x32xf32>, vector<64x32xf32> -> vector<64x32xf32>
    %401 = vector.shape_cast %399 : vector<32xf32> to vector<1x32xf32>
    %402 = vector.broadcast %401 : vector<1x32xf32> to vector<64x32xf32>
    %403 = arith.addf %400, %402 : vector<64x32xf32>
    %cst_201 = arith.constant 0.000000e+00 : f32
    %404 = vector.broadcast %cst_201 : f32 to vector<64x32xf32>
    %405 = arith.maximumf %403, %404 : vector<64x32xf32>
    %c0_202 = arith.constant 0 : index
    %c0_203 = arith.constant 0 : index
    %406 = vector.load %arg12[%c0_202, %c0_203] : memref<32x5xf32, #tpu.memory_space<vmem>>, vector<32x5xf32>
    %c1_204 = arith.constant 1 : index
    %c0_205 = arith.constant 0 : index
    %407 = vector.load %arg13[%c1_204, %c0_205] : memref<2x32xf32, #tpu.memory_space<vmem>>, vector<1x32xf32>
    %408 = vector.shape_cast %407 : vector<1x32xf32> to vector<32xf32>
    %409 = vector.extract_strided_slice %408 {offsets = [0], sizes = [5], strides = [1]} : vector<32xf32> to vector<5xf32>
    %cst_206 = arith.constant dense<0.000000e+00> : vector<64x5xf32>
    %410 = tpu.matmul %405, %406, %cst_206 {dimension_numbers = #tpu.dot_dimension_numbers<[1], [0], [0], [1], [0, 0, 1, 1], [], []>} : vector<64x32xf32>, vector<32x5xf32>, vector<64x5xf32> -> vector<64x5xf32>
    %411 = vector.shape_cast %409 : vector<5xf32> to vector<1x5xf32>
    %412 = vector.broadcast %411 : vector<1x5xf32> to vector<64x5xf32>
    %413 = arith.addf %410, %412 : vector<64x5xf32>
    %414 = vector.extract_strided_slice %413 {offsets = [0, 0], sizes = [64, 4], strides = [1, 1]} : vector<64x5xf32> to vector<64x4xf32>
    %415 = vector.extract_strided_slice %413 {offsets = [0, 4], sizes = [64, 1], strides = [1, 1]} : vector<64x5xf32> to vector<64x1xf32>
    %416 = vector.broadcast %415 : vector<64x1xf32> to vector<64x4xf32>
    %417 = arith.addf %416, %414 : vector<64x4xf32>
    %cst_207 = arith.constant dense<0.000000e+00> : vector<64xf32>
    %418 = vector.multi_reduction <add>, %414, %cst_207 [1] : vector<64x4xf32> to vector<64xf32>
    %419 = vector.shape_cast %418 : vector<64xf32> to vector<64x1xf32>
    %cst_208 = arith.constant 4.000000e+00 : f32
    %420 = vector.broadcast %cst_208 : f32 to vector<64x1xf32>
    %421 = arith.divf %419, %420 : vector<64x1xf32>
    %422 = vector.broadcast %421 : vector<64x1xf32> to vector<64x4xf32>
    %423 = arith.subf %417, %422 : vector<64x4xf32>
    %424 = vector.shape_cast %423 : vector<64x4xf32> to vector<8x8x4xf32>
    %425 = vector.extract_strided_slice %424 {offsets = [0, 0, 0], sizes = [8, 1, 4], strides = [1, 1, 1]} : vector<8x8x4xf32> to vector<8x1x4xf32>
    %426 = vector.shape_cast %425 : vector<8x1x4xf32> to vector<8x4xf32>
    %427 = vector.extract_strided_slice %424 {offsets = [0, 1, 0], sizes = [8, 1, 4], strides = [1, 1, 1]} : vector<8x8x4xf32> to vector<8x1x4xf32>
    %428 = vector.shape_cast %427 : vector<8x1x4xf32> to vector<8x4xf32>
    %429 = vector.extract_strided_slice %424 {offsets = [0, 2, 0], sizes = [8, 1, 4], strides = [1, 1, 1]} : vector<8x8x4xf32> to vector<8x1x4xf32>
    %430 = vector.shape_cast %429 : vector<8x1x4xf32> to vector<8x4xf32>
    %431 = vector.extract_strided_slice %424 {offsets = [0, 3, 0], sizes = [8, 1, 4], strides = [1, 1, 1]} : vector<8x8x4xf32> to vector<8x1x4xf32>
    %432 = vector.shape_cast %431 : vector<8x1x4xf32> to vector<8x4xf32>
    %433 = vector.extract_strided_slice %424 {offsets = [0, 4, 0], sizes = [8, 1, 4], strides = [1, 1, 1]} : vector<8x8x4xf32> to vector<8x1x4xf32>
    %434 = vector.shape_cast %433 : vector<8x1x4xf32> to vector<8x4xf32>
    %435 = vector.extract_strided_slice %424 {offsets = [0, 5, 0], sizes = [8, 1, 4], strides = [1, 1, 1]} : vector<8x8x4xf32> to vector<8x1x4xf32>
    %436 = vector.shape_cast %435 : vector<8x1x4xf32> to vector<8x4xf32>
    %437 = vector.extract_strided_slice %424 {offsets = [0, 6, 0], sizes = [8, 1, 4], strides = [1, 1, 1]} : vector<8x8x4xf32> to vector<8x1x4xf32>
    %438 = vector.shape_cast %437 : vector<8x1x4xf32> to vector<8x4xf32>
    %439 = vector.extract_strided_slice %424 {offsets = [0, 7, 0], sizes = [8, 1, 4], strides = [1, 1, 1]} : vector<8x8x4xf32> to vector<8x1x4xf32>
    %440 = vector.shape_cast %439 : vector<8x1x4xf32> to vector<8x4xf32>
    %441 = tpu.concatenate %426, %428, %430, %432, %434, %436, %438, %440 in 1 : vector<8x4xf32>, vector<8x4xf32>, vector<8x4xf32>, vector<8x4xf32>, vector<8x4xf32>, vector<8x4xf32>, vector<8x4xf32>, vector<8x4xf32> -> vector<8x32xf32>
    %c0_209 = arith.constant 0 : index
    %c0_210 = arith.constant 0 : index
    %442 = vector.load %arg14[%c0_209, %c0_210] : memref<8x32xf32, #tpu.memory_space<vmem>>, vector<8x32xf32>
    tpu.vector_store %arg14[%c0_209, %c0_210], %441 {strides = array<i32>} : memref<8x32xf32, #tpu.memory_space<vmem>>, vector<8x32xf32>,
    return
  }
  func.func @transform_0(%arg0: i32) -> (i32, i32, i32) {
    %c0_i32 = arith.constant 0 : i32
    %c0_i32_0 = arith.constant 0 : i32
    %c0_i32_1 = arith.constant 0 : i32
    return %arg0, %c0_i32, %c0_i32_0 : i32, i32, i32
  }
  func.func @transform_1(%arg0: i32) -> (i32, i32) {
    %c0_i32 = arith.constant 0 : i32
    %c0_i32_0 = arith.constant 0 : i32
    %c0_i32_1 = arith.constant 0 : i32
    return %c0_i32, %c0_i32_0 : i32, i32
  }
  func.func @transform_2(%arg0: i32) -> (i32, i32) {
    %c0_i32 = arith.constant 0 : i32
    %c0_i32_0 = arith.constant 0 : i32
    %c0_i32_1 = arith.constant 0 : i32
    return %c0_i32, %c0_i32_0 : i32, i32
  }
  func.func @transform_3(%arg0: i32) -> (i32, i32) {
    %c0_i32 = arith.constant 0 : i32
    %c0_i32_0 = arith.constant 0 : i32
    %c0_i32_1 = arith.constant 0 : i32
    return %c0_i32, %c0_i32_0 : i32, i32
  }
  func.func @transform_4(%arg0: i32) -> (i32, i32, i32, i32) {
    %c0_i32 = arith.constant 0 : i32
    %c0_i32_0 = arith.constant 0 : i32
    %c0_i32_1 = arith.constant 0 : i32
    %c0_i32_2 = arith.constant 0 : i32
    %c0_i32_3 = arith.constant 0 : i32
    return %c0_i32, %c0_i32_0, %c0_i32_1, %c0_i32_2 : i32, i32, i32, i32
  }
  func.func @transform_5(%arg0: i32) -> (i32, i32, i32) {
    %c0_i32 = arith.constant 0 : i32
    %c0_i32_0 = arith.constant 0 : i32
    %c0_i32_1 = arith.constant 0 : i32
    %c0_i32_2 = arith.constant 0 : i32
    return %c0_i32, %c0_i32_0, %c0_i32_1 : i32, i32, i32
  }
  func.func @transform_6(%arg0: i32) -> (i32, i32, i32) {
    %c0_i32 = arith.constant 0 : i32
    %c0_i32_0 = arith.constant 0 : i32
    %c0_i32_1 = arith.constant 0 : i32
    %c0_i32_2 = arith.constant 0 : i32
    return %c0_i32, %c0_i32_0, %c0_i32_1 : i32, i32, i32
  }
  func.func @transform_7(%arg0: i32) -> (i32, i32, i32) {
    %c0_i32 = arith.constant 0 : i32
    %c0_i32_0 = arith.constant 0 : i32
    %c0_i32_1 = arith.constant 0 : i32
    %c0_i32_2 = arith.constant 0 : i32
    return %c0_i32, %c0_i32_0, %c0_i32_1 : i32, i32, i32
  }
  func.func @transform_8(%arg0: i32) -> (i32, i32, i32) {
    %c0_i32 = arith.constant 0 : i32
    %c0_i32_0 = arith.constant 0 : i32
    %c0_i32_1 = arith.constant 0 : i32
    %c0_i32_2 = arith.constant 0 : i32
    return %c0_i32, %c0_i32_0, %c0_i32_1 : i32, i32, i32
  }
  func.func @transform_9(%arg0: i32) -> (i32, i32) {
    %c0_i32 = arith.constant 0 : i32
    %c0_i32_0 = arith.constant 0 : i32
    %c0_i32_1 = arith.constant 0 : i32
    return %c0_i32, %c0_i32_0 : i32, i32
  }
  func.func @transform_10(%arg0: i32) -> (i32, i32) {
    %c0_i32 = arith.constant 0 : i32
    %c0_i32_0 = arith.constant 0 : i32
    %c0_i32_1 = arith.constant 0 : i32
    return %c0_i32, %c0_i32_0 : i32, i32
  }
  func.func @transform_11(%arg0: i32) -> (i32, i32) {
    %c0_i32 = arith.constant 0 : i32
    %c0_i32_0 = arith.constant 0 : i32
    %c0_i32_1 = arith.constant 0 : i32
    return %c0_i32, %c0_i32_0 : i32, i32
  }
  func.func @transform_12(%arg0: i32) -> (i32, i32) {
    %c0_i32 = arith.constant 0 : i32
    %c0_i32_0 = arith.constant 0 : i32
    %c0_i32_1 = arith.constant 0 : i32
    return %c0_i32, %c0_i32_0 : i32, i32
  }
  func.func @transform_13(%arg0: i32) -> (i32, i32) {
    %c0_i32 = arith.constant 0 : i32
    %c0_i32_0 = arith.constant 0 : i32
    return %arg0, %c0_i32 : i32, i32
  }
}

</mosaic_0001>

<bundles_post_ra>
// kernel: tpu_custom_call.1
= control target key start
LH: loop header
LB: loop body
LE: loop exit
PB: predicated region body
PF: predicated region fallthrough
CT: control target
= control target key end

     0   :  { %18 = vsyncpa [#allocation3], 0  ;;  %s9644_s0 = inlined_call_operand.vmem [shape: f32[8,8,32], index: 0, kind: input, shape index: {}]   ;;  %s9645_s1 = inlined_call_operand.vmem [shape: f32[64,32], index: 1, kind: input, shape index: {}]   ;;  %s9646_s2 = inlined_call_operand.hbm [shape: f32[32,32], index: 2, kind: input, shape index: {}]   ;;  %s9647_s3 = inlined_call_operand.hbm [shape: f32[3,32], index: 3, kind: input, shape index: {}]   ;;  %s9648_s4 = inlined_call_operand.vmem [shape: f32[2,3,32,32], index: 4, kind: input, shape index: {}]   ;;  %s9649_s5 = inlined_call_operand.vmem [shape: f32[2,32,32], index: 5, kind: input, shape index: {}]   ;;  %s9650_s6 = inlined_call_operand.hbm [shape: f32[2,32,64], index: 6, kind: input, shape index: {}]   ;;  %s9651_s7 = inlined_call_operand.vmem [shape: f32[2,64,32], index: 7, kind: input, shape index: {}]   ;;  %s9652_s8 = inlined_call_operand.vmem [shape: f32[2,9,32], index: 8, kind: input, shape index: {}]   ;;  %s9653_s9 = inlined_call_operand.vmem [shape: f32[2,64], index: 9, kind: input, shape index: {}]   ;;  %s9654_s10 = inlined_call_operand.hbm [shape: f32[32,32], index: 10, kind: input, shape index: {}]   ;;  %s9655_s11 = inlined_call_operand.vmem [shape: f32[32,5], index: 11, kind: input, shape index: {}]   ;;  %s9656_s12 = inlined_call_operand.vmem [shape: f32[2,32], index: 12, kind: input, shape index: {}]   ;;  %s9657_s13 = inlined_call_operand.hbm [shape: f32[8,32], index: 13, kind: output, shape index: {}]  }
   0x1   :  { %19 = vsyncpa [#allocation6], 0 }
   0x2   :  { %20 = vsyncpa [#allocation9], 0 }
   0x3   :  { %21 = vsyncpa [#allocation4], 0  ;;  %s7826_s25 = smov [#allocation5]   ;;  %s7827_s27 = smov [#allocation2]  }
   0x4   :  { %s44_s26 = sshll.u32 %s7826_s25, 4  ;;  %s31_s28 = sshll.u32 %s7827_s27, 4  ;;  %s45_s26 = int_to_ptr.vmem [resolvable:$true] %s44_s26  ;;  %s7912_s28 = int_to_ptr.vmem [resolvable:$true] %s31_s28 }
   0x5   :  { %s7708_s14 = scalar_lea.hbm %s9647_s3, 64 }
   0x6   :  { %p7709_p0 = scmp.ne.s32.totalorder %s9647_s3, %s7708_s14  ;;  %p7712_p1 = scmp.lt.u32.totalorder %s7708_s14, %s9647_s3 }
   0x8   :  { %p7714_p2 = pnand %p7712_p1, %p7709_p0 }
   0xa   :  { %7717 = shalt.err (!%p7714_p2)
}
   0xb   :  { %s7718_s19 = scalar_lea.vmem %s45_s26, 64  ;;  %p7723_p4 = scmp.lt.s32.totalorder %s45_s26, %s45_s26 }
   0xc   :  { %p7719_p3 = scmp.ne.s32.totalorder %s45_s26, %s7718_s19  ;;  %p7724_p5 = scmp.lt.s32.totalorder %s7718_s19, %s7718_s19 }
   0xe   :  { %p7725_p6 = por %p7724_p5, %p7723_p4 }
  0x10   :  { %p7726_p7 = pnand %p7725_p6, %p7719_p3 }
  0x12   :  { %7729 = shalt.err (!%p7726_p7)
}
  0x13   :  { %47 = dma.hbm_to_vmem [thread:$0]  %s9647_s3, 64, %s45_s26, [#allocation6]  }
  0x14   :  { %s7730_s24 = scalar_lea.hbm %s9646_s2, 512 }
  0x15   :  { %p7731_p8 = scmp.ne.s32.totalorder %s9646_s2, %s7730_s24  ;;  %p7734_p9 = scmp.lt.u32.totalorder %s7730_s24, %s9646_s2 }
  0x17   :  { %p7736_p10 = pnand %p7734_p9, %p7731_p8 }
  0x19   :  { %7739 = shalt.err (!%p7736_p10)
}
  0x1a   :  { %s7740_s14 = scalar_lea.vmem %s7912_s28, 512  ;;  %p7745_p12 = scmp.lt.s32.totalorder %s7912_s28, %s7912_s28 }
  0x1b   :  { %p7741_p11 = scmp.ne.s32.totalorder %s7912_s28, %s7740_s14  ;;  %p7746_p13 = scmp.lt.s32.totalorder %s7740_s14, %s7740_s14 }
  0x1d   :  { %p7747_p0 = por %p7746_p13, %p7745_p12 }
  0x1f   :  { %p7748_p1 = pnand %p7747_p0, %p7741_p11 }
  0x21   :  { %7751 = shalt.err (!%p7748_p1)
}
  0x22   :  { %s7828_s3 = smov 128   ;;  %s7829_s26 = smov 8  }
  0x23   :  { %37 = dma.hbm_to_vmem [thread:$0]  %s9646_s2, 512, %s7912_s28, [#allocation3], %s7828_s3, %s7828_s3, %s7829_s26  }
  0x24   :  { %s7830_s17 = smov [#allocation7]   ;;  %s7831_s19 = smov [#allocation8]  }
  0x25   :  { %s57_s18 = sshll.u32 %s7830_s17, 4  ;;  %s75_s20 = sshll.u32 %s7831_s19, 4  ;;  %s58_s18 = int_to_ptr.vmem [resolvable:$true] %s57_s18  ;;  %s7946_s20 = int_to_ptr.vmem [resolvable:$true] %s75_s20 }
  0x26   :  { %s7752_s23 = scalar_lea.hbm %s9650_s6, 1024 }
  0x27   :  { %p7753_p2 = scmp.ne.s32.totalorder %s9650_s6, %s7752_s23  ;;  %p7756_p3 = scmp.lt.u32.totalorder %s7752_s23, %s9650_s6 }
  0x29   :  { %p7758_p4 = pnand %p7756_p3, %p7753_p2 }
  0x2b   :  { %7761 = shalt.err (!%p7758_p4)
}
  0x2c   :  { %s7762_s2 = scalar_lea.vmem %s58_s18, 1024  ;;  %p7767_p6 = scmp.lt.s32.totalorder %s58_s18, %s58_s18 }
  0x2d   :  { %p7763_p5 = scmp.ne.s32.totalorder %s58_s18, %s7762_s2  ;;  %p7768_p7 = scmp.lt.s32.totalorder %s7762_s2, %s7762_s2 }
  0x2f   :  { %p7769_p8 = por %p7768_p7, %p7767_p6 }
  0x31   :  { %p7770_p9 = pnand %p7769_p8, %p7763_p5 }
  0x33   :  { %7773 = shalt.err (!%p7770_p9)
}
  0x34   :  { %63 = dma.hbm_to_vmem [thread:$0]  %s9650_s6, 1024, %s58_s18, [#allocation6], %s7828_s3, %s7828_s3, %s7829_s26  }
  0x35   :  { %s7774_s16 = scalar_lea.hbm %s9654_s10, 512 }
  0x36   :  { %p7775_p10 = scmp.ne.s32.totalorder %s9654_s10, %s7774_s16  ;;  %p7778_p11 = scmp.lt.u32.totalorder %s7774_s16, %s9654_s10 }
  0x38   :  { %p7780_p12 = pnand %p7778_p11, %p7775_p10 }
  0x3a   :  { %7783 = shalt.err (!%p7780_p12)
}
  0x3b   :  { %s7784_s23 = scalar_lea.vmem %s7946_s20, 512  ;;  %p7789_p0 = scmp.lt.s32.totalorder %s7946_s20, %s7946_s20 }
  0x3c   :  { %p7785_p13 = scmp.ne.s32.totalorder %s7946_s20, %s7784_s23  ;;  %p7790_p1 = scmp.lt.s32.totalorder %s7784_s23, %s7784_s23 }
  0x3e   :  { %p7791_p2 = por %p7790_p1, %p7789_p0 }
  0x40   :  { %p7792_p3 = pnand %p7791_p2, %p7785_p13 }
  0x42   :  { %7795 = shalt.err (!%p7792_p3)
}
  0x43   :  { %81 = dma.hbm_to_vmem [thread:$0]  %s9654_s10, 512, %s7946_s20, [#allocation9], %s7828_s3, %s7828_s3, %s7829_s26  }
  0x44   :  { %7818 = dma.done.wait [#allocation3], 512  }
  0x45   :  { %7819 = vsyncadd [#allocation3], 4294966784 }
  0x46   :  { %7820 = dma.done.wait [#allocation6], 1088  }
  0x47   :  { %7821 = vsyncadd [#allocation6], 4294966208 }
  0x48   :  { %7822 = dma.done.wait [#allocation9], 512  }
  0x49   :  { %7823 = vsyncadd [#allocation9], 4294966784  ;;  %vm115_vm0 = vcmask 261120   ;;  %v106_v0 = vld [vmem:[#allocation2] sm:$0xff]  ;;  %v107_v1 = vld [vmem:[#allocation2 + $0x8] sm:$0xff]  ;;  %vm7833_vm9 = vmmov 0  }
  0x4a   :  { %v108_v2 = vld [vmem:[#allocation2 + $0x10] sm:$0xff]  ;;  %v7310_v3 = vpack.c.bf16 %v107_v1, %v106_v0  ;;  %v109_v4 = vld [vmem:[#allocation2 + $0x18] sm:$0xff]  ;;  %v98_v5 = vld [vmem:[%s9644_s0] sm:$0xff]  ;;  %vm1598_vm10 = vcmask 64512   ;;  %vm2910_vm13 = vcmask 523264   ;;  %s7837_s23 = smov 12  }
  0x4b   :  { %v7314_v6 = vpack.c.bf16 %v109_v4, %v108_v2  ;;  %6842 = vmatprep.mubr.msk.f32.mxu0 %vm115_vm0, %v98_v5  ;;  %v102_v7 = vld [vmem:[%s9644_s0 + $0x20] sm:$0xff]  ;;  %v99_v8 = vld [vmem:[%s9644_s0 + $0x8] sm:$0xff]  ;;  %v100_v10 = vld [vmem:[%s9644_s0 + $0x10] sm:$0xff]  ;;  %s7838_s6 = smov 24   ;;  %s7839_s18 = smov 20  }
  0x4c   :  { %7311 = vmatprep.subr.bf16.mxu0 %v7310_v3  ;;  %7446 = vmatprep.subr.bf16.mxu1 %v7310_v3  ;;  %v103_v9 = vld [vmem:[%s9644_s0 + $0x28] sm:$0xff]  ;;  %v104_v11 = vld [vmem:[%s9644_s0 + $0x30] sm:$0xff]  ;;  %v101_v12 = vld [vmem:[%s9644_s0 + $0x18] sm:$0xff]  ;;  %s7840_s24 = smov 28   ;;  %s7841_s25 = smov [#allocation10]  }
  0x4d   :  { %7313 = vmatpush3.bf16.msra.mxu0 %v7310_v3  ;;  %7448 = vmatpush3.bf16.msra.mxu1 %v7310_v3  ;;  %v105_v13 = vld [vmem:[%s9644_s0 + $0x38] sm:$0xff]  ;;  %v6300_v14 = vld [vmem:[#allocation5] ss:$0 sm:$0xff]  ;;  %s6289_s10 = sshll.u32 %s7841_s25, 4  ;;  %s6290_s10 = int_to_ptr.vmem [resolvable:$true] %s6289_s10 }
  0x4e   :  { %7315 = vmatprep.subr.bf16.mxu0 %v7314_v6  ;;  %7447 = vmatprep.subr.bf16.mxu1 %v7314_v6  ;;  %s7796_s3 = scalar_lea.vmem %s6290_s10, 128  ;;  %p7801_p5 = scmp.lt.s32.totalorder %s6290_s10, %s6290_s10 }
  0x4f   :  { %6848 = vmatprep.mubr.msk.f32.mxu1 %vm115_vm0, %v102_v7  ;;  %p7797_p4 = scmp.ne.s32.totalorder %s6290_s10, %s7796_s3  ;;  %p7802_p6 = scmp.lt.s32.totalorder %s7796_s3, %s7796_s3 }
  0x51   :  { %7317 = vmatpush3.bf16.msra.mxu0 %v7314_v6  ;;  %7449 = vmatpush3.bf16.msra.mxu1 %v7314_v6  ;;  %p7803_p7 = por %p7802_p6, %p7801_p5 }
  0x53   :  { %p7804_p8 = pnand %p7803_p7, %p7797_p4 }
  0x54   :  { %6843 = vmatmul.mubr.msk.f32.vlgmr.msra.gmra.mrb[0].mxu0 %vm115_vm0, %v99_v8  ;;  %6849 = vmatmul.mubr.msk.f32.vlgmr.msra.gmra.mrb[0].mxu1 %vm115_vm0, %v103_v9 }
  0x55   :  { %6845 = vmatprep.mubr.msk.f32.mxu0 %vm115_vm0, %v100_v10  ;;  %6851 = vmatprep.mubr.msk.f32.mxu1 %vm115_vm0, %v104_v11 }
  0x58   :  { %6846 = vmatmul.mubr.msk.f32.gmra.mrb[2].mxu0 %vm115_vm0, %v101_v12  ;;  %6852 = vmatmul.mubr.msk.f32.gmra.mrb[2].mxu1 %vm115_vm0, %v105_v13 }
 0x127   :  { %v6844_v15 = vpop.f32.mrb[0].mxu0  ;;  %v6850_v16 = vpop.f32.mrb[0].mxu1 }
 0x128   :  { %v206_v17 = vpop.f32.mrb[1].mxu0  ;;  %v226_v18 = vpop.f32.mrb[1].mxu1  ;;  %v212_v20 = vadd.f32 %v6844_v15, %v6300_v14  ;;  %v232_v33 = vadd.f32 %v6850_v16, %v6300_v14  ;;  %v617_v15 = vld [vmem:[%s9648_s4] sm:$0xff]  ;;  %v618_v16 = vld [vmem:[%s9648_s4 + $0x8] sm:$0xff] }
 0x129   :  { %v207_v19 = vadd.f32 %v6300_v14, %v206_v17  ;;  %v227_v27 = vadd.f32 %v6300_v14, %v226_v18  ;;  %v6336_v17 = vld [vmem:[%s9648_s4 + $0x20] sm:$0xff]  ;;  %v7318_v18 = vpack.c.bf16 %v618_v16, %v617_v15 }
 0x12a   :  { %v250_v30 = vsel %vm115_vm0, %v212_v20, 0.0  ;;  %v262_v37 = vsel %vm115_vm0, %v232_v33, 0.0 }
 0x12b   :  { %v6847_v21 = vpop.f32.mrb[2].mxu0  ;;  %v247_v22 = vsel %vm115_vm0, %v207_v19, 0.0  ;;  %v6853_v23 = vpop.f32.mrb[2].mxu1  ;;  %v259_v32 = vsel %vm115_vm0, %v227_v27, 0.0  ;;  %7319 = vmatprep.subr.bf16.mxu1 %v7318_v18 }
 0x12c   :  { %v216_v24 = vpop.f32.mrb[3].mxu0  ;;  %248 = vadd.xlane.f32.xlu0 %v247_v22  ;;  %v236_v25 = vpop.f32.mrb[3].mxu1  ;;  %v222_v28 = vadd.f32 %v6847_v21, %v6300_v14  ;;  %v242_v36 = vadd.f32 %v6853_v23, %v6300_v14  ;;  %v620_v21 = vld [vmem:[%s9648_s4 + $0x18] sm:$0xff]  ;;  %7321 = vmatpush3.bf16.msra.mxu1 %v7318_v18 }
 0x12d   :  { %v217_v26 = vadd.f32 %v6300_v14, %v216_v24  ;;  %v237_v31 = vadd.f32 %v6300_v14, %v236_v25  ;;  %v6338_v24 = vld [vmem:[%s9648_s4 + $0x30] sm:$0xff]  ;;  %v6339_v25 = vld [vmem:[%s9648_s4 + $0x38] sm:$0xff] }
 0x12e   :  { %v256_v34 = vsel %vm115_vm0, %v222_v28, 0.0  ;;  %v268_v38 = vsel %vm115_vm0, %v242_v36, 0.0 }
 0x12f   :  { %v253_v29 = vsel %vm115_vm0, %v217_v26, 0.0  ;;  %v265_v35 = vsel %vm115_vm0, %v237_v31, 0.0 }
 0x130   :  { %254 = vadd.xlane.f32.xlu1 %v253_v29  ;;  %251 = vadd.xlane.f32.xlu0 %v250_v30 }
 0x134   :  { %257 = vadd.xlane.f32.xlu1 %v256_v34  ;;  %260 = vadd.xlane.f32.xlu0 %v259_v32 }
 0x138   :  { %263 = vadd.xlane.f32.xlu1 %v262_v37  ;;  %266 = vadd.xlane.f32.xlu0 %v265_v35 }
 0x13c   :  { %269 = vadd.xlane.f32.xlu1 %v268_v38 }
 0x1b9   :  { %v249_v39 = vpop.xlane.xlu0 %248 }
 0x1ba   :  { %v272_v40 = vmul.f32 0.03125, %v249_v39 }
 0x1bc   :  { %v8023_v41 = vsub.f32 %v207_v19, %v272_v40  ;;  %v6337_v19 = vld [vmem:[%s9648_s4 + $0x28] sm:$0xff] }
 0x1bd   :  { %v255_v42 = vpop.xlane.xlu1 %254  ;;  %v252_v43 = vpop.xlane.xlu0 %251  ;;  %v7326_v22 = vpack.c.bf16 %v6337_v19, %v6336_v17 }
 0x1be   :  { %v274_v44 = vmul.f32 0.03125, %v255_v42  ;;  %v273_v45 = vmul.f32 0.03125, %v252_v43  ;;  %v288_v46 = vmul.f32 %v8023_v41, %v8023_v41 }
 0x1bf   :  { %7327 = vmatprep.subr.bf16.mxu0 %v7326_v22 }
 0x1c0   :  { %v8027_v47 = vsub.f32 %v217_v26, %v274_v44  ;;  %v8029_v48 = vsub.f32 %v212_v20, %v273_v45  ;;  %v296_v49 = vsel %vm115_vm0, %v288_v46, 0.0  ;;  %v619_v20 = vld [vmem:[%s9648_s4 + $0x10] sm:$0xff]  ;;  %7329 = vmatpush3.bf16.msra.mxu0 %v7326_v22  ;;  %v7330_v26 = vpack.c.bf16 %v6339_v25, %v6338_v24 }
 0x1c1   :  { %v258_v50 = vpop.xlane.xlu1 %257  ;;  %297 = vadd.xlane.f32.xlu0 %v296_v49  ;;  %v261_v51 = vpop.xlane.xlu0 %260  ;;  %v7322_v23 = vpack.c.bf16 %v620_v21, %v619_v20 }
 0x1c2   :  { %v275_v52 = vmul.f32 0.03125, %v258_v50  ;;  %v276_v53 = vmul.f32 0.03125, %v261_v51  ;;  %v290_v54 = vmul.f32 %v8027_v47, %v8027_v47  ;;  %v289_v55 = vmul.f32 %v8029_v48, %v8029_v48  ;;  %7331 = vmatprep.subr.bf16.mxu0 %v7330_v26 }
 0x1c3   :  { %7323 = vmatprep.subr.bf16.mxu1 %v7322_v23 }
 0x1c4   :  { %v8036_v56 = vsub.f32 %v222_v28, %v275_v52  ;;  %v8038_v57 = vsub.f32 %v227_v27, %v276_v53  ;;  %v302_v58 = vsel %vm115_vm0, %v290_v54, 0.0  ;;  %v299_v59 = vsel %vm115_vm0, %v289_v55, 0.0  ;;  %7325 = vmatpush3.bf16.msra.mxu1 %v7322_v23  ;;  %7333 = vmatpush3.bf16.msra.mxu0 %v7330_v26  ;;  %v6349_v27 = vld [vmem:[%s9648_s4 + $0x40] sm:$0xff]  ;;  %v6350_v28 = vld [vmem:[%s9648_s4 + $0x48] sm:$0xff] }
 0x1c5   :  { %v264_v60 = vpop.xlane.xlu1 %263  ;;  %303 = vadd.xlane.f32.xlu0 %v302_v58  ;;  %300 = vadd.xlane.f32.xlu1 %v299_v59  ;;  %v267_v61 = vpop.xlane.xlu0 %266  ;;  %v8093_v29 = vpack.c.bf16 %v6350_v28, %v6349_v27  ;;  %v8096_v53 = vld [vmem:[#allocation5 + $0x1] ss:$0 sm:$0xff] }
 0x1c6   :  { %v277_v62 = vmul.f32 0.03125, %v264_v60  ;;  %v278_v63 = vmul.f32 0.03125, %v267_v61  ;;  %v291_v0 = vmul.f32 %v8036_v56, %v8036_v56  ;;  %v292_v1 = vmul.f32 %v8038_v57, %v8038_v57  ;;  %v8099_v60 = vld [vmem:[#allocation5 + $0x2] ss:$0 sm:$0xff] }
 0x1c7   :  { %7335 = vmatprep.subr.bf16.mxu1 %v8093_v29 }
 0x1c8   :  { %v8046_v2 = vsub.f32 %v232_v33, %v277_v62  ;;  %v8048_v3 = vsub.f32 %v237_v31, %v278_v63  ;;  %v305_v4 = vsel %vm115_vm0, %v291_v0, 0.0  ;;  %v308_v5 = vsel %vm115_vm0, %v292_v1, 0.0 }
 0x1c9   :  { %v270_v6 = vpop.xlane.xlu1 %269  ;;  %306 = vadd.xlane.f32.xlu1 %v305_v4  ;;  %309 = vadd.xlane.f32.xlu0 %v308_v5 }
 0x1ca   :  { %v279_v7 = vmul.f32 0.03125, %v270_v6  ;;  %v293_v8 = vmul.f32 %v8046_v2, %v8046_v2  ;;  %v294_v9 = vmul.f32 %v8048_v3, %v8048_v3 }
 0x1cc   :  { %v8056_v10 = vsub.f32 %v242_v36, %v279_v7  ;;  %v311_v11 = vsel %vm115_vm0, %v293_v8, 0.0  ;;  %v314_v12 = vsel %vm115_vm0, %v294_v9, 0.0 }
 0x1cd   :  { %312 = vadd.xlane.f32.xlu1 %v311_v11  ;;  %315 = vadd.xlane.f32.xlu0 %v314_v12 }
 0x1ce   :  { %v295_v13 = vmul.f32 %v8056_v10, %v8056_v10 }
 0x1d0   :  { %v317_v14 = vsel %vm115_vm0, %v295_v13, 0.0 }
 0x1d1   :  { %318 = vadd.xlane.f32.xlu1 %v317_v14 }
 0x24e   :  { %v298_v30 = vpop.xlane.xlu0 %297 }
 0x24f   :  { %v320_v31 = vmul.f32 0.03125, %v298_v30 }
 0x251   :  { %v328_v32 = vadd.f32 1e-05, %v320_v31 }
 0x252   :  { %v301_v33 = vpop.xlane.xlu1 %300  ;;  %v304_v34 = vpop.xlane.xlu0 %303 }
 0x253   :  { %7468 = vrsqrt.f32 %v328_v32  ;;  %v321_v35 = vmul.f32 0.03125, %v301_v33  ;;  %v322_v36 = vmul.f32 0.03125, %v304_v34 }
 0x255   :  { %v329_v37 = vadd.f32 1e-05, %v321_v35  ;;  %v330_v38 = vadd.f32 1e-05, %v322_v36 }
 0x256   :  { %v307_v39 = vpop.xlane.xlu1 %306  ;;  %v310_v40 = vpop.xlane.xlu0 %309 }
 0x257   :  { %7470 = vrsqrt.f32 %v329_v37  ;;  %v323_v42 = vmul.f32 0.03125, %v307_v39  ;;  %v324_v43 = vmul.f32 0.03125, %v310_v40 }
 0x258   :  { %7472 = vrsqrt.f32 %v330_v38 }
 0x259   :  { %v331_v44 = vadd.f32 1e-05, %v323_v42  ;;  %v332_v45 = vadd.f32 1e-05, %v324_v43 }
 0x25a   :  { %v313_v46 = vpop.xlane.xlu1 %312  ;;  %v316_v49 = vpop.xlane.xlu0 %315 }
 0x25b   :  { %7474 = vrsqrt.f32 %v331_v44  ;;  %v325_v50 = vmul.f32 0.03125, %v313_v46  ;;  %v326_v51 = vmul.f32 0.03125, %v316_v49 }
 0x25c   :  { %7476 = vrsqrt.f32 %v332_v45 }
 0x25d   :  { %v7469_v52 = vpop.eup %7468  ;;  %v333_v54 = vadd.f32 1e-05, %v325_v50  ;;  %v334_v58 = vadd.f32 1e-05, %v326_v51 }
 0x25e   :  { %v344_v55 = vmul.f32 %v7469_v52, %v8023_v41  ;;  %v319_v59 = vpop.xlane.xlu1 %318 }
 0x25f   :  { %v327_v61 = vmul.f32 0.03125, %v319_v59  ;;  %7478 = vrsqrt.f32 %v333_v54 }
 0x260   :  { %v356_v62 = vmul.f32 %v8096_v53, %v344_v55  ;;  %7480 = vrsqrt.f32 %v334_v58 }
 0x261   :  { %v7471_v63 = vpop.eup %7470  ;;  %v335_v0 = vadd.f32 1e-05, %v327_v61 }
 0x262   :  { %v7473_v1 = vpop.eup %7472  ;;  %v345_v4 = vmul.f32 %v7471_v63, %v8029_v48  ;;  %v368_v5 = vadd.f32 %v8099_v60, %v356_v62 }
 0x263   :  { %v346_v6 = vmul.f32 %v7473_v1, %v8027_v47  ;;  %7482 = vrsqrt.f32 %v335_v0 }
 0x264   :  { %v357_v41 = vmul.f32 %v8096_v53, %v345_v4  ;;  %v8106_v7 = vmul.f32 0.70710677, %v368_v5  ;;  %v8141_v43 = vmul.f32 0.5, %v368_v5 }
 0x265   :  { %v7475_v8 = vpop.eup %7474  ;;  %v358_v9 = vmul.f32 %v8096_v53, %v346_v6 }
 0x266   :  { %v7477_v11 = vpop.eup %7476  ;;  %v369_v12 = vadd.f32 %v8099_v60, %v357_v41  ;;  %v347_v13 = vmul.f32 %v7475_v8, %v8036_v56  ;;  %v392_v48 = vand.u32 2147483647, %v8106_v7  ;;  %vm552_vm1 = vcmp.lt.f32.partialorder %v8106_v7, 0.0 }
 0x267   :  { %v348_v14 = vmul.f32 %v7477_v11, %v8038_v57  ;;  %v370_v15 = vadd.f32 %v8099_v60, %v358_v9 }
 0x268   :  { %v8114_v47 = vmul.f32 0.70710677, %v369_v12  ;;  %v400_v16 = vmul.f32 0.3275911, %v392_v48  ;;  %v359_v18 = vmul.f32 %v8096_v53, %v347_v13  ;;  %v504_v25 = vmul.f32 %v392_v48, %v392_v48 }
 0x269   :  { %v8116_v17 = vmul.f32 0.70710677, %v370_v15  ;;  %v360_v19 = vmul.f32 %v8096_v53, %v348_v14  ;;  %v7479_v22 = vpop.eup %7478  ;;  %v8155_v59 = vmul.f32 0.5, %v369_v12  ;;  %v8158_v62 = vmul.f32 0.5, %v370_v15 }
 0x26a   :  { %v393_v20 = vand.u32 2147483647, %v8114_v47  ;;  %v408_v21 = vadd.f32 1.0, %v400_v16  ;;  %v7481_v23 = vpop.eup %7480  ;;  %v8123_v57 = vadd.f32 %v8099_v60, %v359_v18  ;;  %v349_v30 = vmul.f32 %v7479_v22, %v8046_v2 }
 0x26b   :  { %v394_v56 = vand.u32 2147483647, %v8116_v17  ;;  %v8126_v27 = vadd.f32 %v8099_v60, %v360_v19  ;;  %v350_v32 = vmul.f32 %v7481_v23, %v8048_v3  ;;  %v512_v37 = vsub.f32 0.0, %v504_v25 }
 0x26c   :  { %v401_v24 = vmul.f32 0.3275911, %v393_v20  ;;  %7484 = vrcp.f32 %v408_v21  ;;  %v8131_v34 = vmul.f32 0.70710677, %v8123_v57  ;;  %v505_v36 = vmul.f32 %v393_v20, %v393_v20 }
 0x26d   :  { %v402_v26 = vmul.f32 0.3275911, %v394_v56  ;;  %v7483_v31 = vpop.eup %7482  ;;  %v8134_v35 = vmul.f32 0.70710677, %v8126_v27  ;;  %v361_v40 = vmul.f32 %v8096_v53, %v349_v30  ;;  %v362_v42 = vmul.f32 %v8096_v53, %v350_v32 }
 0x26e   :  { %v409_v28 = vadd.f32 1.0, %v401_v24  ;;  %v395_v38 = vand.u32 2147483647, %v8131_v34  ;;  %v351_v39 = vmul.f32 %v7483_v31, %v8056_v10  ;;  %v513_v46 = vsub.f32 0.0, %v505_v36  ;;  %v6351_v36 = vld [vmem:[%s9648_s4 + $0x50] sm:$0xff] }
 0x26f   :  { %v410_v33 = vadd.f32 1.0, %v402_v26  ;;  %v396_v2 = vand.u32 2147483647, %v8134_v35  ;;  %v8144_v45 = vadd.f32 %v8099_v60, %v361_v40  ;;  %v520_v49 = vmul.f32 1.442695, %v512_v37  ;;  %v6352_v37 = vld [vmem:[%s9648_s4 + $0x58] sm:$0xff] }
 0x270   :  { %7486 = vrcp.f32 %v409_v28  ;;  %v403_v3 = vmul.f32 0.3275911, %v395_v38  ;;  %v8147_v51 = vadd.f32 %v8099_v60, %v362_v42  ;;  %v506_v52 = vmul.f32 %v394_v56, %v394_v56 }
 0x271   :  { %7488 = vrcp.f32 %v410_v33  ;;  %v404_v44 = vmul.f32 0.3275911, %v396_v2  ;;  %v8152_v55 = vmul.f32 0.70710677, %v8144_v45  ;;  %v363_v58 = vmul.f32 %v8096_v53, %v351_v39 }
 0x272   :  { %v411_v50 = vadd.f32 1.0, %v403_v3  ;;  %v507_v63 = vmul.f32 %v395_v38, %v395_v38  ;;  %v508_v0 = vmul.f32 %v396_v2, %v396_v2  ;;  %v522_v4 = vmul.f32 1.442695, %v513_v46 }
 0x273   :  { %v412_v54 = vadd.f32 1.0, %v404_v44  ;;  %v397_v1 = vand.u32 2147483647, %v8152_v55  ;;  %v8162_v6 = vmul.f32 0.70710677, %v8147_v51  ;;  %v514_v53 = vsub.f32 0.0, %v506_v52 }
 0x274   :  { %7490 = vrcp.f32 %v411_v50  ;;  %v8167_v9 = vadd.f32 %v8099_v60, %v363_v58  ;;  %v515_v16 = vsub.f32 0.0, %v507_v63  ;;  %v516_v18 = vsub.f32 0.0, %v508_v0 }
 0x275   :  { %7492 = vrcp.f32 %v412_v54  ;;  %v405_v8 = vmul.f32 0.3275911, %v397_v1  ;;  %v509_v48 = vmul.f32 %v397_v1, %v397_v1  ;;  %v398_v14 = vand.u32 2147483647, %v8162_v6 }
 0x276   :  { %v8149_v10 = vpop.eup %7484  ;;  %7494 = vpow2.f32 %v520_v49  ;;  %v524_v56 = vmul.f32 1.442695, %v514_v53  ;;  %v8176_v23 = vmul.f32 0.70710677, %v8167_v9  ;;  %v526_v31 = vmul.f32 1.442695, %v515_v16 }
 0x277   :  { %v432_v61 = vmul.f32 1.0614054, %v8149_v10  ;;  %v413_v19 = vadd.f32 1.0, %v405_v8  ;;  %7496 = vpow2.f32 %v522_v4  ;;  %v406_v22 = vmul.f32 0.3275911, %v398_v14 }
 0x278   :  { %v517_v26 = vsub.f32 0.0, %v509_v48  ;;  %v510_v32 = vmul.f32 %v398_v14, %v398_v14  ;;  %v399_v33 = vand.u32 2147483647, %v8176_v23  ;;  %v528_v40 = vmul.f32 1.442695, %v516_v18 }
 0x279   :  { %v6311_v5 = vadd.f32 -1.4531521, %v432_v61  ;;  %7498 = vrcp.f32 %v413_v19  ;;  %v414_v28 = vadd.f32 1.0, %v406_v22  ;;  %v8197_v8 = vpack.c.bf16 %v6352_v37, %v6351_v36 }
 0x27a   :  { %v8164_v41 = vpop.eup %7486  ;;  %v407_v46 = vmul.f32 0.3275911, %v399_v33  ;;  %v530_v54 = vmul.f32 1.442695, %v517_v26  ;;  %v518_v0 = vsub.f32 0.0, %v510_v32  ;;  %v511_v48 = vmul.f32 %v399_v33, %v399_v33 }
 0x27b   :  { %v8169_v11 = vpop.eup %7488  ;;  %v448_v12 = vmul.f32 %v8149_v10, %v6311_v5  ;;  %v433_v13 = vmul.f32 1.0614054, %v8164_v41  ;;  %7500 = vrcp.f32 %v414_v28  ;;  %vm553_vm2 = vcmp.lt.f32.partialorder %v8114_v47, 0.0 }
 0x27c   :  { %v434_v15 = vmul.f32 1.0614054, %v8169_v11  ;;  %7502 = vpow2.f32 %v524_v56  ;;  %v415_v1 = vadd.f32 1.0, %v407_v46  ;;  %v532_v22 = vmul.f32 1.442695, %v518_v0 }
 0x27d   :  { %v456_v20 = vadd.f32 1.4214138, %v448_v12  ;;  %v6312_v21 = vadd.f32 -1.4531521, %v433_v13  ;;  %v519_v28 = vsub.f32 0.0, %v511_v48  ;;  %vm554_vm3 = vcmp.lt.f32.partialorder %v8116_v17, 0.0 }
 0x27e   :  { %v6313_v60 = vadd.f32 -1.4531521, %v434_v15  ;;  %v8188_v38 = vpop.eup %7490  ;;  %7504 = vrcp.f32 %v415_v1  ;;  %vm555_vm4 = vcmp.lt.f32.partialorder %v8131_v34, 0.0  ;;  %vm556_vm5 = vcmp.lt.f32.partialorder %v8134_v35, 0.0 }
 0x27f   :  { %v464_v24 = vmul.f32 %v8149_v10, %v456_v20  ;;  %v449_v25 = vmul.f32 %v8164_v41, %v6312_v21  ;;  %v8190_v3 = vpop.eup %7492  ;;  %v435_v44 = vmul.f32 1.0614054, %v8188_v38  ;;  %7506 = vpow2.f32 %v526_v31 }
 0x280   :  { %v450_v30 = vmul.f32 %v8169_v11, %v6313_v60  ;;  %v436_v52 = vmul.f32 1.0614054, %v8190_v3  ;;  %v7495_v58 = vpop.eup %7494  ;;  %7508 = vpow2.f32 %v528_v40  ;;  %v380_v34 = vmul.f32 0.5, %v8126_v27 }
 0x281   :  { %v6319_v39 = vadd.f32 -0.28449672, %v464_v24  ;;  %v457_v2 = vadd.f32 1.4214138, %v449_v25  ;;  %v6314_v63 = vadd.f32 -1.4531521, %v435_v44  ;;  %v7497_v14 = vpop.eup %7496  ;;  %7510 = vpow2.f32 %v530_v54 }
 0x282   :  { %v458_v42 = vadd.f32 1.4214138, %v450_v30  ;;  %v6315_v53 = vadd.f32 -1.4531521, %v436_v52  ;;  %7512 = vpow2.f32 %v532_v22  ;;  %v534_v54 = vmul.f32 1.442695, %v519_v28 }
 0x283   :  { %v480_v49 = vmul.f32 %v8149_v10, %v6319_v39  ;;  %v465_v50 = vmul.f32 %v8164_v41, %v457_v2  ;;  %v451_v13 = vmul.f32 %v8188_v38, %v6314_v63  ;;  %v8204_v19 = vpop.eup %7498  ;;  %vm557_vm6 = vcmp.lt.f32.partialorder %v8152_v55, 0.0 }
 0x284   :  { %v466_v61 = vmul.f32 %v8169_v11, %v458_v42  ;;  %v452_v18 = vmul.f32 %v8190_v3, %v6315_v53  ;;  %v437_v25 = vmul.f32 1.0614054, %v8204_v19  ;;  %7514 = vpow2.f32 %v534_v54 }
 0x285   :  { %v488_v4 = vadd.f32 0.2548296, %v480_v49  ;;  %v6320_v5 = vadd.f32 -0.28449672, %v465_v50  ;;  %v459_v21 = vadd.f32 1.4214138, %v451_v13  ;;  %v8210_v30 = vpop.eup %7500 }
 0x286   :  { %v6321_v12 = vadd.f32 -0.28449672, %v466_v61  ;;  %v460_v24 = vadd.f32 1.4214138, %v452_v18  ;;  %v6316_v36 = vadd.f32 -1.4531521, %v437_v25  ;;  %v7503_v37 = vpop.eup %7502 }
 0x287   :  { %v496_v15 = vmul.f32 %v8149_v10, %v488_v4  ;;  %v481_v16 = vmul.f32 %v8164_v41, %v6320_v5  ;;  %v467_v26 = vmul.f32 %v8188_v38, %v459_v21  ;;  %v438_v40 = vmul.f32 1.0614054, %v8210_v30  ;;  %v592_v13 = vld [vmem:[%s9645_s1] sm:$0xff] }
 0x288   :  { %v482_v20 = vmul.f32 %v8169_v11, %v6321_v12  ;;  %v468_v33 = vmul.f32 %v8190_v3, %v460_v24  ;;  %v453_v49 = vmul.f32 %v8204_v19, %v6316_v36  ;;  %v8222_v0 = vpop.eup %7504  ;;  %v381_v55 = vmul.f32 0.5, %v8144_v45  ;;  %v598_v45 = vld [vmem:[%s9645_s1 + $0x30] sm:$0xff] }
 0x289   :  { %v536_v60 = vmul.f32 %v7495_v58, %v496_v15  ;;  %v489_v56 = vadd.f32 0.2548296, %v481_v16  ;;  %v6322_v2 = vadd.f32 -0.28449672, %v467_v26  ;;  %v6317_v52 = vadd.f32 -1.4531521, %v438_v40  ;;  %v7507_v12 = vpop.eup %7506 }
 0x28a   :  { %v490_v10 = vadd.f32 0.2548296, %v482_v20  ;;  %v6323_v46 = vadd.f32 -0.28449672, %v468_v33  ;;  %v461_v63 = vadd.f32 1.4214138, %v453_v49  ;;  %v7509_v16 = vpop.eup %7508 }
 0x28b   :  { %v544_v31 = vsub.f32 1.0, %v536_v60  ;;  %v497_v32 = vmul.f32 %v8164_v41, %v489_v56  ;;  %v483_v41 = vmul.f32 %v8188_v38, %v6322_v2  ;;  %v454_v53 = vmul.f32 %v8210_v30, %v6317_v52 }
 0x28c   :  { %v498_v39 = vmul.f32 %v8169_v11, %v490_v10  ;;  %v484_v11 = vmul.f32 %v8190_v3, %v6323_v46  ;;  %v469_v7 = vmul.f32 %v8204_v19, %v461_v63  ;;  %v439_v15 = vmul.f32 1.0614054, %v8222_v0  ;;  %v7511_v10 = vpop.eup %7510 }
 0x28d   :  { %v560_v42 = vsub.f32 0.0, %v544_v31  ;;  %v537_v44 = vmul.f32 %v7497_v14, %v497_v32  ;;  %v491_v5 = vadd.f32 0.2548296, %v483_v41  ;;  %v462_v22 = vadd.f32 1.4214138, %v454_v53  ;;  %v7513_v36 = vpop.eup %7512 }
 0x28e   :  { %v538_v50 = vmul.f32 %v7503_v37, %v498_v39  ;;  %v492_v14 = vadd.f32 0.2548296, %v484_v11  ;;  %v6324_v24 = vadd.f32 -0.28449672, %v469_v7  ;;  %v6318_v25 = vadd.f32 -1.4531521, %v439_v15 }
 0x28f   :  { %v568_v58 = vsel %vm552_vm1, %v560_v42, %v544_v31  ;;  %v545_v61 = vsub.f32 1.0, %v537_v44  ;;  %v499_v21 = vmul.f32 %v8188_v38, %v491_v5  ;;  %v594_v37 = vld [vmem:[%s9645_s1 + $0x10] sm:$0xff]  ;;  %vm558_vm7 = vcmp.lt.f32.partialorder %v8162_v6, 0.0 }
 0x290   :  { %v576_v1 = vadd.f32 1.0, %v568_v58  ;;  %v546_v4 = vsub.f32 1.0, %v538_v50  ;;  %v500_v56 = vmul.f32 %v8190_v3, %v492_v14  ;;  %v485_v47 = vmul.f32 %v8204_v19, %v6324_v24 }
 0x291   :  { %v561_v48 = vsub.f32 0.0, %v545_v61  ;;  %v539_v32 = vmul.f32 %v7507_v12, %v499_v21  ;;  %v470_v3 = vmul.f32 %v8210_v30, %v462_v22  ;;  %v455_v2 = vmul.f32 %v8222_v0, %v6318_v25  ;;  %v596_v12 = vld [vmem:[%s9645_s1 + $0x20] sm:$0xff]  ;;  %v7515_v21 = vpop.eup %7514 }
 0x292   :  { %v584_v18 = vmul.f32 %v576_v1, %v8141_v43  ;;  %v562_v20 = vsub.f32 0.0, %v546_v4  ;;  %v593_v43 = vld [vmem:[%s9645_s1 + $0x8] sm:$0xff]  ;;  %v540_v33 = vmul.f32 %v7509_v16, %v500_v56  ;;  %v493_v44 = vadd.f32 0.2548296, %v485_v47 }
 0x293   :  { %v569_v60 = vsel %vm553_vm2, %v561_v48, %v545_v61  ;;  %v547_v39 = vsub.f32 1.0, %v539_v32  ;;  %v6325_v46 = vadd.f32 -0.28449672, %v470_v3  ;;  %v463_v41 = vadd.f32 1.4214138, %v455_v2  ;;  %v599_v3 = vld [vmem:[%s9645_s1 + $0x38] sm:$0xff] }
 0x294   :  { %v8235_v26 = vadd.f32 %v592_v13, %v584_v18  ;;  %v577_v28 = vadd.f32 1.0, %v569_v60  ;;  %v570_v31 = vsel %vm554_vm3, %v562_v20, %v546_v4  ;;  %v548_v42 = vsub.f32 1.0, %v540_v33  ;;  %v597_v60 = vld [vmem:[%s9645_s1 + $0x28] sm:$0xff]  ;;  %v6327_v2 = vld [vmem:[%s9652_s8] ss:$0 sm:$0xff] }
 0x295   :  { %v578_v38 = vadd.f32 1.0, %v570_v31  ;;  %v563_v50 = vsub.f32 0.0, %v547_v39  ;;  %v501_v58 = vmul.f32 %v8204_v19, %v493_v44  ;;  %v486_v61 = vmul.f32 %v8210_v30, %v6325_v46 }
 0x296   :  { %6862 = vmatprep.mubr.msk.f32.mxu1 %vm115_vm0, %v8235_v26  ;;  %6882 = vmatprep.mubr.msk.f32.mxu0 %vm115_vm0, %v8235_v26  ;;  %v585_v17 = vmul.f32 %v577_v28, %v8155_v59  ;;  %v564_v52 = vsub.f32 0.0, %v548_v42  ;;  %v471_v54 = vmul.f32 %v8222_v0, %v463_v41  ;;  %v382_v31 = vmul.f32 0.5, %v8147_v51 }
 0x297   :  { %v586_v40 = vmul.f32 %v578_v38, %v8158_v62  ;;  %v379_v62 = vmul.f32 0.5, %v8123_v57  ;;  %v571_v11 = vsel %vm555_vm4, %v563_v50, %v547_v39  ;;  %v541_v1 = vmul.f32 %v7511_v10, %v501_v58  ;;  %v595_v57 = vld [vmem:[%s9645_s1 + $0x18] sm:$0xff] }
 0x298   :  { %v8255_v49 = vadd.f32 %v593_v43, %v585_v17  ;;  %v579_v19 = vadd.f32 1.0, %v571_v11  ;;  %v572_v63 = vsel %vm556_vm5, %v564_v52, %v548_v42  ;;  %v494_v4 = vadd.f32 0.2548296, %v486_v61 }
 0x299   :  { %v8257_v59 = vadd.f32 %v594_v37, %v586_v40  ;;  %v580_v5 = vadd.f32 1.0, %v572_v63  ;;  %v6326_v35 = vadd.f32 -0.28449672, %v471_v54  ;;  %v549_v13 = vsub.f32 1.0, %v541_v1 }
 0x29a   :  { %6863 = vmatmul.mubr.msk.f32.vlgmr.msra.gmra.mrb[4].mxu1 %vm115_vm0, %v8255_v49  ;;  %6883 = vmatmul.mubr.msk.f32.vlgmr.msra.gmra.mrb[4].mxu0 %vm115_vm0, %v8255_v49  ;;  %v587_v53 = vmul.f32 %v579_v19, %v379_v62  ;;  %v502_v48 = vmul.f32 %v8210_v30, %v494_v4  ;;  %vm559_vm8 = vcmp.lt.f32.partialorder %v8176_v23, 0.0  ;;  %v383_v51 = vmul.f32 0.5, %v8167_v9  ;;  %v6340_v23 = vld [vmem:[%s9652_s8 + $0x1] ss:$0 sm:$0xff] }
 0x29b   :  { %6865 = vmatprep.mubr.msk.f32.mxu1 %vm115_vm0, %v8257_v59  ;;  %6885 = vmatprep.mubr.msk.f32.mxu0 %vm115_vm0, %v8257_v59  ;;  %v588_v14 = vmul.f32 %v580_v5, %v380_v34  ;;  %v487_v7 = vmul.f32 %v8222_v0, %v6326_v35  ;;  %v565_v27 = vsub.f32 0.0, %v549_v13  ;;  %v7832_v9 = vmov 0.0  }
 0x29c   :  { %7337 = vmatpush3.bf16.msra.mxu1 %v8093_v29  ;;  %v8285_v15 = vadd.f32 %v595_v57, %v587_v53  ;;  %v542_v16 = vmul.f32 %v7513_v36, %v502_v48  ;;  %6914 = vmatprep.subr.mxu0 %v7832_v9 }
 0x29d   :  { %7339 = vmatprep.subr.bf16.mxu1 %v8197_v8  ;;  %v8287_v18 = vadd.f32 %v596_v12, %v588_v14  ;;  %v495_v29 = vadd.f32 0.2548296, %v487_v7  ;;  %v573_v30 = vsel %vm557_vm6, %v565_v27, %v549_v13 }
 0x29e   :  { %6866 = vmatmul.mubr.msk.f32.gmra.mrb[6].mxu1 %vm115_vm0, %v8285_v15  ;;  %6886 = vmatmul.mubr.msk.f32.gmra.mrb[6].mxu0 %vm115_vm0, %v8285_v15  ;;  %v550_v20 = vsub.f32 1.0, %v542_v16  ;;  %v581_v22 = vadd.f32 1.0, %v573_v30 }
 0x29f   :  { %6868 = vmatprep.mubr.msk.f32.mxu1 %vm115_vm0, %v8287_v18  ;;  %6888 = vmatprep.mubr.msk.f32.mxu0 %vm115_vm0, %v8287_v18 }
 0x2a0   :  { %7341 = vmatpush3.bf16.msra.mxu1 %v8197_v8  ;;  %v503_v8 = vmul.f32 %v8222_v0, %v495_v29  ;;  %v566_v56 = vsub.f32 0.0, %v550_v20  ;;  %v589_v24 = vmul.f32 %v581_v22, %v381_v55  ;;  %v6353_v29 = vld [vmem:[%s9652_s8 + $0x2] ss:$0 sm:$0xff] }
 0x2a1   :  { %6919 = vmatprep.subr.mxu1 %v7832_v9 }
 0x2a2   :  { %v543_v25 = vmul.f32 %v7515_v21, %v503_v8  ;;  %v574_v10 = vsel %vm558_vm7, %v566_v56, %v550_v20  ;;  %v8305_v28 = vadd.f32 %v597_v60, %v589_v24 }
 0x2a3   :  { %v582_v32 = vadd.f32 1.0, %v574_v10 }
 0x2a4   :  { %v551_v43 = vsub.f32 1.0, %v543_v25  ;;  %6869 = vmatmul.mubr.msk.f32.gmra.mrb[8].mxu1 %vm115_vm0, %v8305_v28  ;;  %6889 = vmatmul.mubr.msk.f32.gmra.mrb[8].mxu0 %vm115_vm0, %v8305_v28 }
 0x2a5   :  { %v590_v0 = vmul.f32 %v582_v32, %v382_v31 }
 0x2a6   :  { %v567_v6 = vsub.f32 0.0, %v551_v43 }
 0x2a7   :  { %v8316_v38 = vadd.f32 %v598_v45, %v590_v0 }
 0x2a8   :  { %v575_v33 = vsel %vm559_vm8, %v567_v6, %v551_v43 }
 0x2a9   :  { %v583_v47 = vadd.f32 1.0, %v575_v33  ;;  %6871 = vmatprep.mubr.msk.f32.mxu1 %vm115_vm0, %v8316_v38  ;;  %6891 = vmatprep.mubr.msk.f32.mxu0 %vm115_vm0, %v8316_v38 }
 0x2ab   :  { %v591_v36 = vmul.f32 %v583_v47, %v383_v51 }
 0x2ad   :  { %v8326_v17 = vadd.f32 %v599_v3, %v591_v36 }
 0x2af   :  { %6872 = vmatmul.mubr.msk.f32.gmra.mrb[10].mxu1 %vm115_vm0, %v8326_v17  ;;  %6892 = vmatmul.mubr.msk.f32.gmra.mrb[10].mxu0 %vm115_vm0, %v8326_v17 }
 0x2b0   :  { %6902 = vmatprep.mubr.msk.f32.mxu1 %vm115_vm0, %v8235_v26  ;;  %6916 = vmatprep.mubr.msk.f32.mxu0 %vm7833_vm9, %v7832_v9 }
 0x2b3   :  { %6903 = vmatmul.mubr.msk.f32.vlgmr.msra.gmra.mrb[12].mxu1 %vm115_vm0, %v8255_v49 }
 0x2b4   :  { %6905 = vmatprep.mubr.msk.f32.mxu1 %vm115_vm0, %v8257_v59 }
 0x2b7   :  { %6906 = vmatmul.mubr.msk.f32.gmra.mrb[14].mxu1 %vm115_vm0, %v8285_v15 }
 0x2b8   :  { %6908 = vmatprep.mubr.msk.f32.mxu1 %vm115_vm0, %v8287_v18 }
 0x2bb   :  { %6909 = vmatmul.mubr.msk.f32.gmra.mrb[16].mxu1 %vm115_vm0, %v8305_v28 }
 0x2bc   :  { %6911 = vmatprep.mubr.msk.f32.mxu1 %vm115_vm0, %v8316_v38 }
 0x2bf   :  { %6912 = vmatmul.mubr.msk.f32.gmra.mrb[18].mxu1 %vm115_vm0, %v8326_v17 }
 0x2c0   :  { %6921 = vmatprep.mubr.msk.f32.mxu1 %vm7833_vm9, %v7832_v9 }
 0x36d   :  { %v6864_v37 = vpop.f32.mrb[4].mxu1  ;;  %v6884_v39 = vpop.f32.mrb[4].mxu0 }
 0x36e   :  { %v835_v40 = vadd.f32 %v6884_v39, %v6340_v23  ;;  %v715_v42 = vpop.f32.mrb[5].mxu1  ;;  %v829_v44 = vpop.f32.mrb[5].mxu0  ;;  %v721_v50 = vadd.f32 %v6864_v37, %v6327_v2 }
 0x36f   :  { %v830_v46 = vadd.f32 %v6340_v23, %v829_v44  ;;  %v716_v41 = vadd.f32 %v6327_v2, %v715_v42 }
 0x370   :  { %6920 = vmatpush3.xpose.msk.msra.mxu1 %vm115_vm0, %v835_v40 }
 0x371   :  { %6915 = vmatpush3.xpose.msk.msra.mxu0 %vm115_vm0, %v830_v46  ;;  %6929 = vmatprep.subr.mxu1 %v7832_v9  ;;  %v6867_v52 = vpop.f32.mrb[6].mxu1  ;;  %v6887_v58 = vpop.f32.mrb[6].mxu0 }
 0x372   :  { %6924 = vmatprep.subr.mxu0 %v7832_v9  ;;  %v845_v61 = vadd.f32 %v6887_v58, %v6340_v23  ;;  %v725_v62 = vpop.f32.mrb[7].mxu1  ;;  %v839_v11 = vpop.f32.mrb[7].mxu0  ;;  %v731_v19 = vadd.f32 %v6867_v52, %v6327_v2 }
 0x373   :  { %6922 = vmatmul.mubr.msk.f32.vlgmr.msra.gmra.mrb[20].mxu1 %vm115_vm0, %v721_v50  ;;  %v840_v54 = vadd.f32 %v6340_v23, %v839_v11  ;;  %v726_v63 = vadd.f32 %v6327_v2, %v725_v62 }
 0x374   :  { %6917 = vmatmul.mubr.msk.f32.vlgmr.msra.gmra.mrb[12].mxu0 %vm115_vm0, %v716_v41  ;;  %6931 = vmatprep.mubr.msk.f32.mxu1 %vm7833_vm9, %v7832_v9 }
 0x375   :  { %6926 = vmatprep.mubr.msk.f32.mxu0 %vm7833_vm9, %v7832_v9  ;;  %6930 = vmatpush3.xpose.msk.msra.mxu1 %vm115_vm0, %v845_v61 }
 0x376   :  { %6925 = vmatpush3.xpose.msk.msra.mxu0 %vm115_vm0, %v840_v54  ;;  %6939 = vmatprep.subr.mxu1 %v7832_v9 }
 0x377   :  { %6934 = vmatprep.subr.mxu0 %v7832_v9  ;;  %v6870_v1 = vpop.f32.mrb[8].mxu1  ;;  %v6890_v4 = vpop.f32.mrb[8].mxu0 }
 0x378   :  { %6932 = vmatmul.mubr.msk.f32.vlgmr.msra.gmra.mrb[22].mxu1 %vm115_vm0, %v731_v19  ;;  %v855_v57 = vadd.f32 %v6890_v4, %v6340_v23  ;;  %v735_v34 = vpop.f32.mrb[9].mxu1  ;;  %v849_v5 = vpop.f32.mrb[9].mxu0  ;;  %v741_v53 = vadd.f32 %v6870_v1, %v6327_v2 }
 0x379   :  { %6927 = vmatmul.mubr.msk.f32.vlgmr.msra.gmra.mrb[14].mxu0 %vm115_vm0, %v726_v63  ;;  %6941 = vmatprep.mubr.msk.f32.mxu1 %vm7833_vm9, %v7832_v9  ;;  %v850_v35 = vadd.f32 %v6340_v23, %v849_v5  ;;  %v736_v12 = vadd.f32 %v6327_v2, %v735_v34 }
 0x37a   :  { %6936 = vmatprep.mubr.msk.f32.mxu0 %vm7833_vm9, %v7832_v9  ;;  %6940 = vmatpush3.xpose.msk.msra.mxu1 %vm115_vm0, %v855_v57 }
 0x37b   :  { %6935 = vmatpush3.xpose.msk.msra.mxu0 %vm115_vm0, %v850_v35  ;;  %6949 = vmatprep.subr.mxu1 %v7832_v9 }
 0x37c   :  { %6944 = vmatprep.subr.mxu0 %v7832_v9 }
 0x37d   :  { %6942 = vmatmul.mubr.msk.f32.vlgmr.msra.gmra.mrb[24].mxu1 %vm115_vm0, %v741_v53 }
 0x37e   :  { %6937 = vmatmul.mubr.msk.f32.vlgmr.msra.gmra.mrb[16].mxu0 %vm115_vm0, %v736_v12  ;;  %6951 = vmatprep.mubr.msk.f32.mxu1 %vm7833_vm9, %v7832_v9 }
 0x37f   :  { %6946 = vmatprep.mubr.msk.f32.mxu0 %vm7833_vm9, %v7832_v9 }
 0x382   :  { %v6873_v13 = vpop.f32.mrb[10].mxu1  ;;  %v6893_v48 = vpop.f32.mrb[10].mxu0 }
 0x383   :  { %v865_v14 = vadd.f32 %v6893_v48, %v6340_v23  ;;  %v745_v7 = vpop.f32.mrb[11].mxu1  ;;  %v859_v27 = vpop.f32.mrb[11].mxu0  ;;  %v751_v30 = vadd.f32 %v6873_v13, %v6327_v2 }
 0x384   :  { %v860_v16 = vadd.f32 %v6340_v23, %v859_v27  ;;  %v746_v21 = vadd.f32 %v6327_v2, %v745_v7 }
 0x385   :  { %6950 = vmatpush3.xpose.msk.msra.mxu1 %vm115_vm0, %v865_v14 }
 0x386   :  { %v6904_v20 = vpop.f32.mrb[12].mxu1  ;;  %6945 = vmatpush3.xpose.msk.msra.mxu0 %vm115_vm0, %v860_v16  ;;  %6959 = vmatprep.subr.mxu1 %v7832_v9 }
 0x387   :  { %v949_v55 = vadd.f32 %v6904_v20, %v6353_v29  ;;  %v943_v22 = vpop.f32.mrb[13].mxu1  ;;  %6954 = vmatprep.subr.mxu0 %v7832_v9 }
 0x388   :  { %v944_v8 = vadd.f32 %v6353_v29, %v943_v22  ;;  %6952 = vmatmul.mubr.msk.f32.vlgmr.msra.gmra.mrb[26].mxu1 %vm115_vm0, %v751_v30 }
 0x389   :  { %6947 = vmatmul.mubr.msk.f32.vlgmr.msra.gmra.mrb[18].mxu0 %vm115_vm0, %v746_v21  ;;  %6960 = vmatpush3.msra.mxu1 %v949_v55 }
 0x38a   :  { %v6907_v60 = vpop.f32.mrb[14].mxu1  ;;  %6955 = vmatpush3.msra.mxu0 %v944_v8  ;;  %6961 = vmatprep.mubr.msk.f32.mxu1 %vm7833_vm9, %v7832_v9 }
 0x38b   :  { %v8401_v56 = vadd.f32 %v6907_v60, %v6353_v29  ;;  %v953_v24 = vpop.f32.mrb[15].mxu1  ;;  %6969 = vmatprep.subr.mxu1 %v7832_v9  ;;  %6956 = vmatprep.mubr.msk.f32.mxu0 %vm7833_vm9, %v7832_v9 }
 0x38c   :  { %v8406_v25 = vadd.f32 %v6353_v29, %v953_v24  ;;  %6964 = vmatprep.subr.mxu0 %v7832_v9 }
 0x38e   :  { %v6910_v10 = vpop.f32.mrb[16].mxu1 }
 0x38f   :  { %v8409_v31 = vadd.f32 %v6910_v10, %v6353_v29  ;;  %v963_v32 = vpop.f32.mrb[17].mxu1 }
 0x390   :  { %v8411_v43 = vadd.f32 %v6353_v29, %v963_v32 }
 0x392   :  { %v6913_v45 = vpop.f32.mrb[18].mxu1 }
 0x393   :  { %v8413_v0 = vadd.f32 %v6913_v45, %v6353_v29  ;;  %v973_v6 = vpop.f32.mrb[19].mxu1 }
 0x394   :  { %v8415_v33 = vadd.f32 %v6353_v29, %v973_v6 }
 0x446   :  { %v1130_v51 = vpop.f32.mrb[20].mxu1 }
 0x447   :  { %v1591_v47 = vmul.f32 0.17677669, %v1130_v51  ;;  %v1054_v3 = vpop.f32.mrb[12].mxu0  ;;  %v6923_v36 = vpop.f32.mrb[21].mxu1 }
 0x448   :  { %v1590_v23 = vmul.f32 0.17677669, %v1054_v3  ;;  %v6918_v37 = vpop.f32.mrb[13].mxu0 }
 0x449   :  { %v1602_v39 = vsel %vm1598_vm10, %v1591_v47, -inf }
 0x44a   :  { %1603 = vmax.xlane.f32.xlu1 %v1602_v39  ;;  %v1599_v2 = vsel %vm1598_vm10, %v1590_v23, -inf }
 0x44b   :  { %1600 = vmax.xlane.f32.xlu0 %v1599_v2  ;;  %v1282_v40 = vpop.f32.mrb[22].mxu1 }
 0x44c   :  { %v1593_v42 = vmul.f32 0.17677669, %v1282_v40  ;;  %v1206_v44 = vpop.f32.mrb[14].mxu0  ;;  %v6933_v46 = vpop.f32.mrb[23].mxu1 }
 0x44d   :  { %v1592_v50 = vmul.f32 0.17677669, %v1206_v44  ;;  %v6928_v41 = vpop.f32.mrb[15].mxu0 }
 0x44e   :  { %v1608_v52 = vsel %vm1598_vm10, %v1593_v42, -inf }
 0x44f   :  { %1609 = vmax.xlane.f32.xlu1 %v1608_v52  ;;  %v1605_v58 = vsel %vm1598_vm10, %v1592_v50, -inf }
 0x450   :  { %1606 = vmax.xlane.f32.xlu0 %v1605_v58  ;;  %v1434_v61 = vpop.f32.mrb[24].mxu1 }
 0x451   :  { %v1595_v62 = vmul.f32 0.17677669, %v1434_v61  ;;  %v1358_v11 = vpop.f32.mrb[16].mxu0  ;;  %v6943_v54 = vpop.f32.mrb[25].mxu1 }
 0x452   :  { %v1594_v19 = vmul.f32 0.17677669, %v1358_v11  ;;  %v6938_v63 = vpop.f32.mrb[17].mxu0 }
 0x453   :  { %v1614_v1 = vsel %vm1598_vm10, %v1595_v62, -inf }
 0x454   :  { %1615 = vmax.xlane.f32.xlu1 %v1614_v1  ;;  %v1611_v4 = vsel %vm1598_vm10, %v1594_v19, -inf }
 0x455   :  { %1612 = vmax.xlane.f32.xlu0 %v1611_v4 }
 0x45b   :  { %v1586_v57 = vpop.f32.mrb[26].mxu1 }
 0x45c   :  { %v1597_v34 = vmul.f32 0.17677669, %v1586_v57  ;;  %v1510_v5 = vpop.f32.mrb[18].mxu0  ;;  %v6953_v35 = vpop.f32.mrb[27].mxu1 }
 0x45d   :  { %v1596_v53 = vmul.f32 0.17677669, %v1510_v5  ;;  %v6948_v12 = vpop.f32.mrb[19].mxu0 }
 0x45e   :  { %v1620_v13 = vsel %vm1598_vm10, %v1597_v34, -inf }
 0x45f   :  { %1621 = vmax.xlane.f32.xlu1 %v1620_v13  ;;  %v1617_v48 = vsel %vm1598_vm10, %v1596_v53, -inf }
 0x460   :  { %1618 = vmax.xlane.f32.xlu0 %v1617_v48 }
 0x4d7   :  { %v1604_v14 = vpop.xlane.xlu1 %1603 }
 0x4d8   :  { %v1624_v7 = vsub.f32 %v1591_v47, %v1604_v14  ;;  %v1601_v27 = vpop.xlane.xlu0 %1600 }
 0x4d9   :  { %v1623_v16 = vsub.f32 %v1590_v23, %v1601_v27 }
 0x4da   :  { %v1633_v29 = vmul.f32 1.442695, %v1624_v7 }
 0x4db   :  { %v1631_v30 = vmul.f32 1.442695, %v1623_v16 }
 0x4dc   :  { %7516 = vpow2.f32 %v1633_v29  ;;  %v1610_v20 = vpop.xlane.xlu1 %1609 }
 0x4dd   :  { %7518 = vpow2.f32 %v1631_v30  ;;  %v1626_v21 = vsub.f32 %v1593_v42, %v1610_v20  ;;  %v1607_v55 = vpop.xlane.xlu0 %1606  ;;  %v2271_v30 = vld [vmem:[%s9649_s5] sm:$0xff] }
 0x4de   :  { %v1625_v22 = vsub.f32 %v1592_v50, %v1607_v55 }
 0x4df   :  { %v1637_v8 = vmul.f32 1.442695, %v1626_v21 }
 0x4e0   :  { %v1635_v60 = vmul.f32 1.442695, %v1625_v22 }
 0x4e1   :  { %7520 = vpow2.f32 %v1637_v8  ;;  %v1616_v24 = vpop.xlane.xlu1 %1615  ;;  %v2273_v8 = vld [vmem:[%s9649_s5 + $0x10] sm:$0xff] }
 0x4e2   :  { %7522 = vpow2.f32 %v1635_v60  ;;  %v1628_v32 = vsub.f32 %v1595_v62, %v1616_v24  ;;  %v1613_v45 = vpop.xlane.xlu0 %1612  ;;  %v2274_v60 = vld [vmem:[%s9649_s5 + $0x18] sm:$0xff] }
 0x4e3   :  { %v1627_v51 = vsub.f32 %v1594_v19, %v1613_v45 }
 0x4e4   :  { %v1641_v3 = vmul.f32 1.442695, %v1628_v32  ;;  %v7346_v32 = vpack.c.bf16 %v2274_v60, %v2273_v8 }
 0x4e5   :  { %v1639_v23 = vmul.f32 1.442695, %v1627_v51 }
 0x4e6   :  { %v7517_v10 = vpop.eup %7516  ;;  %7524 = vpow2.f32 %v1641_v3 }
 0x4e7   :  { %v7519_v6 = vpop.eup %7518  ;;  %v1650_v47 = vsel %vm1598_vm10, %v7517_v10, 0.0  ;;  %7526 = vpow2.f32 %v1639_v23 }
 0x4e8   :  { %1651 = vadd.xlane.f32.xlu1 %v1650_v47  ;;  %v1647_v36 = vsel %vm1598_vm10, %v7519_v6, 0.0 }
 0x4e9   :  { %1648 = vadd.xlane.f32.xlu0 %v1647_v36 }
 0x4eb   :  { %v7521_v37 = vpop.eup %7520 }
 0x4ec   :  { %v7523_v39 = vpop.eup %7522  ;;  %v1622_v2 = vpop.xlane.xlu1 %1621  ;;  %v1656_v40 = vsel %vm1598_vm10, %v7521_v37, 0.0 }
 0x4ed   :  { %v1630_v42 = vsub.f32 %v1597_v34, %v1622_v2  ;;  %v1619_v44 = vpop.xlane.xlu0 %1618  ;;  %1657 = vadd.xlane.f32.xlu1 %v1656_v40  ;;  %v1653_v46 = vsel %vm1598_vm10, %v7523_v39, 0.0 }
 0x4ee   :  { %v1629_v50 = vsub.f32 %v1596_v53, %v1619_v44  ;;  %1654 = vadd.xlane.f32.xlu0 %v1653_v46 }
 0x4ef   :  { %v1645_v41 = vmul.f32 1.442695, %v1630_v42 }
 0x4f0   :  { %v1643_v52 = vmul.f32 1.442695, %v1629_v50  ;;  %v7525_v58 = vpop.eup %7524 }
 0x4f1   :  { %7528 = vpow2.f32 %v1645_v41  ;;  %v7527_v61 = vpop.eup %7526  ;;  %v1662_v62 = vsel %vm1598_vm10, %v7525_v58, 0.0 }
 0x4f2   :  { %7530 = vpow2.f32 %v1643_v52  ;;  %1663 = vadd.xlane.f32.xlu1 %v1662_v62  ;;  %v1659_v11 = vsel %vm1598_vm10, %v7527_v61, 0.0  ;;  %v6386_v52 = vld [vmem:[%s9652_s8 + $0x3] ss:$0 sm:$0xff] }
 0x4f3   :  { %1660 = vadd.xlane.f32.xlu0 %v1659_v11 }
 0x4fb   :  { %v8431_v54 = vpop.eup %7528 }
 0x4fc   :  { %v8433_v19 = vpop.eup %7530  ;;  %v1668_v63 = vsel %vm1598_vm10, %v8431_v54, 0.0 }
 0x4fd   :  { %1669 = vadd.xlane.f32.xlu1 %v1668_v63  ;;  %v1665_v1 = vsel %vm1598_vm10, %v8433_v19, 0.0 }
 0x4fe   :  { %1666 = vadd.xlane.f32.xlu0 %v1665_v1 }
 0x575   :  { %v1652_v4 = vpop.xlane.xlu1 %1651 }
 0x576   :  { %7532 = vrcp.f32 %v1652_v4  ;;  %v1649_v57 = vpop.xlane.xlu0 %1648 }
 0x577   :  { %7534 = vrcp.f32 %v1649_v57 }
 0x57a   :  { %v1658_v34 = vpop.xlane.xlu1 %1657 }
 0x57b   :  { %7536 = vrcp.f32 %v1658_v34  ;;  %v1655_v5 = vpop.xlane.xlu0 %1654 }
 0x57c   :  { %7538 = vrcp.f32 %v1655_v5 }
 0x57f   :  { %v1664_v48 = vpop.xlane.xlu1 %1663 }
 0x580   :  { %v7533_v35 = vpop.eup %7532  ;;  %7540 = vrcp.f32 %v1664_v48  ;;  %v1661_v14 = vpop.xlane.xlu0 %1660 }
 0x581   :  { %v7535_v53 = vpop.eup %7534  ;;  %v1680_v12 = vmul.f32 %v7533_v35, %v7517_v10  ;;  %7542 = vrcp.f32 %v1661_v14 }
 0x582   :  { %v1679_v13 = vmul.f32 %v7535_v53, %v7519_v6 }
 0x583   :  { %6962 = vmatmul.mubr.msk.f32.vlgmr.msra.gmra.mrb[28].mxu1 %vm1598_vm10, %v1680_v12 }
 0x584   :  { %6970 = vmatpush3.msra.mxu1 %v8401_v56  ;;  %6957 = vmatmul.mubr.msk.f32.vlgmr.msra.gmra.mrb[20].mxu0 %vm1598_vm10, %v1679_v13 }
 0x585   :  { %6965 = vmatpush3.msra.mxu0 %v8406_v25  ;;  %6971 = vmatprep.mubr.msk.f32.mxu1 %vm7833_vm9, %v7832_v9  ;;  %v7537_v7 = vpop.eup %7536 }
 0x586   :  { %6979 = vmatprep.subr.mxu1 %v7832_v9  ;;  %6966 = vmatprep.mubr.msk.f32.mxu0 %vm7833_vm9, %v7832_v9  ;;  %v7539_v27 = vpop.eup %7538  ;;  %v1682_v16 = vmul.f32 %v7537_v7, %v7521_v37 }
 0x587   :  { %6974 = vmatprep.subr.mxu0 %v7832_v9  ;;  %v1681_v29 = vmul.f32 %v7539_v27, %v7523_v39 }
 0x588   :  { %6972 = vmatmul.mubr.msk.f32.vlgmr.msra.gmra.mrb[30].mxu1 %vm1598_vm10, %v1682_v16 }
 0x589   :  { %6980 = vmatpush3.msra.mxu1 %v8409_v31  ;;  %6967 = vmatmul.mubr.msk.f32.vlgmr.msra.gmra.mrb[22].mxu0 %vm1598_vm10, %v1681_v29  ;;  %v2272_v31 = vld [vmem:[%s9649_s5 + $0x8] sm:$0xff] }
 0x58a   :  { %v1670_v56 = vpop.xlane.xlu1 %1669  ;;  %6975 = vmatpush3.msra.mxu0 %v8411_v43  ;;  %6981 = vmatprep.mubr.msk.f32.mxu1 %vm7833_vm9, %v7832_v9  ;;  %v7541_v20 = vpop.eup %7540  ;;  %v7342_v22 = vpack.c.bf16 %v2272_v31, %v2271_v30 }
 0x58b   :  { %7544 = vrcp.f32 %v1670_v56  ;;  %v1667_v25 = vpop.xlane.xlu0 %1666  ;;  %6989 = vmatprep.subr.mxu1 %v7832_v9  ;;  %6976 = vmatprep.mubr.msk.f32.mxu0 %vm7833_vm9, %v7832_v9  ;;  %v7543_v43 = vpop.eup %7542  ;;  %v1684_v21 = vmul.f32 %v7541_v20, %v7525_v58 }
 0x58c   :  { %7546 = vrcp.f32 %v1667_v25  ;;  %6984 = vmatprep.subr.mxu0 %v7832_v9  ;;  %v1683_v55 = vmul.f32 %v7543_v43, %v7527_v61 }
 0x58d   :  { %6982 = vmatmul.mubr.msk.f32.vlgmr.msra.gmra.mrb[32].mxu1 %vm1598_vm10, %v1684_v21 }
 0x58e   :  { %6990 = vmatpush3.msra.mxu1 %v8413_v0  ;;  %6977 = vmatmul.mubr.msk.f32.vlgmr.msra.gmra.mrb[24].mxu0 %vm1598_vm10, %v1683_v55 }
 0x58f   :  { %6985 = vmatpush3.msra.mxu0 %v8415_v33  ;;  %6991 = vmatprep.mubr.msk.f32.mxu1 %vm7833_vm9, %v7832_v9 }
 0x590   :  { %6986 = vmatprep.mubr.msk.f32.mxu0 %vm7833_vm9, %v7832_v9  ;;  %7343 = vmatprep.subr.bf16.mxu0 %v7342_v22 }
 0x595   :  { %v7545_v0 = vpop.eup %7544 }
 0x596   :  { %v7547_v24 = vpop.eup %7546  ;;  %v1686_v10 = vmul.f32 %v7545_v0, %v8431_v54 }
 0x597   :  { %v1685_v33 = vmul.f32 %v7547_v24, %v8433_v19 }
 0x598   :  { %6992 = vmatmul.mubr.msk.f32.vlgmr.msra.gmra.mrb[34].mxu1 %vm1598_vm10, %v1686_v10 }
 0x599   :  { %6987 = vmatmul.mubr.msk.f32.vlgmr.msra.gmra.mrb[26].mxu0 %vm1598_vm10, %v1685_v33 }
 0x59a   :  { %7345 = vmatpush3.bf16.msra.mxu0 %v7342_v22 }
 0x59b   :  { %7347 = vmatprep.subr.bf16.mxu0 %v7346_v32 }
 0x59e   :  { %7349 = vmatpush3.bf16.msra.mxu0 %v7346_v32 }
 0x656   :  { %v1829_v45 = vpop.f32.mrb[28].mxu1 }
 0x657   :  { %v1756_v6 = vpop.f32.mrb[20].mxu0  ;;  %v6963_v51 = vpop.f32.mrb[29].mxu1 }
 0x658   :  { %v6958_v47 = vpop.f32.mrb[21].mxu0  ;;  %7002 = vmatprep.mubr.msk.f32.mxu0 %vm115_vm0, %v1756_v6 }
 0x659   :  { %7003 = vmatmul.mubr.msk.f32.vlgmr.msra.gmra.mrb[28].mxu0 %vm115_vm0, %v1829_v45 }
 0x65b   :  { %v1975_v3 = vpop.f32.mrb[30].mxu1 }
 0x65c   :  { %v1902_v36 = vpop.f32.mrb[22].mxu0  ;;  %v6973_v23 = vpop.f32.mrb[31].mxu1 }
 0x65d   :  { %v6968_v37 = vpop.f32.mrb[23].mxu0  ;;  %7005 = vmatprep.mubr.msk.f32.mxu0 %vm115_vm0, %v1902_v36 }
 0x65e   :  { %7006 = vmatmul.mubr.msk.f32.gmra.mrb[30].mxu0 %vm115_vm0, %v1975_v3 }
 0x660   :  { %v2121_v39 = vpop.f32.mrb[32].mxu1 }
 0x661   :  { %v2048_v2 = vpop.f32.mrb[24].mxu0  ;;  %v6983_v40 = vpop.f32.mrb[33].mxu1 }
 0x662   :  { %v6978_v42 = vpop.f32.mrb[25].mxu0  ;;  %7008 = vmatprep.mubr.msk.f32.mxu0 %vm115_vm0, %v2048_v2 }
 0x663   :  { %7009 = vmatmul.mubr.msk.f32.gmra.mrb[32].mxu0 %vm115_vm0, %v2121_v39 }
 0x66b   :  { %v2267_v44 = vpop.f32.mrb[34].mxu1 }
 0x66c   :  { %v2194_v46 = vpop.f32.mrb[26].mxu0  ;;  %v6993_v50 = vpop.f32.mrb[35].mxu1 }
 0x66d   :  { %v6988_v41 = vpop.f32.mrb[27].mxu0  ;;  %7011 = vmatprep.mubr.msk.f32.mxu0 %vm115_vm0, %v2194_v46 }
 0x66e   :  { %7012 = vmatmul.mubr.msk.f32.gmra.mrb[34].mxu0 %vm115_vm0, %v2267_v44 }
 0x72c   :  { %v7004_v58 = vpop.f32.mrb[28].mxu0 }
 0x72d   :  { %v2375_v61 = vadd.f32 %v7004_v58, %v6386_v52  ;;  %v2369_v62 = vpop.f32.mrb[29].mxu0 }
 0x72e   :  { %v2370_v11 = vadd.f32 %v6386_v52, %v2369_v62 }
 0x72f   :  { %v2409_v54 = vadd.f32 %v2375_v61, %v8255_v49 }
 0x730   :  { %v2408_v19 = vadd.f32 %v2370_v11, %v8235_v26 }
 0x731   :  { %v2419_v63 = vsel %vm115_vm0, %v2409_v54, 0.0  ;;  %v7007_v4 = vpop.f32.mrb[30].mxu0 }
 0x732   :  { %2420 = vadd.xlane.f32.xlu1 %v2419_v63  ;;  %v2416_v1 = vsel %vm115_vm0, %v2408_v19, 0.0  ;;  %v2385_v57 = vadd.f32 %v7007_v4, %v6386_v52  ;;  %v2379_v34 = vpop.f32.mrb[31].mxu0 }
 0x733   :  { %2417 = vadd.xlane.f32.xlu0 %v2416_v1  ;;  %v2380_v5 = vadd.f32 %v6386_v52, %v2379_v34  ;;  %v2545_v34 = vld [vmem:[#allocation7 + $0x8] sm:$0xff] }
 0x734   :  { %v2411_v35 = vadd.f32 %v2385_v57, %v8285_v15  ;;  %v2544_v57 = vld [vmem:[#allocation7] sm:$0xff] }
 0x735   :  { %v2410_v53 = vadd.f32 %v2380_v5, %v8257_v59  ;;  %v7350_v5 = vpack.c.bf16 %v2545_v34, %v2544_v57 }
 0x736   :  { %v2425_v12 = vsel %vm115_vm0, %v2411_v35, 0.0  ;;  %v7010_v26 = vpop.f32.mrb[32].mxu0 }
 0x737   :  { %2426 = vadd.xlane.f32.xlu1 %v2425_v12  ;;  %v2422_v49 = vsel %vm115_vm0, %v2410_v53, 0.0  ;;  %v2395_v13 = vadd.f32 %v7010_v26, %v6386_v52  ;;  %v2389_v48 = vpop.f32.mrb[33].mxu0  ;;  %7351 = vmatprep.subr.bf16.mxu1 %v7350_v5 }
 0x738   :  { %2423 = vadd.xlane.f32.xlu0 %v2422_v49  ;;  %v2390_v14 = vadd.f32 %v6386_v52, %v2389_v48  ;;  %7353 = vmatpush3.bf16.msra.mxu1 %v7350_v5 }
 0x739   :  { %v2413_v7 = vadd.f32 %v2395_v13, %v8305_v28 }
 0x73a   :  { %v2412_v27 = vadd.f32 %v2390_v14, %v8287_v18 }
 0x73b   :  { %v2431_v16 = vsel %vm115_vm0, %v2413_v7, 0.0 }
 0x73c   :  { %2432 = vadd.xlane.f32.xlu1 %v2431_v16  ;;  %v2428_v15 = vsel %vm115_vm0, %v2412_v27, 0.0 }
 0x73d   :  { %2429 = vadd.xlane.f32.xlu0 %v2428_v15 }
 0x741   :  { %v7013_v59 = vpop.f32.mrb[34].mxu0 }
 0x742   :  { %v2405_v29 = vadd.f32 %v7013_v59, %v6386_v52  ;;  %v2399_v56 = vpop.f32.mrb[35].mxu0 }
 0x743   :  { %v2400_v25 = vadd.f32 %v6386_v52, %v2399_v56 }
 0x744   :  { %v2415_v30 = vadd.f32 %v2405_v29, %v8326_v17 }
 0x745   :  { %v2414_v31 = vadd.f32 %v2400_v25, %v8316_v38 }
 0x746   :  { %v2437_v20 = vsel %vm115_vm0, %v2415_v30, 0.0 }
 0x747   :  { %2438 = vadd.xlane.f32.xlu1 %v2437_v20  ;;  %v2434_v28 = vsel %vm115_vm0, %v2414_v31, 0.0 }
 0x748   :  { %2435 = vadd.xlane.f32.xlu0 %v2434_v28  ;;  %v6395_v28 = vld [vmem:[%s9652_s8 + $0x4] ss:$0 sm:$0xff] }
 0x7bf   :  { %v2421_v18 = vpop.xlane.xlu1 %2420 }
 0x7c0   :  { %v2441_v43 = vmul.f32 0.03125, %v2421_v18  ;;  %v2418_v21 = vpop.xlane.xlu0 %2417 }
 0x7c1   :  { %v2440_v55 = vmul.f32 0.03125, %v2418_v21 }
 0x7c2   :  { %v8510_v22 = vsub.f32 %v2409_v54, %v2441_v43 }
 0x7c3   :  { %v8512_v8 = vsub.f32 %v2408_v19, %v2440_v55 }
 0x7c4   :  { %v2457_v60 = vmul.f32 %v8510_v22, %v8510_v22  ;;  %v2427_v17 = vpop.xlane.xlu1 %2426 }
 0x7c5   :  { %v2456_v38 = vmul.f32 %v8512_v8, %v8512_v8  ;;  %v2443_v24 = vmul.f32 0.03125, %v2427_v17  ;;  %v2424_v10 = vpop.xlane.xlu0 %2423  ;;  %v6396_v17 = vld [vmem:[%s9652_s8 + $0x5] ss:$0 sm:$0xff] }
 0x7c6   :  { %v2467_v0 = vsel %vm115_vm0, %v2457_v60, 0.0  ;;  %v2442_v32 = vmul.f32 0.03125, %v2424_v10 }
 0x7c7   :  { %2468 = vadd.xlane.f32.xlu1 %v2467_v0  ;;  %v2464_v33 = vsel %vm115_vm0, %v2456_v38, 0.0  ;;  %v8520_v45 = vsub.f32 %v2411_v35, %v2443_v24  ;;  %v2546_v35 = vld [vmem:[#allocation7 + $0x10] sm:$0xff] }
 0x7c8   :  { %2465 = vadd.xlane.f32.xlu0 %v2464_v33  ;;  %v8522_v6 = vsub.f32 %v2410_v53, %v2442_v32  ;;  %v2547_v53 = vld [vmem:[#allocation7 + $0x18] sm:$0xff] }
 0x7c9   :  { %v2459_v51 = vmul.f32 %v8520_v45, %v8520_v45  ;;  %v2433_v3 = vpop.xlane.xlu1 %2432  ;;  %v7354_v12 = vpack.c.bf16 %v2547_v53, %v2546_v35  ;;  %v2898_v35 = vld [vmem:[%s9651_s7] sm:$0xff]  ;;  %v2900_v53 = vld [vmem:[%s9651_s7 + $0x10] sm:$0xff] }
 0x7ca   :  { %v2458_v47 = vmul.f32 %v8522_v6, %v8522_v6  ;;  %v2445_v23 = vmul.f32 0.03125, %v2433_v3  ;;  %v2430_v37 = vpop.xlane.xlu0 %2429 }
 0x7cb   :  { %v2473_v36 = vsel %vm115_vm0, %v2459_v51, 0.0  ;;  %v2444_v2 = vmul.f32 0.03125, %v2430_v37  ;;  %7355 = vmatprep.subr.bf16.mxu1 %v7354_v12 }
 0x7cc   :  { %2474 = vadd.xlane.f32.xlu1 %v2473_v36  ;;  %v2470_v39 = vsel %vm115_vm0, %v2458_v47, 0.0  ;;  %v8530_v40 = vsub.f32 %v2413_v7, %v2445_v23  ;;  %7357 = vmatpush3.bf16.msra.mxu1 %v7354_v12  ;;  %v2901_v12 = vld [vmem:[%s9651_s7 + $0x18] sm:$0xff] }
 0x7cd   :  { %2471 = vadd.xlane.f32.xlu0 %v2470_v39  ;;  %v8532_v42 = vsub.f32 %v2412_v27, %v2444_v2 }
 0x7ce   :  { %v2461_v44 = vmul.f32 %v8530_v40, %v8530_v40 }
 0x7cf   :  { %v2460_v46 = vmul.f32 %v8532_v42, %v8532_v42 }
 0x7d0   :  { %v2479_v50 = vsel %vm115_vm0, %v2461_v44, 0.0 }
 0x7d1   :  { %2480 = vadd.xlane.f32.xlu1 %v2479_v50  ;;  %v2476_v41 = vsel %vm115_vm0, %v2460_v46, 0.0 }
 0x7d2   :  { %2477 = vadd.xlane.f32.xlu0 %v2476_v41 }
 0x7d4   :  { %v2439_v52 = vpop.xlane.xlu1 %2438 }
 0x7d5   :  { %v2447_v58 = vmul.f32 0.03125, %v2439_v52  ;;  %v2436_v61 = vpop.xlane.xlu0 %2435 }
 0x7d6   :  { %v2446_v62 = vmul.f32 0.03125, %v2436_v61 }
 0x7d7   :  { %v8540_v11 = vsub.f32 %v2415_v30, %v2447_v58 }
 0x7d8   :  { %v8542_v54 = vsub.f32 %v2414_v31, %v2446_v62 }
 0x7d9   :  { %v2463_v19 = vmul.f32 %v8540_v11, %v8540_v11 }
 0x7da   :  { %v2462_v63 = vmul.f32 %v8542_v54, %v8542_v54 }
 0x7db   :  { %v2485_v1 = vsel %vm115_vm0, %v2463_v19, 0.0 }
 0x7dc   :  { %2486 = vadd.xlane.f32.xlu1 %v2485_v1  ;;  %v2482_v4 = vsel %vm115_vm0, %v2462_v63, 0.0 }
 0x7dd   :  { %2483 = vadd.xlane.f32.xlu0 %v2482_v4 }
 0x854   :  { %v2469_v49 = vpop.xlane.xlu1 %2468 }
 0x855   :  { %v2489_v26 = vmul.f32 0.03125, %v2469_v49  ;;  %v2466_v13 = vpop.xlane.xlu0 %2465  ;;  %v7362_v49 = vpack.c.bf16 %v2901_v12, %v2900_v53 }
 0x856   :  { %v2488_v48 = vmul.f32 0.03125, %v2466_v13  ;;  %v2903_v13 = vld [vmem:[%s9651_s7 + $0x28] sm:$0xff] }
 0x857   :  { %v2497_v14 = vadd.f32 1e-05, %v2489_v26  ;;  %v2902_v26 = vld [vmem:[%s9651_s7 + $0x20] sm:$0xff] }
 0x858   :  { %v2496_v7 = vadd.f32 1e-05, %v2488_v48  ;;  %v7366_v48 = vpack.c.bf16 %v2903_v13, %v2902_v26 }
 0x859   :  { %7548 = vrsqrt.f32 %v2497_v14  ;;  %v2475_v27 = vpop.xlane.xlu1 %2474  ;;  %v2904_v14 = vld [vmem:[%s9651_s7 + $0x30] sm:$0xff] }
 0x85a   :  { %7550 = vrsqrt.f32 %v2496_v7  ;;  %v2491_v16 = vmul.f32 0.03125, %v2475_v27  ;;  %v2472_v15 = vpop.xlane.xlu0 %2471  ;;  %v2905_v7 = vld [vmem:[%s9651_s7 + $0x38] sm:$0xff] }
 0x85b   :  { %v2490_v59 = vmul.f32 0.03125, %v2472_v15  ;;  %v7370_v27 = vpack.c.bf16 %v2905_v7, %v2904_v14 }
 0x85c   :  { %v2499_v29 = vadd.f32 1e-05, %v2491_v16  ;;  %v6397_v16 = vld [vmem:[%s9653_s9] ss:$0 sm:$0xff] }
 0x85d   :  { %v2498_v56 = vadd.f32 1e-05, %v2490_v59 }
 0x85e   :  { %7552 = vrsqrt.f32 %v2499_v29  ;;  %v2481_v25 = vpop.xlane.xlu1 %2480 }
 0x85f   :  { %7554 = vrsqrt.f32 %v2498_v56  ;;  %v2493_v31 = vmul.f32 0.03125, %v2481_v25  ;;  %v2478_v20 = vpop.xlane.xlu0 %2477 }
 0x860   :  { %v2492_v21 = vmul.f32 0.03125, %v2478_v20 }
 0x861   :  { %v2501_v55 = vadd.f32 1e-05, %v2493_v31 }
 0x862   :  { %v2500_v38 = vadd.f32 1e-05, %v2492_v21 }
 0x863   :  { %v7549_v30 = vpop.eup %7548  ;;  %7556 = vrsqrt.f32 %v2501_v55 }
 0x864   :  { %v7551_v18 = vpop.eup %7550  ;;  %v2513_v43 = vmul.f32 %v7549_v30, %v8510_v22  ;;  %7558 = vrsqrt.f32 %v2500_v38 }
 0x865   :  { %v2512_v60 = vmul.f32 %v7551_v18, %v8512_v8 }
 0x866   :  { %v2525_v0 = vmul.f32 %v6395_v28, %v2513_v43 }
 0x867   :  { %v2524_v24 = vmul.f32 %v6395_v28, %v2512_v60 }
 0x868   :  { %v7553_v33 = vpop.eup %7552  ;;  %v8560_v32 = vadd.f32 %v6396_v17, %v2525_v0 }
 0x869   :  { %v8558_v10 = vadd.f32 %v6396_v17, %v2524_v24  ;;  %v7555_v51 = vpop.eup %7554  ;;  %v2487_v22 = vpop.xlane.xlu1 %2486  ;;  %v2515_v8 = vmul.f32 %v7553_v33, %v8520_v45 }
 0x86a   :  { %v2495_v47 = vmul.f32 0.03125, %v2487_v22  ;;  %v2484_v3 = vpop.xlane.xlu0 %2483  ;;  %v2514_v36 = vmul.f32 %v7555_v51, %v8522_v6 }
 0x86b   :  { %7022 = vmatprep.mubr.msk.f32.mxu1 %vm115_vm0, %v8558_v10  ;;  %v2494_v23 = vmul.f32 0.03125, %v2484_v3  ;;  %v2527_v37 = vmul.f32 %v6395_v28, %v2515_v8 }
 0x86c   :  { %7023 = vmatmul.mubr.msk.f32.vlgmr.msra.gmra.mrb[36].mxu1 %vm115_vm0, %v8560_v32  ;;  %v2503_v39 = vadd.f32 1e-05, %v2495_v47  ;;  %v2526_v2 = vmul.f32 %v6395_v28, %v2514_v36 }
 0x86d   :  { %v2502_v44 = vadd.f32 1e-05, %v2494_v23  ;;  %v7557_v50 = vpop.eup %7556  ;;  %v8570_v41 = vadd.f32 %v6396_v17, %v2527_v37 }
 0x86e   :  { %7560 = vrsqrt.f32 %v2503_v39  ;;  %v8568_v46 = vadd.f32 %v6396_v17, %v2526_v2  ;;  %v7559_v45 = vpop.eup %7558  ;;  %v2517_v52 = vmul.f32 %v7557_v50, %v8530_v40 }
 0x86f   :  { %7562 = vrsqrt.f32 %v2502_v44  ;;  %v2516_v6 = vmul.f32 %v7559_v45, %v8532_v42 }
 0x870   :  { %7025 = vmatprep.mubr.msk.f32.mxu1 %vm115_vm0, %v8568_v46  ;;  %v2529_v58 = vmul.f32 %v6395_v28, %v2517_v52 }
 0x871   :  { %7026 = vmatmul.mubr.msk.f32.gmra.mrb[38].mxu1 %vm115_vm0, %v8570_v41  ;;  %v2528_v61 = vmul.f32 %v6395_v28, %v2516_v6 }
 0x872   :  { %v8580_v19 = vadd.f32 %v6396_v17, %v2529_v58 }
 0x873   :  { %v8578_v62 = vadd.f32 %v6396_v17, %v2528_v61 }
 0x875   :  { %7028 = vmatprep.mubr.msk.f32.mxu1 %vm115_vm0, %v8578_v62 }
 0x876   :  { %7029 = vmatmul.mubr.msk.f32.gmra.mrb[40].mxu1 %vm115_vm0, %v8580_v19 }
 0x878   :  { %v7561_v63 = vpop.eup %7560 }
 0x879   :  { %v7563_v1 = vpop.eup %7562  ;;  %v2519_v40 = vmul.f32 %v7561_v63, %v8540_v11  ;;  %v2899_v11 = vld [vmem:[%s9651_s7 + $0x8] sm:$0xff] }
 0x87a   :  { %v2518_v4 = vmul.f32 %v7563_v1, %v8542_v54  ;;  %v7358_v54 = vpack.c.bf16 %v2899_v11, %v2898_v35 }
 0x87b   :  { %v2531_v57 = vmul.f32 %v6395_v28, %v2519_v40 }
 0x87c   :  { %v2530_v42 = vmul.f32 %v6395_v28, %v2518_v4  ;;  %7359 = vmatprep.subr.bf16.mxu0 %v7358_v54 }
 0x87d   :  { %v8590_v5 = vadd.f32 %v6396_v17, %v2531_v57  ;;  %7361 = vmatpush3.bf16.msra.mxu0 %v7358_v54 }
 0x87e   :  { %v8588_v34 = vadd.f32 %v6396_v17, %v2530_v42  ;;  %7363 = vmatprep.subr.bf16.mxu0 %v7362_v49 }
 0x880   :  { %7031 = vmatprep.mubr.msk.f32.mxu1 %vm115_vm0, %v8588_v34 }
 0x881   :  { %7032 = vmatmul.mubr.msk.f32.gmra.mrb[42].mxu1 %vm115_vm0, %v8590_v5  ;;  %7365 = vmatpush3.bf16.msra.mxu0 %v7362_v49 }
 0x882   :  { %7367 = vmatprep.subr.bf16.mxu0 %v7366_v48 }
 0x885   :  { %7369 = vmatpush3.bf16.msra.mxu0 %v7366_v48 }
 0x886   :  { %7371 = vmatprep.subr.bf16.mxu0 %v7370_v27 }
 0x889   :  { %7373 = vmatpush3.bf16.msra.mxu0 %v7370_v27 }
 0x93f   :  { %v7024_v15 = vpop.f32.mrb[36].mxu1 }
 0x940   :  { %v2649_v59 = vadd.f32 %v7024_v15, %v6397_v16  ;;  %v2643_v29 = vpop.f32.mrb[37].mxu1 }
 0x941   :  { %v2644_v56 = vadd.f32 %v6397_v16, %v2643_v29 }
 0x942   :  { %v8623_v25 = vmul.f32 0.70710677, %v2649_v59 }
 0x943   :  { %v8625_v30 = vmul.f32 0.70710677, %v2644_v56 }
 0x944   :  { %v2699_v31 = vand.u32 2147483647, %v8623_v25  ;;  %v7027_v18 = vpop.f32.mrb[38].mxu1  ;;  %vm2859_vm11 = vcmp.lt.f32.partialorder %v8623_v25, 0.0 }
 0x945   :  { %v2698_v20 = vand.u32 2147483647, %v8625_v30  ;;  %v8629_v21 = vadd.f32 %v7027_v18, %v6397_v16  ;;  %v2653_v55 = vpop.f32.mrb[39].mxu1  ;;  %vm2858_vm12 = vcmp.lt.f32.partialorder %v8625_v30, 0.0 }
 0x946   :  { %v2707_v28 = vmul.f32 0.3275911, %v2699_v31  ;;  %v8631_v38 = vadd.f32 %v6397_v16, %v2653_v55  ;;  %v2811_v22 = vmul.f32 %v2699_v31, %v2699_v31  ;;  %v8663_v31 = vmul.f32 0.5, %v2649_v59 }
 0x947   :  { %v2706_v43 = vmul.f32 0.3275911, %v2698_v20  ;;  %v8634_v0 = vmul.f32 0.70710677, %v8629_v21  ;;  %v2810_v2 = vmul.f32 %v2698_v20, %v2698_v20 }
 0x948   :  { %v2715_v60 = vadd.f32 1.0, %v2707_v28  ;;  %v8637_v24 = vmul.f32 0.70710677, %v8631_v38  ;;  %v2819_v45 = vsub.f32 0.0, %v2811_v22  ;;  %v8666_v28 = vmul.f32 0.5, %v2644_v56 }
 0x949   :  { %v2714_v17 = vadd.f32 1.0, %v2706_v43  ;;  %v2701_v33 = vand.u32 2147483647, %v8634_v0  ;;  %v7030_v47 = vpop.f32.mrb[40].mxu1  ;;  %v2818_v40 = vsub.f32 0.0, %v2810_v2  ;;  %vm2861_vm14 = vcmp.lt.f32.partialorder %v8634_v0, 0.0 }
 0x94a   :  { %7564 = vrcp.f32 %v2715_v60  ;;  %v2700_v51 = vand.u32 2147483647, %v8637_v24  ;;  %v8641_v36 = vadd.f32 %v7030_v47, %v6397_v16  ;;  %v2663_v23 = vpop.f32.mrb[41].mxu1  ;;  %v2828_v35 = vmul.f32 1.442695, %v2819_v45 }
 0x94b   :  { %7566 = vrcp.f32 %v2714_v17  ;;  %v2709_v8 = vmul.f32 0.3275911, %v2701_v33  ;;  %v8643_v39 = vadd.f32 %v6397_v16, %v2663_v23  ;;  %v2813_v6 = vmul.f32 %v2701_v33, %v2701_v33 }
 0x94c   :  { %v2708_v3 = vmul.f32 0.3275911, %v2700_v51  ;;  %v8646_v50 = vmul.f32 0.70710677, %v8641_v36  ;;  %v2812_v61 = vmul.f32 %v2700_v51, %v2700_v51  ;;  %v2826_v15 = vmul.f32 1.442695, %v2818_v40 }
 0x94d   :  { %v2717_v37 = vadd.f32 1.0, %v2709_v8  ;;  %v8649_v52 = vmul.f32 0.70710677, %v8643_v39  ;;  %v2821_v53 = vsub.f32 0.0, %v2813_v6  ;;  %vm2860_vm15 = vcmp.lt.f32.partialorder %v8637_v24, 0.0 }
 0x94e   :  { %v2716_v44 = vadd.f32 1.0, %v2708_v3  ;;  %v2703_v58 = vand.u32 2147483647, %v8646_v50  ;;  %v2820_v13 = vsub.f32 0.0, %v2812_v61  ;;  %vm2863_vm1 = vcmp.lt.f32.partialorder %v8646_v50, 0.0 }
 0x94f   :  { %7568 = vrcp.f32 %v2717_v37  ;;  %v2702_v63 = vand.u32 2147483647, %v8649_v52  ;;  %v2832_v43 = vmul.f32 1.442695, %v2821_v53  ;;  %vm2862_vm2 = vcmp.lt.f32.partialorder %v8649_v52, 0.0 }
 0x950   :  { %7570 = vrcp.f32 %v2716_v44  ;;  %v2711_v4 = vmul.f32 0.3275911, %v2703_v58  ;;  %v2830_v33 = vmul.f32 1.442695, %v2820_v13  ;;  %v2815_v3 = vmul.f32 %v2703_v58, %v2703_v58 }
 0x951   :  { %v2710_v11 = vmul.f32 0.3275911, %v2702_v63  ;;  %v2814_v44 = vmul.f32 %v2702_v63, %v2702_v63 }
 0x952   :  { %v2719_v12 = vadd.f32 1.0, %v2711_v4  ;;  %v2823_v58 = vsub.f32 0.0, %v2815_v3 }
 0x953   :  { %v2718_v48 = vadd.f32 1.0, %v2710_v11 }
 0x954   :  { %v8653_v1 = vpop.eup %7564  ;;  %v7033_v49 = vpop.f32.mrb[42].mxu1  ;;  %7572 = vrcp.f32 %v2719_v12 }
 0x955   :  { %v8655_v57 = vpop.eup %7566  ;;  %v2739_v42 = vmul.f32 1.0614054, %v8653_v1  ;;  %v8659_v14 = vadd.f32 %v7033_v49, %v6397_v16  ;;  %v2673_v7 = vpop.f32.mrb[43].mxu1  ;;  %7574 = vrcp.f32 %v2718_v48 }
 0x956   :  { %v2738_v54 = vmul.f32 1.0614054, %v8655_v57  ;;  %v8661_v29 = vadd.f32 %v6397_v16, %v2673_v7  ;;  %7576 = vpow2.f32 %v2828_v35 }
 0x957   :  { %v6407_v26 = vadd.f32 -1.4531521, %v2739_v42  ;;  %v8670_v55 = vmul.f32 0.70710677, %v8659_v14  ;;  %7578 = vpow2.f32 %v2826_v15 }
 0x958   :  { %v6406_v27 = vadd.f32 -1.4531521, %v2738_v54  ;;  %v8675_v16 = vmul.f32 0.70710677, %v8661_v29  ;;  %7580 = vpow2.f32 %v2832_v43 }
 0x959   :  { %v2755_v20 = vmul.f32 %v8653_v1, %v6407_v26  ;;  %v8672_v60 = vpop.eup %7568  ;;  %v2705_v22 = vand.u32 2147483647, %v8670_v55  ;;  %v2822_v26 = vsub.f32 0.0, %v2814_v44  ;;  %vm2865_vm3 = vcmp.lt.f32.partialorder %v8670_v55, 0.0  ;;  %v6422_v55 = vld [vmem:[%s9652_s8 + $0x6] ss:$0 sm:$0xff] }
 0x95a   :  { %v2754_v18 = vmul.f32 %v8655_v57, %v6406_v27  ;;  %v8677_v59 = vpop.eup %7570  ;;  %v2741_v56 = vmul.f32 1.0614054, %v8672_v60  ;;  %v2704_v23 = vand.u32 2147483647, %v8675_v16  ;;  %vm2864_vm4 = vcmp.lt.f32.partialorder %v8675_v16, 0.0 }
 0x95b   :  { %v2763_v17 = vadd.f32 1.4214138, %v2755_v20  ;;  %v2740_v47 = vmul.f32 1.0614054, %v8677_v59  ;;  %v2713_v45 = vmul.f32 0.3275911, %v2705_v22 }
 0x95c   :  { %v2762_v51 = vadd.f32 1.4214138, %v2754_v18  ;;  %v6409_v2 = vadd.f32 -1.4531521, %v2741_v56  ;;  %v2712_v40 = vmul.f32 0.3275911, %v2704_v23 }
 0x95d   :  { %v2771_v8 = vmul.f32 %v8653_v1, %v2763_v17  ;;  %v6408_v61 = vadd.f32 -1.4531521, %v2740_v47  ;;  %v2721_v35 = vadd.f32 1.0, %v2713_v45  ;;  %v2834_v44 = vmul.f32 1.442695, %v2822_v26 }
 0x95e   :  { %v2770_v37 = vmul.f32 %v8655_v57, %v2762_v51  ;;  %v2757_v42 = vmul.f32 %v8672_v60, %v6409_v2  ;;  %v2720_v53 = vadd.f32 1.0, %v2712_v40  ;;  %v8688_v12 = vpop.eup %7572 }
 0x95f   :  { %v6415_v6 = vadd.f32 -0.28449672, %v2771_v8  ;;  %v2756_v54 = vmul.f32 %v8677_v59, %v6408_v61  ;;  %7582 = vrcp.f32 %v2721_v35  ;;  %v8691_v13 = vpop.eup %7574  ;;  %v2743_v27 = vmul.f32 1.0614054, %v8688_v12 }
 0x960   :  { %v6414_v4 = vadd.f32 -0.28449672, %v2770_v37  ;;  %v2765_v63 = vadd.f32 1.4214138, %v2757_v42  ;;  %7584 = vrcp.f32 %v2720_v53  ;;  %v2742_v18 = vmul.f32 1.0614054, %v8691_v13  ;;  %v7577_v43 = vpop.eup %7576 }
 0x961   :  { %v2787_v11 = vmul.f32 %v8653_v1, %v6415_v6  ;;  %v2764_v7 = vadd.f32 1.4214138, %v2756_v54  ;;  %7586 = vpow2.f32 %v2830_v33  ;;  %v6411_v56 = vadd.f32 -1.4531521, %v2743_v27  ;;  %v7579_v47 = vpop.eup %7578 }
 0x962   :  { %v2786_v49 = vmul.f32 %v8655_v57, %v6414_v4  ;;  %v2773_v20 = vmul.f32 %v8672_v60, %v2765_v63  ;;  %v2836_v8 = vmul.f32 1.442695, %v2823_v58  ;;  %v6410_v2 = vadd.f32 -1.4531521, %v2742_v18 }
 0x963   :  { %v2795_v48 = vadd.f32 0.2548296, %v2787_v11  ;;  %v2772_v51 = vmul.f32 %v8677_v59, %v2764_v7  ;;  %v2759_v33 = vmul.f32 %v8688_v12, %v6411_v56  ;;  %v2817_v61 = vmul.f32 %v2705_v22, %v2705_v22 }
 0x964   :  { %v2794_v15 = vadd.f32 0.2548296, %v2786_v49  ;;  %v6417_v37 = vadd.f32 -0.28449672, %v2773_v20  ;;  %v2758_v4 = vmul.f32 %v8691_v13, %v6410_v2  ;;  %v2816_v42 = vmul.f32 %v2704_v23, %v2704_v23 }
 0x965   :  { %v2803_v17 = vmul.f32 %v8653_v1, %v2795_v48  ;;  %v6416_v6 = vadd.f32 -0.28449672, %v2772_v51  ;;  %v2767_v54 = vadd.f32 1.4214138, %v2759_v33  ;;  %7588 = vpow2.f32 %v2836_v8 }
 0x966   :  { %v2802_v3 = vmul.f32 %v8655_v57, %v2794_v15  ;;  %v2789_v1 = vmul.f32 %v8672_v60, %v6417_v37  ;;  %v7581_v57 = vpop.eup %7580  ;;  %v2766_v49 = vadd.f32 1.4214138, %v2758_v4  ;;  %7590 = vpow2.f32 %v2834_v44 }
 0x967   :  { %v2843_v45 = vmul.f32 %v7577_v43, %v2803_v17  ;;  %v2788_v11 = vmul.f32 %v8677_v59, %v6416_v6  ;;  %v2775_v26 = vmul.f32 %v8688_v12, %v2767_v54  ;;  %v2825_v48 = vsub.f32 0.0, %v2817_v61 }
 0x968   :  { %v2842_v40 = vmul.f32 %v7579_v47, %v2802_v3  ;;  %v2797_v53 = vadd.f32 0.2548296, %v2789_v1  ;;  %v2774_v15 = vmul.f32 %v8691_v13, %v2766_v49  ;;  %v2824_v20 = vsub.f32 0.0, %v2816_v42 }
 0x969   :  { %v2851_v35 = vsub.f32 1.0, %v2843_v45  ;;  %v2796_v22 = vadd.f32 0.2548296, %v2788_v11  ;;  %v8707_v7 = vpop.eup %7582  ;;  %v6419_v51 = vadd.f32 -0.28449672, %v2775_v26 }
 0x96a   :  { %v2850_v58 = vsub.f32 1.0, %v2842_v40  ;;  %v2805_v27 = vmul.f32 %v8672_v60, %v2797_v53  ;;  %v8712_v18 = vpop.eup %7584  ;;  %v2745_v56 = vmul.f32 1.0614054, %v8707_v7  ;;  %v6418_v37 = vadd.f32 -0.28449672, %v2774_v15 }
 0x96b   :  { %v2867_v63 = vsub.f32 0.0, %v2851_v35  ;;  %v2804_v17 = vmul.f32 %v8677_v59, %v2796_v22  ;;  %v7587_v8 = vpop.eup %7586  ;;  %v2791_v45 = vmul.f32 %v8688_v12, %v6419_v51  ;;  %v2840_v61 = vmul.f32 1.442695, %v2825_v48 }
 0x96c   :  { %v2866_v23 = vsub.f32 0.0, %v2850_v58  ;;  %v2845_v3 = vmul.f32 %v7581_v57, %v2805_v27  ;;  %v6413_v6 = vadd.f32 -1.4531521, %v2745_v56  ;;  %v2790_v25 = vmul.f32 %v8691_v13, %v6418_v37 }
 0x96d   :  { %v2875_v43 = vsel %vm2859_vm11, %v2867_v63, %v2851_v35  ;;  %v2844_v44 = vmul.f32 %v7587_v8, %v2804_v17  ;;  %v2744_v59 = vmul.f32 1.0614054, %v8712_v18  ;;  %v2799_v4 = vadd.f32 0.2548296, %v2791_v45 }
 0x96e   :  { %v2883_v47 = vadd.f32 1.0, %v2875_v43  ;;  %v2874_v60 = vsel %vm2858_vm12, %v2866_v23, %v2850_v58  ;;  %v2853_v33 = vsub.f32 1.0, %v2845_v3  ;;  %v2761_v30 = vmul.f32 %v8707_v7, %v6413_v6 }
 0x96f   :  { %v2882_v2 = vadd.f32 1.0, %v2874_v60  ;;  %v2852_v1 = vsub.f32 1.0, %v2844_v44  ;;  %v2798_v11 = vadd.f32 0.2548296, %v2790_v25  ;;  %v6412_v54 = vadd.f32 -1.4531521, %v2744_v59  ;;  %v7589_v57 = vpop.eup %7588 }
 0x970   :  { %v2891_v42 = vmul.f32 %v2883_v47, %v8663_v31  ;;  %v2869_v35 = vsub.f32 0.0, %v2853_v33  ;;  %v2807_v53 = vmul.f32 %v8688_v12, %v2799_v4  ;;  %v2769_v49 = vadd.f32 1.4214138, %v2761_v30  ;;  %v7591_v22 = vpop.eup %7590 }
 0x971   :  { %v2890_v40 = vmul.f32 %v2882_v2, %v8666_v28  ;;  %v2868_v58 = vsub.f32 0.0, %v2852_v1  ;;  %v2838_v63 = vmul.f32 1.442695, %v2824_v20  ;;  %v2806_v26 = vmul.f32 %v8691_v13, %v2798_v11 }
 0x972   :  { %v2877_v28 = vsel %vm2861_vm14, %v2869_v35, %v2853_v33  ;;  %7592 = vpow2.f32 %v2840_v61  ;;  %v2760_v31 = vmul.f32 %v8712_v18, %v6412_v54  ;;  %v2847_v12 = vmul.f32 %v7589_v57, %v2807_v53 }
 0x973   :  { %7050 = vmatprep.mubr.msk.f32.mxu0 %vm2910_vm13, %v2890_v40  ;;  %v2885_v48 = vadd.f32 1.0, %v2877_v28  ;;  %v2876_v23 = vsel %vm2860_vm15, %v2868_v58, %v2852_v1  ;;  %v2777_v27 = vmul.f32 %v8707_v7, %v2769_v49  ;;  %v2684_v15 = vmul.f32 0.5, %v8631_v38 }
 0x974   :  { %7051 = vmatmul.mubr.msk.f32.vlgmr.msra.gmra.mrb[36].mxu0 %vm2910_vm13, %v2891_v42  ;;  %v2884_v20 = vadd.f32 1.0, %v2876_v23  ;;  %v2846_v43 = vmul.f32 %v7591_v22, %v2806_v26  ;;  %v2768_v0 = vadd.f32 1.4214138, %v2760_v31  ;;  %v2685_v17 = vmul.f32 0.5, %v8629_v21 }
 0x975   :  { %v2855_v13 = vsub.f32 1.0, %v2847_v12  ;;  %v6421_v51 = vadd.f32 -0.28449672, %v2777_v27  ;;  %7594 = vpow2.f32 %v2838_v63  ;;  %v2686_v33 = vmul.f32 0.5, %v8643_v39 }
 0x976   :  { %v2892_v56 = vmul.f32 %v2884_v20, %v2684_v15  ;;  %v2854_v8 = vsub.f32 1.0, %v2846_v43  ;;  %v2776_v47 = vmul.f32 %v8712_v18, %v2768_v0  ;;  %v2893_v60 = vmul.f32 %v2885_v48, %v2685_v17 }
 0x977   :  { %v2871_v24 = vsub.f32 0.0, %v2855_v13  ;;  %v2793_v3 = vmul.f32 %v8707_v7, %v6421_v51  ;;  %v2687_v59 = vmul.f32 0.5, %v8641_v36  ;;  %v2688_v53 = vmul.f32 0.5, %v8661_v29 }
 0x978   :  { %v2870_v37 = vsub.f32 0.0, %v2854_v8  ;;  %v6420_v38 = vadd.f32 -0.28449672, %v2776_v47  ;;  %7053 = vmatprep.mubr.msk.f32.mxu0 %vm2910_vm13, %v2892_v56  ;;  %v2689_v49 = vmul.f32 0.5, %v8659_v14  ;;  %vm6130_vm15 = vcmask 1041409  }
 0x979   :  { %v2879_v2 = vsel %vm2863_vm1, %v2871_v24, %v2855_v13  ;;  %v2801_v21 = vadd.f32 0.2548296, %v2793_v3  ;;  %7054 = vmatmul.mubr.msk.f32.gmra.mrb[38].mxu0 %vm2910_vm13, %v2893_v60  ;;  %vm6133_vm1 = vcmask 1042434  }
 0x97a   :  { %v2887_v44 = vadd.f32 1.0, %v2879_v2  ;;  %v2878_v45 = vsel %vm2862_vm2, %v2870_v37, %v2854_v8  ;;  %v2792_v6 = vmul.f32 %v8712_v18, %v6420_v38  ;;  %vm6136_vm2 = vcmask 1043459  }
 0x97b   :  { %v2886_v25 = vadd.f32 1.0, %v2878_v45  ;;  %v2809_v61 = vmul.f32 %v8707_v7, %v2801_v21 }
 0x97c   :  { %v7593_v50 = vpop.eup %7592  ;;  %v2800_v40 = vadd.f32 0.2548296, %v2792_v6  ;;  %v2895_v30 = vmul.f32 %v2887_v44, %v2687_v59 }
 0x97d   :  { %v2894_v1 = vmul.f32 %v2886_v25, %v2686_v33  ;;  %v2849_v4 = vmul.f32 %v7593_v50, %v2809_v61 }
 0x97e   :  { %v2808_v52 = vmul.f32 %v8712_v18, %v2800_v40 }
 0x97f   :  { %v7595_v42 = vpop.eup %7594  ;;  %v2857_v35 = vsub.f32 1.0, %v2849_v4  ;;  %7056 = vmatprep.mubr.msk.f32.mxu0 %vm2910_vm13, %v2894_v1 }
 0x980   :  { %v2848_v11 = vmul.f32 %v7595_v42, %v2808_v52  ;;  %7057 = vmatmul.mubr.msk.f32.gmra.mrb[40].mxu0 %vm2910_vm13, %v2895_v30 }
 0x981   :  { %v2873_v39 = vsub.f32 0.0, %v2857_v35 }
 0x982   :  { %v2856_v7 = vsub.f32 1.0, %v2848_v11 }
 0x983   :  { %v2881_v54 = vsel %vm2865_vm3, %v2873_v39, %v2857_v35  ;;  %vm6139_vm3 = vcmask 1044484  }
 0x984   :  { %v2872_v57 = vsub.f32 0.0, %v2856_v7  ;;  %v2889_v36 = vadd.f32 1.0, %v2881_v54 }
 0x986   :  { %v2880_v58 = vsel %vm2864_vm4, %v2872_v57, %v2856_v7  ;;  %v2897_v22 = vmul.f32 %v2889_v36, %v2689_v49  ;;  %vm6142_vm4 = vcmask 1045509  }
 0x987   :  { %v2888_v18 = vadd.f32 1.0, %v2880_v58 }
 0x989   :  { %v2896_v63 = vmul.f32 %v2888_v18, %v2688_v53 }
 0x98b   :  { %7059 = vmatprep.mubr.msk.f32.mxu0 %vm2910_vm13, %v2896_v63 }
 0x98c   :  { %7060 = vmatmul.mubr.msk.f32.gmra.mrb[42].mxu0 %vm2910_vm13, %v2897_v22 }
 0xa47   :  { %v7052_v28 = vpop.f32.mrb[36].mxu0 }
 0xa48   :  { %v3007_v26 = vadd.f32 %v7052_v28, %v6422_v55  ;;  %v3001_v16 = vpop.f32.mrb[37].mxu0 }
 0xa49   :  { %v3002_v31 = vadd.f32 %v6422_v55, %v3001_v16 }
 0xa4a   :  { %v3041_v48 = vadd.f32 %v3007_v26, %v8560_v32 }
 0xa4b   :  { %v3040_v29 = vadd.f32 %v3002_v31, %v8558_v10 }
 0xa4c   :  { %v3051_v14 = vsel %vm115_vm0, %v3041_v48, 0.0  ;;  %v7055_v12 = vpop.f32.mrb[38].mxu0 }
 0xa4d   :  { %3052 = vadd.xlane.f32.xlu1 %v3051_v14  ;;  %v3048_v23 = vsel %vm115_vm0, %v3040_v29, 0.0  ;;  %v3017_v27 = vadd.f32 %v7055_v12, %v6422_v55  ;;  %v3011_v15 = vpop.f32.mrb[39].mxu0 }
 0xa4e   :  { %3049 = vadd.xlane.f32.xlu0 %v3048_v23  ;;  %v3012_v20 = vadd.f32 %v6422_v55, %v3011_v15  ;;  %v6443_v15 = vld [vmem:[%s9648_s4 + $0x68] sm:$0xff] }
 0xa4f   :  { %v3043_v43 = vadd.f32 %v3017_v27, %v8570_v41  ;;  %v6442_v27 = vld [vmem:[%s9648_s4 + $0x60] sm:$0xff] }
 0xa50   :  { %v3042_v0 = vadd.f32 %v3012_v20, %v8568_v46  ;;  %v6455_v20 = vld [vmem:[%s9648_s4 + $0x80] sm:$0xff] }
 0xa51   :  { %v3057_v17 = vsel %vm115_vm0, %v3043_v43, 0.0 }
 0xa52   :  { %3058 = vadd.xlane.f32.xlu1 %v3057_v17  ;;  %v3054_v32 = vsel %vm115_vm0, %v3042_v0, 0.0  ;;  %v6444_v17 = vld [vmem:[%s9648_s4 + $0x70] sm:$0xff] }
 0xa53   :  { %v7058_v10 = vpop.f32.mrb[40].mxu0  ;;  %3055 = vadd.xlane.f32.xlu0 %v3054_v32  ;;  %v6445_v32 = vld [vmem:[%s9648_s4 + $0x78] sm:$0xff] }
 0xa54   :  { %v3027_v13 = vadd.f32 %v7058_v10, %v6422_v55  ;;  %v3021_v51 = vpop.f32.mrb[41].mxu0 }
 0xa55   :  { %v3022_v56 = vadd.f32 %v6422_v55, %v3021_v51  ;;  %v6457_v51 = vld [vmem:[%s9648_s4 + $0x90] sm:$0xff] }
 0xa56   :  { %v3045_v8 = vadd.f32 %v3027_v13, %v8580_v19  ;;  %v7378_v13 = vpack.c.bf16 %v6445_v32, %v6444_v17 }
 0xa57   :  { %v3044_v47 = vadd.f32 %v3022_v56, %v8578_v62  ;;  %v6458_v56 = vld [vmem:[%s9648_s4 + $0x98] sm:$0xff] }
 0xa58   :  { %v3063_v60 = vsel %vm115_vm0, %v3045_v8, 0.0 }
 0xa59   :  { %3064 = vadd.xlane.f32.xlu1 %v3063_v60  ;;  %v3060_v41 = vsel %vm115_vm0, %v3044_v47, 0.0  ;;  %v6469_v60 = vld [vmem:[%s9648_s4 + $0xa8] sm:$0xff] }
 0xa5a   :  { %3061 = vadd.xlane.f32.xlu0 %v3060_v41 }
 0xa5f   :  { %v7061_v46 = vpop.f32.mrb[42].mxu0 }
 0xa60   :  { %v3037_v24 = vadd.f32 %v7061_v46, %v6422_v55  ;;  %v3031_v3 = vpop.f32.mrb[43].mxu0 }
 0xa61   :  { %v3032_v37 = vadd.f32 %v6422_v55, %v3031_v3 }
 0xa62   :  { %v3047_v38 = vadd.f32 %v3037_v24, %v8590_v5 }
 0xa63   :  { %v3046_v2 = vadd.f32 %v3032_v37, %v8588_v34 }
 0xa64   :  { %v3069_v21 = vsel %vm115_vm0, %v3047_v38, 0.0 }
 0xa65   :  { %3070 = vadd.xlane.f32.xlu1 %v3069_v21  ;;  %v3066_v19 = vsel %vm115_vm0, %v3046_v2, 0.0 }
 0xa66   :  { %3067 = vadd.xlane.f32.xlu0 %v3066_v19 }
 0xada   :  { %v3053_v62 = vpop.xlane.xlu1 %3052 }
 0xadb   :  { %v3073_v44 = vmul.f32 0.03125, %v3053_v62  ;;  %v3050_v45 = vpop.xlane.xlu0 %3049 }
 0xadc   :  { %v3072_v6 = vmul.f32 0.03125, %v3050_v45 }
 0xadd   :  { %v8776_v33 = vsub.f32 %v3041_v48, %v3073_v44 }
 0xade   :  { %v8778_v25 = vsub.f32 %v3040_v29, %v3072_v6 }
 0xadf   :  { %v3089_v61 = vmul.f32 %v8776_v33, %v8776_v33  ;;  %v3059_v5 = vpop.xlane.xlu1 %3058 }
 0xae0   :  { %v3088_v34 = vmul.f32 %v8778_v25, %v8778_v25  ;;  %v3075_v59 = vmul.f32 0.03125, %v3059_v5  ;;  %v3056_v40 = vpop.xlane.xlu0 %3055  ;;  %v8850_v5 = vld [vmem:[%s9652_s8 + $0x7] ss:$0 sm:$0xff] }
 0xae1   :  { %v3099_v50 = vsel %vm115_vm0, %v3089_v61, 0.0  ;;  %v3074_v4 = vmul.f32 0.03125, %v3056_v40 }
 0xae2   :  { %3100 = vadd.xlane.f32.xlu1 %v3099_v50  ;;  %v3096_v1 = vsel %vm115_vm0, %v3088_v34, 0.0  ;;  %v8786_v30 = vsub.f32 %v3043_v43, %v3075_v59  ;;  %v7374_v43 = vpack.c.bf16 %v6443_v15, %v6442_v27 }
 0xae3   :  { %3097 = vadd.xlane.f32.xlu0 %v3096_v1  ;;  %v8788_v52 = vsub.f32 %v3042_v0, %v3074_v4  ;;  %v6456_v0 = vld [vmem:[%s9648_s4 + $0x88] sm:$0xff] }
 0xae4   :  { %v3091_v42 = vmul.f32 %v8786_v30, %v8786_v30  ;;  %v7382_v10 = vpack.c.bf16 %v6456_v0, %v6455_v20  ;;  %7375 = vmatprep.subr.bf16.mxu1 %v7374_v43 }
 0xae5   :  { %v3090_v35 = vmul.f32 %v8788_v52, %v8788_v52  ;;  %7377 = vmatpush3.bf16.msra.mxu1 %v7374_v43 }
 0xae6   :  { %v3065_v11 = vpop.xlane.xlu1 %3064  ;;  %v3105_v39 = vsel %vm115_vm0, %v3091_v42, 0.0  ;;  %7383 = vmatprep.subr.bf16.mxu0 %v7382_v10  ;;  %7379 = vmatprep.subr.bf16.mxu1 %v7378_v13 }
 0xae7   :  { %v3077_v7 = vmul.f32 0.03125, %v3065_v11  ;;  %v3062_v54 = vpop.xlane.xlu0 %3061  ;;  %3106 = vadd.xlane.f32.xlu1 %v3105_v39  ;;  %v3102_v57 = vsel %vm115_vm0, %v3090_v35, 0.0  ;;  %7385 = vmatpush3.bf16.msra.mxu0 %v7382_v10  ;;  %v6432_v11 = vld [vmem:[%s9652_s8 + $0x8] ss:$0 sm:$0xff] }
 0xae8   :  { %v3076_v36 = vmul.f32 0.03125, %v3062_v54  ;;  %3103 = vadd.xlane.f32.xlu0 %v3102_v57  ;;  %v6470_v57 = vld [vmem:[%s9648_s4 + $0xb0] sm:$0xff] }
 0xae9   :  { %v8796_v58 = vsub.f32 %v3045_v8, %v3077_v7  ;;  %v7386_v8 = vpack.c.bf16 %v6458_v56, %v6457_v51  ;;  %7381 = vmatpush3.bf16.msra.mxu1 %v7378_v13 }
 0xaea   :  { %v8798_v53 = vsub.f32 %v3044_v47, %v3076_v36  ;;  %v6468_v47 = vld [vmem:[%s9648_s4 + $0xa0] sm:$0xff] }
 0xaeb   :  { %v3093_v18 = vmul.f32 %v8796_v58, %v8796_v58  ;;  %7387 = vmatprep.subr.bf16.mxu0 %v7386_v8  ;;  %v7390_v41 = vpack.c.bf16 %v6469_v60, %v6468_v47 }
 0xaec   :  { %v3092_v49 = vmul.f32 %v8798_v53, %v8798_v53  ;;  %7389 = vmatpush3.bf16.msra.mxu0 %v7386_v8 }
 0xaed   :  { %v3111_v63 = vsel %vm115_vm0, %v3093_v18, 0.0  ;;  %7391 = vmatprep.subr.bf16.mxu1 %v7390_v41  ;;  %7122 = vmatprep.subr.mxu0 %v7832_v9 }
 0xaee   :  { %3112 = vadd.xlane.f32.xlu1 %v3111_v63  ;;  %v3108_v22 = vsel %vm115_vm0, %v3092_v49, 0.0 }
 0xaef   :  { %3109 = vadd.xlane.f32.xlu0 %v3108_v22 }
 0xaf2   :  { %v3071_v55 = vpop.xlane.xlu1 %3070 }
 0xaf3   :  { %v3079_v28 = vmul.f32 0.03125, %v3071_v55  ;;  %v3068_v26 = vpop.xlane.xlu0 %3067 }
 0xaf4   :  { %v3078_v16 = vmul.f32 0.03125, %v3068_v26 }
 0xaf5   :  { %v8806_v31 = vsub.f32 %v3047_v38, %v3079_v28 }
 0xaf6   :  { %v8808_v48 = vsub.f32 %v3046_v2, %v3078_v16 }
 0xaf7   :  { %v3095_v29 = vmul.f32 %v8806_v31, %v8806_v31 }
 0xaf8   :  { %v3094_v14 = vmul.f32 %v8808_v48, %v8808_v48 }
 0xaf9   :  { %v3117_v23 = vsel %vm115_vm0, %v3095_v29, 0.0 }
 0xafa   :  { %3118 = vadd.xlane.f32.xlu1 %v3117_v23  ;;  %v3114_v12 = vsel %vm115_vm0, %v3094_v14, 0.0 }
 0xafb   :  { %3115 = vadd.xlane.f32.xlu0 %v3114_v12 }
 0xb6f   :  { %v3101_v46 = vpop.xlane.xlu1 %3100 }
 0xb70   :  { %v3121_v24 = vmul.f32 0.03125, %v3101_v46  ;;  %v3098_v3 = vpop.xlane.xlu0 %3097 }
 0xb71   :  { %v3120_v37 = vmul.f32 0.03125, %v3098_v3 }
 0xb72   :  { %v3129_v38 = vadd.f32 1e-05, %v3121_v24  ;;  %v6446_v24 = vld [vmem:[%s9652_s8 + $0x10] ss:$0 sm:$0xff] }
 0xb73   :  { %v3128_v2 = vadd.f32 1e-05, %v3120_v37 }
 0xb74   :  { %7596 = vrsqrt.f32 %v3129_v38  ;;  %v3107_v21 = vpop.xlane.xlu1 %3106 }
 0xb75   :  { %7598 = vrsqrt.f32 %v3128_v2  ;;  %v3123_v19 = vmul.f32 0.03125, %v3107_v21  ;;  %v3104_v62 = vpop.xlane.xlu0 %3103 }
 0xb76   :  { %v3122_v44 = vmul.f32 0.03125, %v3104_v62 }
 0xb77   :  { %v3131_v45 = vadd.f32 1e-05, %v3123_v19 }
 0xb78   :  { %v3130_v6 = vadd.f32 1e-05, %v3122_v44 }
 0xb79   :  { %7600 = vrsqrt.f32 %v3131_v45 }
 0xb7a   :  { %7602 = vrsqrt.f32 %v3130_v6 }
 0xb7b   :  { %v3113_v61 = vpop.xlane.xlu1 %3112 }
 0xb7c   :  { %v3125_v50 = vmul.f32 0.03125, %v3113_v61  ;;  %v3110_v59 = vpop.xlane.xlu0 %3109 }
 0xb7d   :  { %v3124_v4 = vmul.f32 0.03125, %v3110_v59 }
 0xb7e   :  { %v7597_v34 = vpop.eup %7596  ;;  %v3133_v42 = vadd.f32 1e-05, %v3125_v50 }
 0xb7f   :  { %v7599_v40 = vpop.eup %7598  ;;  %v3145_v1 = vmul.f32 %v7597_v34, %v8776_v33  ;;  %v3132_v7 = vadd.f32 1e-05, %v3124_v4  ;;  %v6471_v33 = vld [vmem:[%s9648_s4 + $0xb8] sm:$0xff] }
 0xb80   :  { %v3144_v35 = vmul.f32 %v7599_v40, %v8778_v25  ;;  %7604 = vrsqrt.f32 %v3133_v42  ;;  %v7394_v49 = vpack.c.bf16 %v6471_v33, %v6470_v57 }
 0xb81   :  { %v3157_v39 = vmul.f32 %v8850_v5, %v3145_v1  ;;  %7606 = vrsqrt.f32 %v3132_v7 }
 0xb82   :  { %v3156_v54 = vmul.f32 %v8850_v5, %v3144_v35 }
 0xb83   :  { %v7601_v36 = vpop.eup %7600  ;;  %v8867_v18 = vadd.f32 %v6432_v11, %v3157_v39 }
 0xb84   :  { %v8865_v25 = vadd.f32 %v6432_v11, %v3156_v54  ;;  %v7603_v63 = vpop.eup %7602  ;;  %v3147_v22 = vmul.f32 %v7601_v36, %v8786_v30 }
 0xb85   :  { %v3146_v55 = vmul.f32 %v7603_v63, %v8788_v52  ;;  %v6472_v63 = vld [vmem:[%s9652_s8 + $0x12] ss:$0 sm:$0xff] }
 0xb86   :  { %7070 = vmatprep.mubr.msk.f32.mxu1 %vm115_vm0, %v8865_v25  ;;  %7090 = vmatprep.mubr.msk.f32.mxu0 %vm115_vm0, %v8865_v25  ;;  %v3159_v28 = vmul.f32 %v8850_v5, %v3147_v22 }
 0xb87   :  { %7071 = vmatmul.mubr.msk.f32.vlgmr.msra.gmra.mrb[44].mxu1 %vm115_vm0, %v8867_v18  ;;  %7091 = vmatmul.mubr.msk.f32.vlgmr.msra.gmra.mrb[44].mxu0 %vm115_vm0, %v8867_v18  ;;  %v3119_v26 = vpop.xlane.xlu1 %3118  ;;  %v3158_v16 = vmul.f32 %v8850_v5, %v3146_v55 }
 0xb88   :  { %7393 = vmatpush3.bf16.msra.mxu1 %v7390_v41  ;;  %v3127_v29 = vmul.f32 0.03125, %v3119_v26  ;;  %v3116_v14 = vpop.xlane.xlu0 %3115  ;;  %v8883_v15 = vadd.f32 %v6432_v11, %v3159_v28 }
 0xb89   :  { %7395 = vmatprep.subr.bf16.mxu1 %v7394_v49  ;;  %v3126_v23 = vmul.f32 0.03125, %v3116_v14  ;;  %v8881_v12 = vadd.f32 %v6432_v11, %v3158_v16 }
 0xb8a   :  { %v7605_v30 = vpop.eup %7604  ;;  %v3135_v27 = vadd.f32 1e-05, %v3127_v29 }
 0xb8b   :  { %v7607_v20 = vpop.eup %7606  ;;  %v3134_v43 = vadd.f32 1e-05, %v3126_v23  ;;  %7073 = vmatprep.mubr.msk.f32.mxu1 %vm115_vm0, %v8881_v12  ;;  %7093 = vmatprep.mubr.msk.f32.mxu0 %vm115_vm0, %v8881_v12  ;;  %v3149_v52 = vmul.f32 %v7605_v30, %v8796_v58 }
 0xb8c   :  { %7397 = vmatpush3.bf16.msra.mxu1 %v7394_v49  ;;  %7608 = vrsqrt.f32 %v3135_v27  ;;  %7094 = vmatmul.mubr.msk.f32.gmra.mrb[46].mxu0 %vm115_vm0, %v8883_v15  ;;  %v3148_v0 = vmul.f32 %v7607_v20, %v8798_v53 }
 0xb8d   :  { %7074 = vmatmul.mubr.msk.f32.gmra.mrb[46].mxu1 %vm115_vm0, %v8883_v15  ;;  %7610 = vrsqrt.f32 %v3134_v43  ;;  %v3161_v17 = vmul.f32 %v8850_v5, %v3149_v52  ;;  %7127 = vmatprep.subr.mxu1 %v7832_v9 }
 0xb8e   :  { %v3160_v32 = vmul.f32 %v8850_v5, %v3148_v0 }
 0xb8f   :  { %v8900_v13 = vadd.f32 %v6432_v11, %v3161_v17 }
 0xb90   :  { %v8898_v10 = vadd.f32 %v6432_v11, %v3160_v32 }
 0xb92   :  { %7076 = vmatprep.mubr.msk.f32.mxu1 %vm115_vm0, %v8898_v10  ;;  %7096 = vmatprep.mubr.msk.f32.mxu0 %vm115_vm0, %v8898_v10 }
 0xb93   :  { %7077 = vmatmul.mubr.msk.f32.gmra.mrb[48].mxu1 %vm115_vm0, %v8900_v13  ;;  %7097 = vmatmul.mubr.msk.f32.gmra.mrb[48].mxu0 %vm115_vm0, %v8900_v13 }
 0xb96   :  { %v7609_v58 = vpop.eup %7608 }
 0xb97   :  { %v7611_v53 = vpop.eup %7610  ;;  %v3151_v51 = vmul.f32 %v7609_v58, %v8806_v31  ;;  %v6459_v31 = vld [vmem:[%s9652_s8 + $0x11] ss:$0 sm:$0xff] }
 0xb98   :  { %v3150_v56 = vmul.f32 %v7611_v53, %v8808_v48 }
 0xb99   :  { %v3163_v8 = vmul.f32 %v8850_v5, %v3151_v51 }
 0xb9a   :  { %v3162_v47 = vmul.f32 %v8850_v5, %v3150_v56 }
 0xb9b   :  { %v8916_v41 = vadd.f32 %v6432_v11, %v3163_v8 }
 0xb9c   :  { %v8914_v60 = vadd.f32 %v6432_v11, %v3162_v47 }
 0xb9e   :  { %7079 = vmatprep.mubr.msk.f32.mxu1 %vm115_vm0, %v8914_v60  ;;  %7099 = vmatprep.mubr.msk.f32.mxu0 %vm115_vm0, %v8914_v60 }
 0xb9f   :  { %7080 = vmatmul.mubr.msk.f32.gmra.mrb[50].mxu1 %vm115_vm0, %v8916_v41  ;;  %7100 = vmatmul.mubr.msk.f32.gmra.mrb[50].mxu0 %vm115_vm0, %v8916_v41 }
 0xba0   :  { %7110 = vmatprep.mubr.msk.f32.mxu1 %vm115_vm0, %v8865_v25  ;;  %7124 = vmatprep.mubr.msk.f32.mxu0 %vm7833_vm9, %v7832_v9 }
 0xba3   :  { %7111 = vmatmul.mubr.msk.f32.vlgmr.msra.gmra.mrb[52].mxu1 %vm115_vm0, %v8867_v18 }
 0xba4   :  { %7113 = vmatprep.mubr.msk.f32.mxu1 %vm115_vm0, %v8881_v12 }
 0xba7   :  { %7114 = vmatmul.mubr.msk.f32.gmra.mrb[54].mxu1 %vm115_vm0, %v8883_v15 }
 0xba8   :  { %7116 = vmatprep.mubr.msk.f32.mxu1 %vm115_vm0, %v8898_v10 }
 0xbab   :  { %7117 = vmatmul.mubr.msk.f32.gmra.mrb[56].mxu1 %vm115_vm0, %v8900_v13 }
 0xbac   :  { %7119 = vmatprep.mubr.msk.f32.mxu1 %vm115_vm0, %v8914_v60 }
 0xbaf   :  { %7120 = vmatmul.mubr.msk.f32.gmra.mrb[58].mxu1 %vm115_vm0, %v8916_v41 }
 0xbb0   :  { %7129 = vmatprep.mubr.msk.f32.mxu1 %vm7833_vm9, %v7832_v9 }
 0xc5a   :  { %v7072_v48 = vpop.f32.mrb[44].mxu1  ;;  %v7092_v46 = vpop.f32.mrb[44].mxu0 }
 0xc5b   :  { %v3405_v3 = vadd.f32 %v7092_v46, %v6459_v31  ;;  %v3285_v37 = vpop.f32.mrb[45].mxu1  ;;  %v3399_v38 = vpop.f32.mrb[45].mxu0  ;;  %v3291_v21 = vadd.f32 %v7072_v48, %v6446_v24 }
 0xc5c   :  { %v3400_v2 = vadd.f32 %v6459_v31, %v3399_v38  ;;  %v3286_v19 = vadd.f32 %v6446_v24, %v3285_v37 }
 0xc5d   :  { %7128 = vmatpush3.xpose.msk.msra.mxu1 %vm115_vm0, %v3405_v3 }
 0xc5e   :  { %7123 = vmatpush3.xpose.msk.msra.mxu0 %vm115_vm0, %v3400_v2  ;;  %7137 = vmatprep.subr.mxu1 %v7832_v9 }
 0xc5f   :  { %7132 = vmatprep.subr.mxu0 %v7832_v9  ;;  %v7095_v44 = vpop.f32.mrb[46].mxu0 }
 0xc60   :  { %7130 = vmatmul.mubr.msk.f32.vlgmr.msra.gmra.mrb[60].mxu1 %vm115_vm0, %v3291_v21  ;;  %v7075_v62 = vpop.f32.mrb[46].mxu1  ;;  %v3415_v45 = vadd.f32 %v7095_v44, %v6459_v31  ;;  %v3409_v61 = vpop.f32.mrb[47].mxu0 }
 0xc61   :  { %7125 = vmatmul.mubr.msk.f32.vlgmr.msra.gmra.mrb[52].mxu0 %vm115_vm0, %v3286_v19  ;;  %7139 = vmatprep.mubr.msk.f32.mxu1 %vm7833_vm9, %v7832_v9  ;;  %v3295_v6 = vpop.f32.mrb[47].mxu1  ;;  %v3410_v34 = vadd.f32 %v6459_v31, %v3409_v61  ;;  %v3301_v5 = vadd.f32 %v7075_v62, %v6446_v24 }
 0xc62   :  { %7134 = vmatprep.mubr.msk.f32.mxu0 %vm7833_vm9, %v7832_v9  ;;  %7138 = vmatpush3.xpose.msk.msra.mxu1 %vm115_vm0, %v3415_v45  ;;  %v3296_v50 = vadd.f32 %v6446_v24, %v3295_v6 }
 0xc63   :  { %7133 = vmatpush3.xpose.msk.msra.mxu0 %vm115_vm0, %v3410_v34  ;;  %7147 = vmatprep.subr.mxu1 %v7832_v9 }
 0xc64   :  { %7142 = vmatprep.subr.mxu0 %v7832_v9 }
 0xc65   :  { %7140 = vmatmul.mubr.msk.f32.vlgmr.msra.gmra.mrb[62].mxu1 %vm115_vm0, %v3301_v5 }
 0xc66   :  { %v7078_v59 = vpop.f32.mrb[48].mxu1  ;;  %v7098_v40 = vpop.f32.mrb[48].mxu0  ;;  %7135 = vmatmul.mubr.msk.f32.vlgmr.msra.gmra.mrb[54].mxu0 %vm115_vm0, %v3296_v50  ;;  %7149 = vmatprep.mubr.msk.f32.mxu1 %vm7833_vm9, %v7832_v9 }
 0xc67   :  { %v3425_v1 = vadd.f32 %v7098_v40, %v6459_v31  ;;  %v3305_v4 = vpop.f32.mrb[49].mxu1  ;;  %v3419_v42 = vpop.f32.mrb[49].mxu0  ;;  %7144 = vmatprep.mubr.msk.f32.mxu0 %vm7833_vm9, %v7832_v9  ;;  %v3311_v11 = vadd.f32 %v7078_v59, %v6446_v24 }
 0xc68   :  { %v3420_v35 = vadd.f32 %v6459_v31, %v3419_v42  ;;  %v3306_v39 = vadd.f32 %v6446_v24, %v3305_v4 }
 0xc69   :  { %7148 = vmatpush3.xpose.msk.msra.mxu1 %vm115_vm0, %v3425_v1 }
 0xc6a   :  { %7143 = vmatpush3.xpose.msk.msra.mxu0 %vm115_vm0, %v3420_v35  ;;  %7157 = vmatprep.subr.mxu1 %v7832_v9 }
 0xc6b   :  { %7152 = vmatprep.subr.mxu0 %v7832_v9 }
 0xc6c   :  { %7150 = vmatmul.mubr.msk.f32.vlgmr.msra.gmra.mrb[64].mxu1 %vm115_vm0, %v3311_v11 }
 0xc6d   :  { %7145 = vmatmul.mubr.msk.f32.vlgmr.msra.gmra.mrb[56].mxu0 %vm115_vm0, %v3306_v39  ;;  %7159 = vmatprep.mubr.msk.f32.mxu1 %vm7833_vm9, %v7832_v9 }
 0xc6e   :  { %7154 = vmatprep.mubr.msk.f32.mxu0 %vm7833_vm9, %v7832_v9 }
 0xc72   :  { %v7081_v7 = vpop.f32.mrb[50].mxu1  ;;  %v7101_v54 = vpop.f32.mrb[50].mxu0 }
 0xc73   :  { %v3435_v57 = vadd.f32 %v7101_v54, %v6459_v31  ;;  %v3315_v33 = vpop.f32.mrb[51].mxu1  ;;  %v3429_v36 = vpop.f32.mrb[51].mxu0  ;;  %v3321_v22 = vadd.f32 %v7081_v7, %v6446_v24 }
 0xc74   :  { %v3430_v49 = vadd.f32 %v6459_v31, %v3429_v36  ;;  %v3316_v28 = vadd.f32 %v6446_v24, %v3315_v33 }
 0xc75   :  { %7158 = vmatpush3.xpose.msk.msra.mxu1 %vm115_vm0, %v3435_v57 }
 0xc76   :  { %v7112_v55 = vpop.f32.mrb[52].mxu1  ;;  %7153 = vmatpush3.xpose.msk.msra.mxu0 %vm115_vm0, %v3430_v49  ;;  %7167 = vmatprep.subr.mxu1 %v7832_v9 }
 0xc77   :  { %v3519_v26 = vadd.f32 %v7112_v55, %v6472_v63  ;;  %v3513_v16 = vpop.f32.mrb[53].mxu1  ;;  %7162 = vmatprep.subr.mxu0 %v7832_v9 }
 0xc78   :  { %v3514_v29 = vadd.f32 %v6472_v63, %v3513_v16  ;;  %7160 = vmatmul.mubr.msk.f32.vlgmr.msra.gmra.mrb[66].mxu1 %vm115_vm0, %v3321_v22 }
 0xc79   :  { %7155 = vmatmul.mubr.msk.f32.vlgmr.msra.gmra.mrb[58].mxu0 %vm115_vm0, %v3316_v28  ;;  %7168 = vmatpush3.msra.mxu1 %v3519_v26 }
 0xc7a   :  { %v7115_v14 = vpop.f32.mrb[54].mxu1  ;;  %7163 = vmatpush3.msra.mxu0 %v3514_v29  ;;  %7169 = vmatprep.mubr.msk.f32.mxu1 %vm7833_vm9, %v7832_v9 }
 0xc7b   :  { %v8993_v23 = vadd.f32 %v7115_v14, %v6472_v63  ;;  %v3523_v30 = vpop.f32.mrb[55].mxu1  ;;  %7177 = vmatprep.subr.mxu1 %v7832_v9  ;;  %7164 = vmatprep.mubr.msk.f32.mxu0 %vm7833_vm9, %v7832_v9 }
 0xc7c   :  { %v8998_v27 = vadd.f32 %v6472_v63, %v3523_v30  ;;  %7172 = vmatprep.subr.mxu0 %v7832_v9 }
 0xc7e   :  { %v7118_v20 = vpop.f32.mrb[56].mxu1 }
 0xc7f   :  { %v9001_v43 = vadd.f32 %v7118_v20, %v6472_v63  ;;  %v3533_v52 = vpop.f32.mrb[57].mxu1 }
 0xc80   :  { %v9003_v0 = vadd.f32 %v6472_v63, %v3533_v52 }
 0xc82   :  { %v7121_v17 = vpop.f32.mrb[58].mxu1 }
 0xc83   :  { %v9005_v32 = vadd.f32 %v7121_v17, %v6472_v63  ;;  %v3543_v58 = vpop.f32.mrb[59].mxu1 }
 0xc84   :  { %v9007_v53 = vadd.f32 %v6472_v63, %v3543_v58 }
 0xd33   :  { %v3700_v51 = vpop.f32.mrb[60].mxu1 }
 0xd34   :  { %v4161_v56 = vmul.f32 0.17677669, %v3700_v51  ;;  %v3624_v8 = vpop.f32.mrb[52].mxu0  ;;  %v7131_v47 = vpop.f32.mrb[61].mxu1 }
 0xd35   :  { %v4160_v31 = vmul.f32 0.17677669, %v3624_v8  ;;  %v7126_v48 = vpop.f32.mrb[53].mxu0 }
 0xd36   :  { %v4171_v46 = vsel %vm1598_vm10, %v4161_v56, -inf }
 0xd37   :  { %4172 = vmax.xlane.f32.xlu1 %v4171_v46  ;;  %v4168_v24 = vsel %vm1598_vm10, %v4160_v31, -inf }
 0xd38   :  { %4169 = vmax.xlane.f32.xlu0 %v4168_v24  ;;  %v3852_v3 = vpop.f32.mrb[62].mxu1 }
 0xd39   :  { %v4163_v37 = vmul.f32 0.17677669, %v3852_v3  ;;  %v3776_v38 = vpop.f32.mrb[54].mxu0  ;;  %v7141_v2 = vpop.f32.mrb[63].mxu1 }
 0xd3a   :  { %v4162_v21 = vmul.f32 0.17677669, %v3776_v38  ;;  %v7136_v19 = vpop.f32.mrb[55].mxu0 }
 0xd3b   :  { %v4177_v62 = vsel %vm1598_vm10, %v4163_v37, -inf }
 0xd3c   :  { %4178 = vmax.xlane.f32.xlu1 %v4177_v62  ;;  %v4174_v44 = vsel %vm1598_vm10, %v4162_v21, -inf }
 0xd3d   :  { %4175 = vmax.xlane.f32.xlu0 %v4174_v44 }
 0xd3f   :  { %v4004_v45 = vpop.f32.mrb[64].mxu1 }
 0xd40   :  { %v4165_v6 = vmul.f32 0.17677669, %v4004_v45  ;;  %v3928_v61 = vpop.f32.mrb[56].mxu0  ;;  %v7151_v34 = vpop.f32.mrb[65].mxu1 }
 0xd41   :  { %v4164_v5 = vmul.f32 0.17677669, %v3928_v61  ;;  %v7146_v50 = vpop.f32.mrb[57].mxu0 }
 0xd42   :  { %v4183_v59 = vsel %vm1598_vm10, %v4165_v6, -inf }
 0xd43   :  { %4184 = vmax.xlane.f32.xlu1 %v4183_v59  ;;  %v4180_v40 = vsel %vm1598_vm10, %v4164_v5, -inf }
 0xd44   :  { %4181 = vmax.xlane.f32.xlu0 %v4180_v40 }
 0xd4b   :  { %v4156_v1 = vpop.f32.mrb[66].mxu1 }
 0xd4c   :  { %v4167_v4 = vmul.f32 0.17677669, %v4156_v1  ;;  %v4080_v42 = vpop.f32.mrb[58].mxu0  ;;  %v7161_v35 = vpop.f32.mrb[67].mxu1 }
 0xd4d   :  { %v4166_v11 = vmul.f32 0.17677669, %v4080_v42  ;;  %v7156_v39 = vpop.f32.mrb[59].mxu0 }
 0xd4e   :  { %v4189_v7 = vsel %vm1598_vm10, %v4167_v4, -inf }
 0xd4f   :  { %4190 = vmax.xlane.f32.xlu1 %v4189_v7  ;;  %v4186_v54 = vsel %vm1598_vm10, %v4166_v11, -inf }
 0xd50   :  { %4187 = vmax.xlane.f32.xlu0 %v4186_v54 }
 0xdc4   :  { %v4173_v57 = vpop.xlane.xlu1 %4172 }
 0xdc5   :  { %v4193_v33 = vsub.f32 %v4161_v56, %v4173_v57  ;;  %v4170_v36 = vpop.xlane.xlu0 %4169 }
 0xdc6   :  { %v4192_v49 = vsub.f32 %v4160_v31, %v4170_v36 }
 0xdc7   :  { %v4202_v63 = vmul.f32 1.442695, %v4193_v33 }
 0xdc8   :  { %v4200_v22 = vmul.f32 1.442695, %v4192_v49 }
 0xdc9   :  { %7612 = vpow2.f32 %v4202_v63  ;;  %v4179_v55 = vpop.xlane.xlu1 %4178 }
 0xdca   :  { %7614 = vpow2.f32 %v4200_v22  ;;  %v4195_v28 = vsub.f32 %v4163_v37, %v4179_v55  ;;  %v4176_v26 = vpop.xlane.xlu0 %4175 }
 0xdcb   :  { %v4194_v16 = vsub.f32 %v4162_v21, %v4176_v26 }
 0xdcc   :  { %v4206_v29 = vmul.f32 1.442695, %v4195_v28 }
 0xdcd   :  { %v4204_v14 = vmul.f32 1.442695, %v4194_v16 }
 0xdce   :  { %7616 = vpow2.f32 %v4206_v29  ;;  %v6507_v29 = vld [vmem:[%s9649_s5 + $0x30] sm:$0xff] }
 0xdcf   :  { %7618 = vpow2.f32 %v4204_v14  ;;  %v6508_v14 = vld [vmem:[%s9649_s5 + $0x38] sm:$0xff] }
 0xdd0   :  { %v4185_v30 = vpop.xlane.xlu1 %4184 }
 0xdd1   :  { %v4197_v52 = vsub.f32 %v4165_v6, %v4185_v30  ;;  %v4182_v17 = vpop.xlane.xlu0 %4181 }
 0xdd2   :  { %v4196_v51 = vsub.f32 %v4164_v5, %v4182_v17 }
 0xdd3   :  { %v7613_v20 = vpop.eup %7612  ;;  %v4210_v8 = vmul.f32 1.442695, %v4197_v52  ;;  %v7402_v52 = vpack.c.bf16 %v6508_v14, %v6507_v29 }
 0xdd4   :  { %v7615_v58 = vpop.eup %7614  ;;  %v4219_v56 = vsel %vm1598_vm10, %v7613_v20, 0.0  ;;  %v4208_v31 = vmul.f32 1.442695, %v4196_v51 }
 0xdd5   :  { %4220 = vadd.xlane.f32.xlu1 %v4219_v56  ;;  %v4216_v47 = vsel %vm1598_vm10, %v7615_v58, 0.0  ;;  %7620 = vpow2.f32 %v4210_v8 }
 0xdd6   :  { %4217 = vadd.xlane.f32.xlu0 %v4216_v47  ;;  %7622 = vpow2.f32 %v4208_v31 }
 0xdd8   :  { %v7617_v48 = vpop.eup %7616 }
 0xdd9   :  { %v7619_v46 = vpop.eup %7618  ;;  %v4225_v24 = vsel %vm1598_vm10, %v7617_v48, 0.0 }
 0xdda   :  { %4226 = vadd.xlane.f32.xlu1 %v4225_v24  ;;  %v4222_v3 = vsel %vm1598_vm10, %v7619_v46, 0.0 }
 0xddb   :  { %4223 = vadd.xlane.f32.xlu0 %v4222_v3 }
 0xddc   :  { %v4191_v37 = vpop.xlane.xlu1 %4190 }
 0xddd   :  { %v4199_v38 = vsub.f32 %v4167_v4, %v4191_v37  ;;  %v4188_v2 = vpop.xlane.xlu0 %4187 }
 0xdde   :  { %v4198_v21 = vsub.f32 %v4166_v11, %v4188_v2 }
 0xddf   :  { %v7621_v19 = vpop.eup %7620  ;;  %v4214_v62 = vmul.f32 1.442695, %v4199_v38 }
 0xde0   :  { %v7623_v44 = vpop.eup %7622  ;;  %v4212_v45 = vmul.f32 1.442695, %v4198_v21  ;;  %v4231_v6 = vsel %vm1598_vm10, %v7621_v19, 0.0 }
 0xde1   :  { %7624 = vpow2.f32 %v4214_v62  ;;  %4232 = vadd.xlane.f32.xlu1 %v4231_v6  ;;  %v4228_v61 = vsel %vm1598_vm10, %v7623_v44, 0.0 }
 0xde2   :  { %7626 = vpow2.f32 %v4212_v45  ;;  %4229 = vadd.xlane.f32.xlu0 %v4228_v61 }
 0xdeb   :  { %v9023_v34 = vpop.eup %7624 }
 0xdec   :  { %v9025_v5 = vpop.eup %7626  ;;  %v4237_v50 = vsel %vm1598_vm10, %v9023_v34, 0.0 }
 0xded   :  { %4238 = vadd.xlane.f32.xlu1 %v4237_v50  ;;  %v4234_v59 = vsel %vm1598_vm10, %v9025_v5, 0.0 }
 0xdee   :  { %4235 = vadd.xlane.f32.xlu0 %v4234_v59 }
 0xe62   :  { %v4221_v40 = vpop.xlane.xlu1 %4220 }
 0xe63   :  { %7628 = vrcp.f32 %v4221_v40  ;;  %v4218_v1 = vpop.xlane.xlu0 %4217 }
 0xe64   :  { %7630 = vrcp.f32 %v4218_v1 }
 0xe67   :  { %v4227_v4 = vpop.xlane.xlu1 %4226 }
 0xe68   :  { %7632 = vrcp.f32 %v4227_v4  ;;  %v4224_v42 = vpop.xlane.xlu0 %4223 }
 0xe69   :  { %7634 = vrcp.f32 %v4224_v42 }
 0xe6d   :  { %v7629_v35 = vpop.eup %7628 }
 0xe6e   :  { %v7631_v11 = vpop.eup %7630  ;;  %v4249_v39 = vmul.f32 %v7629_v35, %v7613_v20  ;;  %v4233_v54 = vpop.xlane.xlu1 %4232 }
 0xe6f   :  { %v4248_v7 = vmul.f32 %v7631_v11, %v7615_v58  ;;  %7636 = vrcp.f32 %v4233_v54  ;;  %v4230_v57 = vpop.xlane.xlu0 %4229 }
 0xe70   :  { %7170 = vmatmul.mubr.msk.f32.vlgmr.msra.gmra.mrb[68].mxu1 %vm1598_vm10, %v4249_v39  ;;  %7638 = vrcp.f32 %v4230_v57 }
 0xe71   :  { %7178 = vmatpush3.msra.mxu1 %v8993_v23  ;;  %7165 = vmatmul.mubr.msk.f32.vlgmr.msra.gmra.mrb[60].mxu0 %vm1598_vm10, %v4248_v7  ;;  %v6505_v23 = vld [vmem:[%s9649_s5 + $0x20] sm:$0xff] }
 0xe72   :  { %7173 = vmatpush3.msra.mxu0 %v8998_v27  ;;  %7179 = vmatprep.mubr.msk.f32.mxu1 %vm7833_vm9, %v7832_v9  ;;  %v7633_v33 = vpop.eup %7632  ;;  %v6506_v27 = vld [vmem:[%s9649_s5 + $0x28] sm:$0xff] }
 0xe73   :  { %7187 = vmatprep.subr.mxu1 %v7832_v9  ;;  %7174 = vmatprep.mubr.msk.f32.mxu0 %vm7833_vm9, %v7832_v9  ;;  %v7635_v36 = vpop.eup %7634  ;;  %v4251_v49 = vmul.f32 %v7633_v33, %v7617_v48  ;;  %v7398_v16 = vpack.c.bf16 %v6506_v27, %v6505_v23 }
 0xe74   :  { %7182 = vmatprep.subr.mxu0 %v7832_v9  ;;  %v4250_v63 = vmul.f32 %v7635_v36, %v7619_v46 }
 0xe75   :  { %7180 = vmatmul.mubr.msk.f32.vlgmr.msra.gmra.mrb[70].mxu1 %vm1598_vm10, %v4251_v49 }
 0xe76   :  { %7188 = vmatpush3.msra.mxu1 %v9001_v43  ;;  %7175 = vmatmul.mubr.msk.f32.vlgmr.msra.gmra.mrb[62].mxu0 %vm1598_vm10, %v4250_v63 }
 0xe77   :  { %7183 = vmatpush3.msra.mxu0 %v9003_v0  ;;  %7189 = vmatprep.mubr.msk.f32.mxu1 %vm7833_vm9, %v7832_v9 }
 0xe78   :  { %7197 = vmatprep.subr.mxu1 %v7832_v9  ;;  %7184 = vmatprep.mubr.msk.f32.mxu0 %vm7833_vm9, %v7832_v9 }
 0xe79   :  { %v7637_v43 = vpop.eup %7636  ;;  %7192 = vmatprep.subr.mxu0 %v7832_v9 }
 0xe7a   :  { %v7639_v0 = vpop.eup %7638  ;;  %v4253_v22 = vmul.f32 %v7637_v43, %v7621_v19  ;;  %v4239_v55 = vpop.xlane.xlu1 %4238  ;;  %v6509_v19 = vld [vmem:[%s9652_s8 + $0x13] ss:$0 sm:$0xff] }
 0xe7b   :  { %v4252_v28 = vmul.f32 %v7639_v0, %v7623_v44  ;;  %7640 = vrcp.f32 %v4239_v55  ;;  %v4236_v26 = vpop.xlane.xlu0 %4235 }
 0xe7c   :  { %7642 = vrcp.f32 %v4236_v26  ;;  %7190 = vmatmul.mubr.msk.f32.vlgmr.msra.gmra.mrb[72].mxu1 %vm1598_vm10, %v4253_v22 }
 0xe7d   :  { %7198 = vmatpush3.msra.mxu1 %v9005_v32  ;;  %7185 = vmatmul.mubr.msk.f32.vlgmr.msra.gmra.mrb[64].mxu0 %vm1598_vm10, %v4252_v28 }
 0xe7e   :  { %7193 = vmatpush3.msra.mxu0 %v9007_v53  ;;  %7199 = vmatprep.mubr.msk.f32.mxu1 %vm7833_vm9, %v7832_v9 }
 0xe7f   :  { %7194 = vmatprep.mubr.msk.f32.mxu0 %vm7833_vm9, %v7832_v9  ;;  %7399 = vmatprep.subr.bf16.mxu0 %v7398_v16 }
 0xe85   :  { %v7641_v32 = vpop.eup %7640 }
 0xe86   :  { %v7643_v30 = vpop.eup %7642  ;;  %v4255_v20 = vmul.f32 %v7641_v32, %v9023_v34 }
 0xe87   :  { %v4254_v53 = vmul.f32 %v7643_v30, %v9025_v5 }
 0xe88   :  { %7200 = vmatmul.mubr.msk.f32.vlgmr.msra.gmra.mrb[74].mxu1 %vm1598_vm10, %v4255_v20 }
 0xe89   :  { %7195 = vmatmul.mubr.msk.f32.vlgmr.msra.gmra.mrb[66].mxu0 %vm1598_vm10, %v4254_v53 }
 0xe8a   :  { %7401 = vmatpush3.bf16.msra.mxu0 %v7398_v16 }
 0xe8b   :  { %7403 = vmatprep.subr.bf16.mxu0 %v7402_v52 }
 0xe8e   :  { %7405 = vmatpush3.bf16.msra.mxu0 %v7402_v52 }
 0xf43   :  { %v4398_v9 = vpop.f32.mrb[68].mxu1 }
 0xf44   :  { %v4325_v17 = vpop.f32.mrb[60].mxu0  ;;  %v7171_v58 = vpop.f32.mrb[69].mxu1 }
 0xf45   :  { %v7166_v51 = vpop.f32.mrb[61].mxu0  ;;  %7210 = vmatprep.mubr.msk.f32.mxu0 %vm115_vm0, %v4325_v17 }
 0xf46   :  { %7211 = vmatmul.mubr.msk.f32.vlgmr.msra.gmra.mrb[68].mxu0 %vm115_vm0, %v4398_v9 }
 0xf48   :  { %v4544_v56 = vpop.f32.mrb[70].mxu1 }
 0xf49   :  { %v4471_v8 = vpop.f32.mrb[62].mxu0  ;;  %v7181_v47 = vpop.f32.mrb[71].mxu1 }
 0xf4a   :  { %v7176_v31 = vpop.f32.mrb[63].mxu0  ;;  %7213 = vmatprep.mubr.msk.f32.mxu0 %vm115_vm0, %v4471_v8 }
 0xf4b   :  { %7214 = vmatmul.mubr.msk.f32.gmra.mrb[70].mxu0 %vm115_vm0, %v4544_v56 }
 0xf4f   :  { %v4690_v48 = vpop.f32.mrb[72].mxu1 }
 0xf50   :  { %v4617_v46 = vpop.f32.mrb[64].mxu0  ;;  %v7191_v24 = vpop.f32.mrb[73].mxu1 }
 0xf51   :  { %v7186_v3 = vpop.f32.mrb[65].mxu0  ;;  %7216 = vmatprep.mubr.msk.f32.mxu0 %vm115_vm0, %v4617_v46 }
 0xf52   :  { %7217 = vmatmul.mubr.msk.f32.gmra.mrb[72].mxu0 %vm115_vm0, %v4690_v48 }
 0xf5b   :  { %v4836_v37 = vpop.f32.mrb[74].mxu1 }
 0xf5c   :  { %v4763_v38 = vpop.f32.mrb[66].mxu0  ;;  %v7201_v2 = vpop.f32.mrb[75].mxu1 }
 0xf5d   :  { %v7196_v21 = vpop.f32.mrb[67].mxu0  ;;  %7219 = vmatprep.mubr.msk.f32.mxu0 %vm115_vm0, %v4763_v38 }
 0xf5e   :  { %7220 = vmatmul.mubr.msk.f32.gmra.mrb[74].mxu0 %vm115_vm0, %v4836_v37 }
0x1019   :  { %v7212_v62 = vpop.f32.mrb[68].mxu0 }
0x101a   :  { %v4945_v44 = vadd.f32 %v7212_v62, %v6509_v19  ;;  %v4939_v45 = vpop.f32.mrb[69].mxu0 }
0x101b   :  { %v4940_v6 = vadd.f32 %v6509_v19, %v4939_v45 }
0x101c   :  { %v4979_v61 = vadd.f32 %v4945_v44, %v8867_v18 }
0x101d   :  { %v4978_v34 = vadd.f32 %v4940_v6, %v8865_v25 }
0x101e   :  { %v4989_v5 = vsel %vm115_vm0, %v4979_v61, 0.0  ;;  %v7215_v59 = vpop.f32.mrb[70].mxu0 }
0x101f   :  { %4990 = vadd.xlane.f32.xlu1 %v4989_v5  ;;  %v4986_v50 = vsel %vm115_vm0, %v4978_v34, 0.0  ;;  %v4955_v40 = vadd.f32 %v7215_v59, %v6509_v19  ;;  %v4949_v1 = vpop.f32.mrb[71].mxu0  ;;  %v5115_v59 = vld [vmem:[#allocation7 + $0x20] sm:$0xff] }
0x1020   :  { %4987 = vadd.xlane.f32.xlu0 %v4986_v50  ;;  %v4950_v4 = vadd.f32 %v6509_v19, %v4949_v1  ;;  %v5117_v1 = vld [vmem:[#allocation7 + $0x30] sm:$0xff] }
0x1021   :  { %v4981_v42 = vadd.f32 %v4955_v40, %v8883_v15  ;;  %v5116_v40 = vld [vmem:[#allocation7 + $0x28] sm:$0xff] }
0x1022   :  { %v4980_v35 = vadd.f32 %v4950_v4, %v8881_v12  ;;  %v7406_v4 = vpack.c.bf16 %v5116_v40, %v5115_v59 }
0x1023   :  { %v4995_v11 = vsel %vm115_vm0, %v4981_v42, 0.0 }
0x1024   :  { %4996 = vadd.xlane.f32.xlu1 %v4995_v11  ;;  %v4992_v18 = vsel %vm115_vm0, %v4980_v35, 0.0  ;;  %7407 = vmatprep.subr.bf16.mxu1 %v7406_v4 }
0x1025   :  { %v7218_v25 = vpop.f32.mrb[72].mxu0  ;;  %4993 = vadd.xlane.f32.xlu0 %v4992_v18  ;;  %7409 = vmatpush3.bf16.msra.mxu1 %v7406_v4  ;;  %v6547_v4 = vld [vmem:[%s9651_s7 + $0x50] sm:$0xff] }
0x1026   :  { %v4965_v39 = vadd.f32 %v7218_v25, %v6509_v19  ;;  %v4959_v7 = vpop.f32.mrb[73].mxu0 }
0x1027   :  { %v4960_v54 = vadd.f32 %v6509_v19, %v4959_v7 }
0x1028   :  { %v4983_v57 = vadd.f32 %v4965_v39, %v8900_v13 }
0x1029   :  { %v4982_v33 = vadd.f32 %v4960_v54, %v8898_v10 }
0x102a   :  { %v5001_v36 = vsel %vm115_vm0, %v4983_v57, 0.0 }
0x102b   :  { %5002 = vadd.xlane.f32.xlu1 %v5001_v36  ;;  %v4998_v15 = vsel %vm115_vm0, %v4982_v33, 0.0 }
0x102c   :  { %4999 = vadd.xlane.f32.xlu0 %v4998_v15 }
0x1031   :  { %v7221_v12 = vpop.f32.mrb[74].mxu0 }
0x1032   :  { %v4975_v49 = vadd.f32 %v7221_v12, %v6509_v19  ;;  %v4969_v63 = vpop.f32.mrb[75].mxu0 }
0x1033   :  { %v4970_v23 = vadd.f32 %v6509_v19, %v4969_v63 }
0x1034   :  { %v4985_v27 = vadd.f32 %v4975_v49, %v8916_v41 }
0x1035   :  { %v4984_v43 = vadd.f32 %v4970_v23, %v8914_v60 }
0x1036   :  { %v5007_v0 = vsel %vm115_vm0, %v4985_v27, 0.0 }
0x1037   :  { %5008 = vadd.xlane.f32.xlu1 %v5007_v0  ;;  %v5004_v13 = vsel %vm115_vm0, %v4984_v43, 0.0  ;;  %v6518_v0 = vld [vmem:[%s9652_s8 + $0x14] ss:$0 sm:$0xff] }
0x1038   :  { %5005 = vadd.xlane.f32.xlu0 %v5004_v13 }
0x10ac   :  { %v4991_v10 = vpop.xlane.xlu1 %4990 }
0x10ad   :  { %v5011_v22 = vmul.f32 0.03125, %v4991_v10  ;;  %v4988_v55 = vpop.xlane.xlu0 %4987 }
0x10ae   :  { %v5010_v28 = vmul.f32 0.03125, %v4988_v55 }
0x10af   :  { %v9102_v26 = vsub.f32 %v4979_v61, %v5011_v22 }
0x10b0   :  { %v9104_v16 = vsub.f32 %v4978_v34, %v5010_v28 }
0x10b1   :  { %v5027_v29 = vmul.f32 %v9102_v26, %v9102_v26  ;;  %v4997_v41 = vpop.xlane.xlu1 %4996 }
0x10b2   :  { %v5026_v60 = vmul.f32 %v9104_v16, %v9104_v16  ;;  %v5013_v32 = vmul.f32 0.03125, %v4997_v41  ;;  %v4994_v30 = vpop.xlane.xlu0 %4993 }
0x10b3   :  { %v5037_v14 = vsel %vm115_vm0, %v5027_v29, 0.0  ;;  %v5012_v53 = vmul.f32 0.03125, %v4994_v30 }
0x10b4   :  { %5038 = vadd.xlane.f32.xlu1 %v5037_v14  ;;  %v5034_v20 = vsel %vm115_vm0, %v5026_v60, 0.0  ;;  %v9112_v52 = vsub.f32 %v4981_v42, %v5013_v32  ;;  %v5118_v42 = vld [vmem:[#allocation7 + $0x38] sm:$0xff]  ;;  %v6519_v60 = vld [vmem:[%s9652_s8 + $0x15] ss:$0 sm:$0xff] }
0x10b5   :  { %5035 = vadd.xlane.f32.xlu0 %v5034_v20  ;;  %v9114_v9 = vsub.f32 %v4980_v35, %v5012_v53  ;;  %v7410_v35 = vpack.c.bf16 %v5118_v42, %v5117_v1  ;;  %v6545_v1 = vld [vmem:[%s9651_s7 + $0x40] sm:$0xff]  ;;  %v6548_v42 = vld [vmem:[%s9651_s7 + $0x58] sm:$0xff] }
0x10b6   :  { %v5029_v17 = vmul.f32 %v9112_v52, %v9112_v52 }
0x10b7   :  { %v5028_v58 = vmul.f32 %v9114_v9, %v9114_v9  ;;  %7411 = vmatprep.subr.bf16.mxu1 %v7410_v35 }
0x10b8   :  { %v5003_v51 = vpop.xlane.xlu1 %5002  ;;  %v5043_v56 = vsel %vm115_vm0, %v5029_v17, 0.0  ;;  %7413 = vmatpush3.bf16.msra.mxu1 %v7410_v35  ;;  %v7418_v35 = vpack.c.bf16 %v6548_v42, %v6547_v4 }
0x10b9   :  { %v5015_v8 = vmul.f32 0.03125, %v5003_v51  ;;  %v5000_v47 = vpop.xlane.xlu0 %4999  ;;  %5044 = vadd.xlane.f32.xlu1 %v5043_v56  ;;  %v5040_v31 = vsel %vm115_vm0, %v5028_v58, 0.0 }
0x10ba   :  { %v5014_v48 = vmul.f32 0.03125, %v5000_v47  ;;  %5041 = vadd.xlane.f32.xlu0 %v5040_v31 }
0x10bb   :  { %v9122_v46 = vsub.f32 %v4983_v57, %v5015_v8 }
0x10bc   :  { %v9124_v24 = vsub.f32 %v4982_v33, %v5014_v48 }
0x10bd   :  { %v5031_v3 = vmul.f32 %v9122_v46, %v9122_v46 }
0x10be   :  { %v5030_v37 = vmul.f32 %v9124_v24, %v9124_v24 }
0x10bf   :  { %v5049_v38 = vsel %vm115_vm0, %v5031_v3, 0.0 }
0x10c0   :  { %5050 = vadd.xlane.f32.xlu1 %v5049_v38  ;;  %v5046_v2 = vsel %vm115_vm0, %v5030_v37, 0.0 }
0x10c1   :  { %5047 = vadd.xlane.f32.xlu0 %v5046_v2 }
0x10c4   :  { %v5009_v21 = vpop.xlane.xlu1 %5008 }
0x10c5   :  { %v5017_v19 = vmul.f32 0.03125, %v5009_v21  ;;  %v5006_v62 = vpop.xlane.xlu0 %5005 }
0x10c6   :  { %v5016_v44 = vmul.f32 0.03125, %v5006_v62 }
0x10c7   :  { %v9132_v45 = vsub.f32 %v4985_v27, %v5017_v19 }
0x10c8   :  { %v9134_v6 = vsub.f32 %v4984_v43, %v5016_v44 }
0x10c9   :  { %v5033_v61 = vmul.f32 %v9132_v45, %v9132_v45 }
0x10ca   :  { %v5032_v34 = vmul.f32 %v9134_v6, %v9134_v6 }
0x10cb   :  { %v5055_v5 = vsel %vm115_vm0, %v5033_v61, 0.0 }
0x10cc   :  { %5056 = vadd.xlane.f32.xlu1 %v5055_v5  ;;  %v5052_v50 = vsel %vm115_vm0, %v5032_v34, 0.0 }
0x10cd   :  { %5053 = vadd.xlane.f32.xlu0 %v5052_v50 }
0x1141   :  { %v5039_v11 = vpop.xlane.xlu1 %5038 }
0x1142   :  { %v5059_v18 = vmul.f32 0.03125, %v5039_v11  ;;  %v5036_v25 = vpop.xlane.xlu0 %5035  ;;  %v6549_v11 = vld [vmem:[%s9651_s7 + $0x60] sm:$0xff] }
0x1143   :  { %v5058_v39 = vmul.f32 0.03125, %v5036_v25 }
0x1144   :  { %v5067_v7 = vadd.f32 1e-05, %v5059_v18  ;;  %v6550_v18 = vld [vmem:[%s9651_s7 + $0x68] sm:$0xff] }
0x1145   :  { %v5066_v54 = vadd.f32 1e-05, %v5058_v39  ;;  %v7422_v25 = vpack.c.bf16 %v6550_v18, %v6549_v11  ;;  %v6551_v39 = vld [vmem:[%s9651_s7 + $0x70] sm:$0xff] }
0x1146   :  { %7644 = vrsqrt.f32 %v5067_v7  ;;  %v5045_v57 = vpop.xlane.xlu1 %5044  ;;  %v6552_v7 = vld [vmem:[%s9651_s7 + $0x78] sm:$0xff] }
0x1147   :  { %7646 = vrsqrt.f32 %v5066_v54  ;;  %v5061_v33 = vmul.f32 0.03125, %v5045_v57  ;;  %v5042_v36 = vpop.xlane.xlu0 %5041  ;;  %v7426_v54 = vpack.c.bf16 %v6552_v7, %v6551_v39  ;;  %v9215_v57 = vld [vmem:[%s9653_s9 + $0x1] ss:$0 sm:$0xff] }
0x1148   :  { %v5060_v15 = vmul.f32 0.03125, %v5042_v36 }
0x1149   :  { %v5069_v12 = vadd.f32 1e-05, %v5061_v33 }
0x114a   :  { %v5068_v49 = vadd.f32 1e-05, %v5060_v15 }
0x114b   :  { %7648 = vrsqrt.f32 %v5069_v12 }
0x114c   :  { %7650 = vrsqrt.f32 %v5068_v49 }
0x114d   :  { %v5051_v63 = vpop.xlane.xlu1 %5050 }
0x114e   :  { %v5063_v27 = vmul.f32 0.03125, %v5051_v63  ;;  %v5048_v43 = vpop.xlane.xlu0 %5047 }
0x114f   :  { %v5062_v22 = vmul.f32 0.03125, %v5048_v43 }
0x1150   :  { %v7645_v23 = vpop.eup %7644  ;;  %v5071_v55 = vadd.f32 1e-05, %v5063_v27 }
0x1151   :  { %v7647_v13 = vpop.eup %7646  ;;  %v5083_v10 = vmul.f32 %v7645_v23, %v9102_v26  ;;  %v5070_v29 = vadd.f32 1e-05, %v5062_v22 }
0x1152   :  { %v5082_v28 = vmul.f32 %v7647_v13, %v9104_v16  ;;  %7652 = vrsqrt.f32 %v5071_v55 }
0x1153   :  { %v5095_v41 = vmul.f32 %v6518_v0, %v5083_v10  ;;  %7654 = vrsqrt.f32 %v5070_v29 }
0x1154   :  { %v5094_v14 = vmul.f32 %v6518_v0, %v5082_v28 }
0x1155   :  { %v7649_v30 = vpop.eup %7648  ;;  %v9152_v20 = vadd.f32 %v6519_v60, %v5095_v41 }
0x1156   :  { %v9150_v32 = vadd.f32 %v6519_v60, %v5094_v14  ;;  %v7651_v53 = vpop.eup %7650  ;;  %v5085_v26 = vmul.f32 %v7649_v30, %v9112_v52 }
0x1157   :  { %v5084_v16 = vmul.f32 %v7651_v53, %v9114_v9 }
0x1158   :  { %7230 = vmatprep.mubr.msk.f32.mxu1 %vm115_vm0, %v9150_v32  ;;  %v5097_v17 = vmul.f32 %v6518_v0, %v5085_v26 }
0x1159   :  { %7231 = vmatmul.mubr.msk.f32.vlgmr.msra.gmra.mrb[76].mxu1 %vm115_vm0, %v9152_v20  ;;  %v5057_v58 = vpop.xlane.xlu1 %5056  ;;  %v5096_v51 = vmul.f32 %v6518_v0, %v5084_v16 }
0x115a   :  { %v5065_v56 = vmul.f32 0.03125, %v5057_v58  ;;  %v5054_v8 = vpop.xlane.xlu0 %5053  ;;  %v9162_v37 = vadd.f32 %v6519_v60, %v5097_v17 }
0x115b   :  { %v5064_v47 = vmul.f32 0.03125, %v5054_v8  ;;  %v9160_v31 = vadd.f32 %v6519_v60, %v5096_v51 }
0x115c   :  { %v7653_v48 = vpop.eup %7652  ;;  %v5073_v3 = vadd.f32 1e-05, %v5065_v56 }
0x115d   :  { %v7655_v38 = vpop.eup %7654  ;;  %v5072_v2 = vadd.f32 1e-05, %v5064_v47  ;;  %7233 = vmatprep.mubr.msk.f32.mxu1 %vm115_vm0, %v9160_v31  ;;  %v5087_v52 = vmul.f32 %v7653_v48, %v9122_v46 }
0x115e   :  { %7656 = vrsqrt.f32 %v5073_v3  ;;  %7234 = vmatmul.mubr.msk.f32.gmra.mrb[78].mxu1 %vm115_vm0, %v9162_v37  ;;  %v5086_v9 = vmul.f32 %v7655_v38, %v9124_v24 }
0x115f   :  { %7658 = vrsqrt.f32 %v5072_v2  ;;  %v5099_v21 = vmul.f32 %v6518_v0, %v5087_v52 }
0x1160   :  { %v5098_v19 = vmul.f32 %v6518_v0, %v5086_v9 }
0x1161   :  { %v9172_v44 = vadd.f32 %v6519_v60, %v5099_v21 }
0x1162   :  { %v9170_v62 = vadd.f32 %v6519_v60, %v5098_v19 }
0x1164   :  { %7236 = vmatprep.mubr.msk.f32.mxu1 %vm115_vm0, %v9170_v62 }
0x1165   :  { %7237 = vmatmul.mubr.msk.f32.gmra.mrb[80].mxu1 %vm115_vm0, %v9172_v44 }
0x1168   :  { %v7657_v46 = vpop.eup %7656 }
0x1169   :  { %v7659_v61 = vpop.eup %7658  ;;  %v5089_v34 = vmul.f32 %v7657_v46, %v9132_v45  ;;  %v6546_v45 = vld [vmem:[%s9651_s7 + $0x48] sm:$0xff] }
0x116a   :  { %v5088_v5 = vmul.f32 %v7659_v61, %v9134_v6  ;;  %v7414_v6 = vpack.c.bf16 %v6546_v45, %v6545_v1 }
0x116b   :  { %v5101_v24 = vmul.f32 %v6518_v0, %v5089_v34 }
0x116c   :  { %v5100_v50 = vmul.f32 %v6518_v0, %v5088_v5  ;;  %7415 = vmatprep.subr.bf16.mxu0 %v7414_v6 }
0x116d   :  { %v9182_v40 = vadd.f32 %v6519_v60, %v5101_v24  ;;  %7417 = vmatpush3.bf16.msra.mxu0 %v7414_v6 }
0x116e   :  { %v9180_v59 = vadd.f32 %v6519_v60, %v5100_v50  ;;  %7419 = vmatprep.subr.bf16.mxu0 %v7418_v35 }
0x1170   :  { %7239 = vmatprep.mubr.msk.f32.mxu1 %vm115_vm0, %v9180_v59 }
0x1171   :  { %7240 = vmatmul.mubr.msk.f32.gmra.mrb[82].mxu1 %vm115_vm0, %v9182_v40  ;;  %7421 = vmatpush3.bf16.msra.mxu0 %v7418_v35 }
0x1172   :  { %7423 = vmatprep.subr.bf16.mxu0 %v7422_v25 }
0x1175   :  { %7425 = vmatpush3.bf16.msra.mxu0 %v7422_v25 }
0x1176   :  { %7427 = vmatprep.subr.bf16.mxu0 %v7426_v54 }
0x1179   :  { %7429 = vmatpush3.bf16.msra.mxu0 %v7426_v54 }
0x122c   :  { %v7232_v33 = vpop.f32.mrb[76].mxu1 }
0x122d   :  { %v5220_v36 = vadd.f32 %v7232_v33, %v9215_v57  ;;  %v5214_v15 = vpop.f32.mrb[77].mxu1 }
0x122e   :  { %v9219_v12 = vadd.f32 %v9215_v57, %v5214_v15 }
0x122f   :  { %v9221_v49 = vmul.f32 0.70710677, %v5220_v36  ;;  %v9263_v54 = vmul.f32 0.5, %v5220_v36 }
0x1230   :  { %v9224_v63 = vmul.f32 0.70710677, %v9219_v12 }
0x1231   :  { %v5270_v23 = vand.u32 2147483647, %v9221_v49  ;;  %v7235_v0 = vpop.f32.mrb[78].mxu1  ;;  %vm5430_vm5 = vcmp.lt.f32.partialorder %v9221_v49, 0.0 }
0x1232   :  { %v5269_v27 = vand.u32 2147483647, %v9224_v63  ;;  %v9229_v10 = vadd.f32 %v7235_v0, %v9215_v57  ;;  %v5224_v22 = vpop.f32.mrb[79].mxu1  ;;  %vm5429_vm6 = vcmp.lt.f32.partialorder %v9224_v63, 0.0 }
0x1233   :  { %v5278_v43 = vmul.f32 0.3275911, %v5270_v23  ;;  %v9232_v28 = vadd.f32 %v9215_v57, %v5224_v22  ;;  %v5382_v51 = vmul.f32 %v5270_v23, %v5270_v23 }
0x1234   :  { %v5277_v13 = vmul.f32 0.3275911, %v5269_v27  ;;  %v9235_v60 = vmul.f32 0.70710677, %v9229_v10  ;;  %v5381_v47 = vmul.f32 %v5269_v27, %v5269_v27 }
0x1235   :  { %v5286_v55 = vadd.f32 1.0, %v5278_v43  ;;  %v9238_v41 = vmul.f32 0.70710677, %v9232_v28  ;;  %v5390_v52 = vsub.f32 0.0, %v5382_v51 }
0x1236   :  { %v5285_v29 = vadd.f32 1.0, %v5277_v13  ;;  %v5272_v14 = vand.u32 2147483647, %v9235_v60  ;;  %v5389_v46 = vsub.f32 0.0, %v5381_v47  ;;  %vm5432_vm7 = vcmp.lt.f32.partialorder %v9235_v60, 0.0 }
0x1237   :  { %7660 = vrcp.f32 %v5286_v55  ;;  %v5271_v30 = vand.u32 2147483647, %v9238_v41  ;;  %v5399_v4 = vmul.f32 1.442695, %v5390_v52  ;;  %vm5431_vm8 = vcmp.lt.f32.partialorder %v9238_v41, 0.0 }
0x1238   :  { %7662 = vrcp.f32 %v5285_v29  ;;  %v5280_v53 = vmul.f32 0.3275911, %v5272_v14  ;;  %v7238_v26 = vpop.f32.mrb[80].mxu1  ;;  %v5384_v9 = vmul.f32 %v5272_v14, %v5272_v14  ;;  %v5397_v18 = vmul.f32 1.442695, %v5389_v46 }
0x1239   :  { %v5279_v16 = vmul.f32 0.3275911, %v5271_v30  ;;  %v9243_v17 = vadd.f32 %v7238_v26, %v9215_v57  ;;  %v5234_v58 = vpop.f32.mrb[81].mxu1  ;;  %v5383_v61 = vmul.f32 %v5271_v30, %v5271_v30 }
0x123a   :  { %v5288_v56 = vadd.f32 1.0, %v5280_v53  ;;  %v9246_v8 = vadd.f32 %v9215_v57, %v5234_v58  ;;  %v5392_v42 = vsub.f32 0.0, %v5384_v9 }
0x123b   :  { %v5287_v48 = vadd.f32 1.0, %v5279_v16  ;;  %v9249_v3 = vmul.f32 0.70710677, %v9243_v17  ;;  %v5391_v25 = vsub.f32 0.0, %v5383_v61 }
0x123c   :  { %7664 = vrcp.f32 %v5288_v56  ;;  %v9252_v38 = vmul.f32 0.70710677, %v9246_v8  ;;  %v5403_v0 = vmul.f32 1.442695, %v5392_v42 }
0x123d   :  { %7666 = vrcp.f32 %v5287_v48  ;;  %v5274_v2 = vand.u32 2147483647, %v9249_v3  ;;  %v5401_v29 = vmul.f32 1.442695, %v5391_v25  ;;  %vm5434_vm9 = vcmp.lt.f32.partialorder %v9249_v3, 0.0 }
0x123e   :  { %v5273_v21 = vand.u32 2147483647, %v9252_v38  ;;  %vm5433_vm11 = vcmp.lt.f32.partialorder %v9252_v38, 0.0  ;;  %v5258_v3 = vmul.f32 0.5, %v9243_v17 }
0x123f   :  { %v5282_v34 = vmul.f32 0.3275911, %v5274_v2  ;;  %v5386_v53 = vmul.f32 %v5274_v2, %v5274_v2 }
0x1240   :  { %v5281_v50 = vmul.f32 0.3275911, %v5273_v21 }
0x1241   :  { %v9256_v19 = vpop.eup %7660  ;;  %v5290_v45 = vadd.f32 1.0, %v5282_v34  ;;  %v5394_v34 = vsub.f32 0.0, %v5386_v53 }
0x1242   :  { %v9258_v5 = vpop.eup %7662  ;;  %v5310_v24 = vmul.f32 1.0614054, %v9256_v19  ;;  %v5289_v35 = vadd.f32 1.0, %v5281_v50 }
0x1243   :  { %v5309_v1 = vmul.f32 1.0614054, %v9258_v5  ;;  %7668 = vrcp.f32 %v5290_v45 }
0x1244   :  { %v6530_v6 = vadd.f32 -1.4531521, %v5310_v24  ;;  %7670 = vrcp.f32 %v5289_v35  ;;  %v7241_v7 = vpop.f32.mrb[82].mxu1 }
0x1245   :  { %v6529_v11 = vadd.f32 -1.4531521, %v5309_v1  ;;  %v9267_v15 = vadd.f32 %v7241_v7, %v9215_v57  ;;  %v5244_v23 = vpop.f32.mrb[83].mxu1  ;;  %7672 = vpow2.f32 %v5399_v4 }
0x1246   :  { %v5326_v39 = vmul.f32 %v9256_v19, %v6530_v6  ;;  %v9269_v27 = vpop.eup %7664  ;;  %v9272_v13 = vadd.f32 %v9215_v57, %v5244_v23  ;;  %7674 = vpow2.f32 %v5397_v18  ;;  %v5385_v57 = vmul.f32 %v5273_v21, %v5273_v21 }
0x1247   :  { %v5325_v33 = vmul.f32 %v9258_v5, %v6529_v11  ;;  %v9274_v22 = vpop.eup %7666  ;;  %v5312_v36 = vmul.f32 1.0614054, %v9269_v27  ;;  %v9280_v26 = vmul.f32 0.70710677, %v9267_v15  ;;  %7676 = vpow2.f32 %v5403_v0 }
0x1248   :  { %v5334_v43 = vadd.f32 1.4214138, %v5326_v39  ;;  %v5311_v30 = vmul.f32 1.0614054, %v9274_v22  ;;  %v9284_v51 = vmul.f32 0.70710677, %v9272_v13  ;;  %7678 = vpow2.f32 %v5401_v29 }
0x1249   :  { %v5333_v55 = vadd.f32 1.4214138, %v5325_v33  ;;  %v6532_v58 = vadd.f32 -1.4531521, %v5312_v36  ;;  %v5276_v48 = vand.u32 2147483647, %v9280_v26 }
0x124a   :  { %v5342_v14 = vmul.f32 %v9256_v19, %v5334_v43  ;;  %v6531_v47 = vadd.f32 -1.4531521, %v5311_v30  ;;  %v9289_v2 = vand.u32 2147483647, %v9284_v51  ;;  %v5393_v45 = vsub.f32 0.0, %v5385_v57 }
0x124b   :  { %v5341_v16 = vmul.f32 %v9258_v5, %v5333_v55  ;;  %v5328_v9 = vmul.f32 %v9269_v27, %v6532_v58  ;;  %v5284_v21 = vmul.f32 0.3275911, %v5276_v48  ;;  %v5407_v55 = vmul.f32 1.442695, %v5394_v34 }
0x124c   :  { %v6538_v56 = vadd.f32 -0.28449672, %v5342_v14  ;;  %v5327_v61 = vmul.f32 %v9274_v22, %v6531_v47  ;;  %v5283_v6 = vmul.f32 0.3275911, %v9289_v2  ;;  %v5405_v57 = vmul.f32 1.442695, %v5393_v45 }
0x124d   :  { %v6537_v52 = vadd.f32 -0.28449672, %v5341_v16  ;;  %v9293_v24 = vpop.eup %7668  ;;  %v5336_v1 = vadd.f32 1.4214138, %v5328_v9  ;;  %v5292_v7 = vadd.f32 1.0, %v5284_v21  ;;  %v5387_v63 = vmul.f32 %v9289_v2, %v9289_v2 }
0x124e   :  { %v5358_v46 = vmul.f32 %v9256_v19, %v6538_v56  ;;  %v9297_v4 = vpop.eup %7670  ;;  %v5335_v35 = vadd.f32 1.4214138, %v5327_v61  ;;  %v5314_v11 = vmul.f32 1.0614054, %v9293_v24  ;;  %vm5436_vm12 = vcmp.lt.f32.partialorder %v9280_v26, 0.0 }
0x124f   :  { %v5357_v50 = vmul.f32 %v9258_v5, %v6537_v52  ;;  %v5344_v25 = vmul.f32 %v9269_v27, %v5336_v1  ;;  %v5313_v39 = vmul.f32 1.0614054, %v9297_v4  ;;  %v7673_v33 = vpop.eup %7672  ;;  %7680 = vrcp.f32 %v5292_v7  ;;  %v6553_v26 = vld [vmem:[%s9652_s8 + $0x16] ss:$0 sm:$0xff] }
0x1250   :  { %v5366_v42 = vadd.f32 0.2548296, %v5358_v46  ;;  %v5343_v43 = vmul.f32 %v9274_v22, %v5335_v35  ;;  %v6534_v0 = vadd.f32 -1.4531521, %v5314_v11  ;;  %v7675_v36 = vpop.eup %7674  ;;  %v5291_v52 = vadd.f32 1.0, %v5283_v6 }
0x1251   :  { %v5365_v18 = vadd.f32 0.2548296, %v5357_v50  ;;  %v6540_v14 = vadd.f32 -0.28449672, %v5344_v25  ;;  %v6533_v30 = vadd.f32 -1.4531521, %v5313_v39  ;;  %7682 = vpow2.f32 %v5407_v55 }
0x1252   :  { %v5374_v23 = vmul.f32 %v9256_v19, %v5366_v42  ;;  %v6539_v16 = vadd.f32 -0.28449672, %v5343_v43  ;;  %v5330_v58 = vmul.f32 %v9293_v24, %v6534_v0  ;;  %7684 = vrcp.f32 %v5291_v52 }
0x1253   :  { %v5373_v29 = vmul.f32 %v9258_v5, %v5365_v18  ;;  %v5360_v47 = vmul.f32 %v9269_v27, %v6540_v14  ;;  %v5329_v19 = vmul.f32 %v9297_v4, %v6533_v30  ;;  %v7677_v5 = vpop.eup %7676  ;;  %7686 = vpow2.f32 %v5405_v57 }
0x1254   :  { %v5414_v53 = vmul.f32 %v7673_v33, %v5374_v23  ;;  %v5359_v46 = vmul.f32 %v9274_v22, %v6539_v16  ;;  %v5338_v61 = vadd.f32 1.4214138, %v5330_v58  ;;  %v5388_v18 = vmul.f32 %v5276_v48, %v5276_v48  ;;  %v7679_v25 = vpop.eup %7678 }
0x1255   :  { %v5413_v56 = vmul.f32 %v7675_v36, %v5373_v29  ;;  %v5368_v21 = vadd.f32 0.2548296, %v5360_v47  ;;  %v5337_v50 = vadd.f32 1.4214138, %v5329_v19  ;;  %v5253_v36 = vmul.f32 0.5, %v9219_v12 }
0x1256   :  { %v5422_v9 = vsub.f32 1.0, %v5414_v53  ;;  %v5367_v42 = vadd.f32 0.2548296, %v5359_v46  ;;  %v5346_v45 = vmul.f32 %v9293_v24, %v5338_v61  ;;  %v5396_v53 = vsub.f32 0.0, %v5388_v18 }
0x1257   :  { %v5421_v34 = vsub.f32 1.0, %v5413_v56  ;;  %v5376_v11 = vmul.f32 %v9269_v27, %v5368_v21  ;;  %v5345_v6 = vmul.f32 %v9297_v4, %v5337_v50  ;;  %v5395_v21 = vsub.f32 0.0, %v5387_v63 }
0x1258   :  { %v5438_v1 = vsub.f32 0.0, %v5422_v9  ;;  %v5375_v7 = vmul.f32 %v9274_v22, %v5367_v42  ;;  %v6542_v33 = vadd.f32 -0.28449672, %v5346_v45  ;;  %v5255_v42 = vmul.f32 0.5, %v9232_v28 }
0x1259   :  { %v5437_v35 = vsub.f32 0.0, %v5421_v34  ;;  %v5416_v0 = vmul.f32 %v7677_v5, %v5376_v11  ;;  %v6541_v55 = vadd.f32 -0.28449672, %v5345_v6  ;;  %v9319_v48 = vpop.eup %7680  ;;  %v5256_v11 = vmul.f32 0.5, %v9229_v10 }
0x125a   :  { %v5446_v39 = vsel %vm5430_vm5, %v5438_v1, %v5422_v9  ;;  %v5415_v27 = vmul.f32 %v7679_v25, %v5375_v7  ;;  %v5362_v14 = vmul.f32 %v9293_v24, %v6542_v33  ;;  %v5316_v57 = vmul.f32 1.0614054, %v9319_v48 }
0x125b   :  { %v5454_v23 = vadd.f32 1.0, %v5446_v39  ;;  %v5445_v43 = vsel %vm5429_vm6, %v5437_v35, %v5421_v34  ;;  %v5424_v30 = vsub.f32 1.0, %v5416_v0  ;;  %v5361_v49 = vmul.f32 %v9297_v4, %v6541_v55  ;;  %v7683_v19 = vpop.eup %7682 }
0x125c   :  { %v5453_v29 = vadd.f32 1.0, %v5445_v43  ;;  %v5423_v16 = vsub.f32 1.0, %v5415_v27  ;;  %v5370_v58 = vadd.f32 0.2548296, %v5362_v14  ;;  %v6536_v46 = vadd.f32 -1.4531521, %v5316_v57  ;;  %v7685_v2 = vpop.eup %7684 }
0x125d   :  { %v5462_v12 = vmul.f32 %v5454_v23, %v9263_v54  ;;  %v5440_v56 = vsub.f32 0.0, %v5424_v30  ;;  %v5369_v47 = vadd.f32 0.2548296, %v5361_v49  ;;  %v5411_v34 = vmul.f32 1.442695, %v5396_v53  ;;  %v7687_v60 = vpop.eup %7686 }
0x125e   :  { %v5461_v22 = vmul.f32 %v5453_v29, %v5253_v36  ;;  %v5439_v52 = vsub.f32 0.0, %v5423_v16  ;;  %v5378_v9 = vmul.f32 %v9293_v24, %v5370_v58  ;;  %v5332_v41 = vmul.f32 %v9319_v48, %v6536_v46 }
0x125f   :  { %v5448_v61 = vsel %vm5432_vm7, %v5440_v56, %v5424_v30  ;;  %v5377_v5 = vmul.f32 %v9297_v4, %v5369_v47  ;;  %v5315_v35 = vmul.f32 1.0614054, %v7685_v2  ;;  %7688 = vpow2.f32 %v5411_v34 }
0x1260   :  { %7258 = vmatprep.mubr.msk.f32.mxu0 %vm2910_vm13, %v5461_v22  ;;  %v5456_v54 = vadd.f32 1.0, %v5448_v61  ;;  %v5447_v50 = vsel %vm5431_vm8, %v5439_v52, %v5423_v16  ;;  %v5418_v1 = vmul.f32 %v7683_v19, %v5378_v9  ;;  %v5340_v18 = vadd.f32 1.4214138, %v5332_v41 }
0x1261   :  { %7259 = vmatmul.mubr.msk.f32.vlgmr.msra.gmra.mrb[76].mxu0 %vm2910_vm13, %v5462_v12  ;;  %v5455_v24 = vadd.f32 1.0, %v5447_v50  ;;  %v5417_v45 = vmul.f32 %v7687_v60, %v5377_v5  ;;  %v6535_v39 = vadd.f32 -1.4531521, %v5315_v35  ;;  %v5409_v43 = vmul.f32 1.442695, %v5395_v21 }
0x1262   :  { %v5426_v6 = vsub.f32 1.0, %v5418_v1  ;;  %v5464_v7 = vmul.f32 %v5456_v54, %v5256_v11  ;;  %v5348_v23 = vmul.f32 %v9319_v48, %v5340_v18  ;;  %v5257_v14 = vmul.f32 0.5, %v9246_v8 }
0x1263   :  { %v5463_v4 = vmul.f32 %v5455_v24, %v5255_v42  ;;  %v5425_v25 = vsub.f32 1.0, %v5417_v45  ;;  %v5331_v28 = vmul.f32 %v7685_v2, %v6535_v39  ;;  %7690 = vpow2.f32 %v5409_v43 }
0x1264   :  { %v5442_v33 = vsub.f32 0.0, %v5426_v6  ;;  %v6544_v10 = vadd.f32 -0.28449672, %v5348_v23  ;;  %vm5435_vm14 = vcmp.lt.f32.partialorder %v9284_v51, 0.0  ;;  %v5259_v21 = vmul.f32 0.5, %v9272_v13 }
0x1265   :  { %v5441_v0 = vsub.f32 0.0, %v5425_v25  ;;  %7261 = vmatprep.mubr.msk.f32.mxu0 %vm2910_vm13, %v5463_v4  ;;  %v5339_v27 = vadd.f32 1.4214138, %v5331_v28  ;;  %v5260_v54 = vmul.f32 0.5, %v9267_v15  ;;  %vm6145_vm5 = vcmask 1046534  }
0x1266   :  { %v5450_v55 = vsel %vm5434_vm9, %v5442_v33, %v5426_v6  ;;  %7262 = vmatmul.mubr.msk.f32.gmra.mrb[78].mxu0 %vm2910_vm13, %v5464_v7  ;;  %v5364_v49 = vmul.f32 %v9319_v48, %v6544_v10  ;;  %vm6148_vm6 = vcmask 1047559   ;;  %vm6272_vm7 = vcmask 97280  }
0x1267   :  { %v5458_v36 = vadd.f32 1.0, %v5450_v55  ;;  %v5449_v29 = vsel %vm5433_vm11, %v5441_v0, %v5425_v25  ;;  %v5347_v53 = vmul.f32 %v7685_v2, %v5339_v27  ;;  %vm6274_vm8 = vcmask 130048  }
0x1268   :  { %v5457_v30 = vadd.f32 1.0, %v5449_v29  ;;  %v5372_v22 = vadd.f32 0.2548296, %v5364_v49  ;;  %vm6276_vm9 = vcmask 162816   ;;  %vm6278_vm11 = vcmask 195584  }
0x1269   :  { %v5466_v16 = vmul.f32 %v5458_v36, %v5258_v3  ;;  %v6543_v58 = vadd.f32 -0.28449672, %v5347_v53  ;;  %v7689_v57 = vpop.eup %7688 }
0x126a   :  { %v5465_v63 = vmul.f32 %v5457_v30, %v5257_v14  ;;  %v5380_v38 = vmul.f32 %v9319_v48, %v5372_v22 }
0x126b   :  { %v5363_v12 = vmul.f32 %v7685_v2, %v6543_v58 }
0x126c   :  { %7264 = vmatprep.mubr.msk.f32.mxu0 %vm2910_vm13, %v5465_v63  ;;  %v5420_v8 = vmul.f32 %v7689_v57, %v5380_v38 }
0x126d   :  { %7265 = vmatmul.mubr.msk.f32.gmra.mrb[80].mxu0 %vm2910_vm13, %v5466_v16  ;;  %v5371_v56 = vadd.f32 0.2548296, %v5363_v12  ;;  %v7691_v52 = vpop.eup %7690 }
0x126e   :  { %v5428_v47 = vsub.f32 1.0, %v5420_v8 }
0x126f   :  { %v5379_v19 = vmul.f32 %v7685_v2, %v5371_v56 }
0x1270   :  { %v5444_v9 = vsub.f32 0.0, %v5428_v47 }
0x1271   :  { %v5419_v17 = vmul.f32 %v7691_v52, %v5379_v19 }
0x1272   :  { %v5452_v61 = vsel %vm5436_vm12, %v5444_v9, %v5428_v47  ;;  %vm6280_vm12 = vcmask 228352  }
0x1273   :  { %v5427_v46 = vsub.f32 1.0, %v5419_v17  ;;  %v5460_v48 = vadd.f32 1.0, %v5452_v61 }
0x1275   :  { %v5443_v5 = vsub.f32 0.0, %v5427_v46  ;;  %v5468_v1 = vmul.f32 %v5460_v48, %v5260_v54 }
0x1277   :  { %v5451_v34 = vsel %vm5435_vm14, %v5443_v5, %v5427_v46 }
0x1278   :  { %v5459_v60 = vadd.f32 1.0, %v5451_v34 }
0x127a   :  { %v5467_v50 = vmul.f32 %v5459_v60, %v5259_v21 }
0x127c   :  { %7267 = vmatprep.mubr.msk.f32.mxu0 %vm2910_vm13, %v5467_v50 }
0x127d   :  { %7268 = vmatmul.mubr.msk.f32.gmra.mrb[82].mxu0 %vm2910_vm13, %v5468_v1  ;;  %vm6079_vm13 = vcmask 31744  }
0x1334   :  { %v7260_v2 = vpop.f32.mrb[76].mxu0 }
0x1335   :  { %v5578_v41 = vadd.f32 %v7260_v2, %v6553_v26  ;;  %v5572_v51 = vpop.f32.mrb[77].mxu0 }
0x1336   :  { %v5573_v42 = vadd.f32 %v6553_v26, %v5572_v51 }
0x1337   :  { %v5612_v24 = vadd.f32 %v5578_v41, %v9152_v20 }
0x1338   :  { %v5611_v13 = vadd.f32 %v5573_v42, %v9150_v32 }
0x1339   :  { %v5622_v15 = vsel %vm115_vm0, %v5612_v24, 0.0  ;;  %v7263_v35 = vpop.f32.mrb[78].mxu0 }
0x133a   :  { %5623 = vadd.xlane.f32.xlu1 %v5622_v15  ;;  %v5619_v45 = vsel %vm115_vm0, %v5611_v13, 0.0  ;;  %v5588_v11 = vadd.f32 %v7263_v35, %v6553_v26  ;;  %v5582_v6 = vpop.f32.mrb[79].mxu0  ;;  %v5747_v35 = vld [vmem:[#allocation8] sm:$0xff] }
0x133b   :  { %5620 = vadd.xlane.f32.xlu0 %v5619_v45  ;;  %v5583_v18 = vadd.f32 %v6553_v26, %v5582_v6  ;;  %v5749_v6 = vld [vmem:[#allocation8 + $0x10] sm:$0xff] }
0x133c   :  { %v5614_v4 = vadd.f32 %v5588_v11, %v9162_v37  ;;  %v5748_v11 = vld [vmem:[#allocation8 + $0x8] sm:$0xff] }
0x133d   :  { %v5613_v25 = vadd.f32 %v5583_v18, %v9160_v31  ;;  %v7430_v18 = vpack.c.bf16 %v5748_v11, %v5747_v35 }
0x133e   :  { %v5628_v39 = vsel %vm115_vm0, %v5614_v4, 0.0 }
0x133f   :  { %5629 = vadd.xlane.f32.xlu1 %v5628_v39  ;;  %v5625_v20 = vsel %vm115_vm0, %v5613_v25, 0.0  ;;  %7431 = vmatprep.subr.bf16.mxu1 %v7430_v18  ;;  %v5893_v39 = vld [vmem:[%s9655_s11] sm:$0xff] }
0x1340   :  { %v7266_v32 = vpop.f32.mrb[80].mxu0  ;;  %5626 = vadd.xlane.f32.xlu0 %v5625_v20  ;;  %7433 = vmatpush3.bf16.msra.mxu1 %v7430_v18  ;;  %v5894_v20 = vld [vmem:[%s9655_s11 + $0x8] sm:$0xff] }
0x1341   :  { %v5598_v7 = vadd.f32 %v7266_v32, %v6553_v26  ;;  %v5592_v33 = vpop.f32.mrb[81].mxu0  ;;  %v7438_v32 = vpack.c.bf16 %v5894_v20, %v5893_v39  ;;  %v5896_v39 = vld [vmem:[%s9655_s11 + $0x18] sm:$0xff] }
0x1342   :  { %v5593_v23 = vadd.f32 %v6553_v26, %v5592_v33 }
0x1343   :  { %v5616_v43 = vadd.f32 %v5598_v7, %v9172_v44  ;;  %7439 = vmatprep.subr.bf16.mxu0 %v7438_v32 }
0x1344   :  { %v5615_v0 = vadd.f32 %v5593_v23, %v9170_v62  ;;  %7441 = vmatpush3.bf16.msra.mxu0 %v7438_v32 }
0x1345   :  { %v5634_v28 = vsel %vm115_vm0, %v5616_v43, 0.0 }
0x1346   :  { %5635 = vadd.xlane.f32.xlu1 %v5634_v28  ;;  %v5631_v37 = vsel %vm115_vm0, %v5615_v0, 0.0 }
0x1347   :  { %5632 = vadd.xlane.f32.xlu0 %v5631_v37 }
0x1350   :  { %v7269_v31 = vpop.f32.mrb[82].mxu0 }
0x1351   :  { %v5608_v55 = vadd.f32 %v7269_v31, %v6553_v26  ;;  %v5602_v10 = vpop.f32.mrb[83].mxu0 }
0x1352   :  { %v5603_v36 = vadd.f32 %v6553_v26, %v5602_v10 }
0x1353   :  { %v5618_v29 = vadd.f32 %v5608_v55, %v9182_v40 }
0x1354   :  { %v5617_v27 = vadd.f32 %v5603_v36, %v9180_v59 }
0x1355   :  { %v5640_v14 = vsel %vm115_vm0, %v5618_v29, 0.0 }
0x1356   :  { %5641 = vadd.xlane.f32.xlu1 %v5640_v14  ;;  %v5637_v44 = vsel %vm115_vm0, %v5617_v27, 0.0 }
0x1357   :  { %5638 = vadd.xlane.f32.xlu0 %v5637_v44  ;;  %v6562_v44 = vld [vmem:[%s9652_s8 + $0x17] ss:$0 sm:$0xff] }
0x13c7   :  { %v5624_v62 = vpop.xlane.xlu1 %5623 }
0x13c8   :  { %v5644_v30 = vmul.f32 0.03125, %v5624_v62  ;;  %v5621_v49 = vpop.xlane.xlu0 %5620 }
0x13c9   :  { %v5643_v3 = vmul.f32 0.03125, %v5621_v49 }
0x13ca   :  { %v9371_v53 = vsub.f32 %v5612_v24, %v5644_v30 }
0x13cb   :  { %v9373_v63 = vsub.f32 %v5611_v13, %v5643_v3 }
0x13cc   :  { %v5660_v22 = vmul.f32 %v9371_v53, %v9371_v53  ;;  %v5630_v40 = vpop.xlane.xlu1 %5629 }
0x13cd   :  { %v5659_v59 = vmul.f32 %v9373_v63, %v9373_v63  ;;  %v5646_v58 = vmul.f32 0.03125, %v5630_v40  ;;  %v5627_v38 = vpop.xlane.xlu0 %5626 }
0x13ce   :  { %v5670_v16 = vsel %vm115_vm0, %v5660_v22, 0.0  ;;  %v5645_v12 = vmul.f32 0.03125, %v5627_v38 }
0x13cf   :  { %5671 = vadd.xlane.f32.xlu1 %v5670_v16  ;;  %v5667_v57 = vsel %vm115_vm0, %v5659_v59, 0.0  ;;  %v9381_v8 = vsub.f32 %v5614_v4, %v5646_v58  ;;  %v5750_v4 = vld [vmem:[#allocation8 + $0x18] sm:$0xff]  ;;  %v6563_v16 = vld [vmem:[%s9652_s8 + $0x18] ss:$0 sm:$0xff] }
0x13d0   :  { %5668 = vadd.xlane.f32.xlu0 %v5667_v57  ;;  %v9383_v56 = vsub.f32 %v5613_v25, %v5645_v12  ;;  %v7434_v25 = vpack.c.bf16 %v5750_v4, %v5749_v6 }
0x13d1   :  { %v5662_v47 = vmul.f32 %v9381_v8, %v9381_v8 }
0x13d2   :  { %v5661_v19 = vmul.f32 %v9383_v56, %v9383_v56  ;;  %7435 = vmatprep.subr.bf16.mxu1 %v7434_v25 }
0x13d3   :  { %v5636_v52 = vpop.xlane.xlu1 %5635  ;;  %v5676_v9 = vsel %vm115_vm0, %v5662_v47, 0.0  ;;  %7437 = vmatpush3.bf16.msra.mxu1 %v7434_v25  ;;  %v5895_v25 = vld [vmem:[%s9655_s11 + $0x10] sm:$0xff] }
0x13d4   :  { %v5648_v17 = vmul.f32 0.03125, %v5636_v52  ;;  %v5633_v46 = vpop.xlane.xlu0 %5632  ;;  %5677 = vadd.xlane.f32.xlu1 %v5676_v9  ;;  %v5673_v61 = vsel %vm115_vm0, %v5661_v19, 0.0  ;;  %v7442_v20 = vpack.c.bf16 %v5896_v39, %v5895_v25 }
0x13d5   :  { %v5647_v5 = vmul.f32 0.03125, %v5633_v46  ;;  %5674 = vadd.xlane.f32.xlu0 %v5673_v61 }
0x13d6   :  { %v9391_v48 = vsub.f32 %v5616_v43, %v5648_v17  ;;  %7443 = vmatprep.subr.bf16.mxu0 %v7442_v20 }
0x13d7   :  { %v9393_v34 = vsub.f32 %v5615_v0, %v5647_v5  ;;  %7445 = vmatpush3.bf16.msra.mxu0 %v7442_v20 }
0x13d8   :  { %v5664_v21 = vmul.f32 %v9391_v48, %v9391_v48 }
0x13d9   :  { %v5663_v60 = vmul.f32 %v9393_v34, %v9393_v34 }
0x13da   :  { %v5682_v54 = vsel %vm115_vm0, %v5664_v21, 0.0 }
0x13db   :  { %5683 = vadd.xlane.f32.xlu1 %v5682_v54  ;;  %v5679_v50 = vsel %vm115_vm0, %v5663_v60, 0.0 }
0x13dc   :  { %5680 = vadd.xlane.f32.xlu0 %v5679_v50 }
0x13e3   :  { %v5642_v1 = vpop.xlane.xlu1 %5641 }
0x13e4   :  { %v5650_v26 = vmul.f32 0.03125, %v5642_v1  ;;  %v5639_v2 = vpop.xlane.xlu0 %5638 }
0x13e5   :  { %v5649_v41 = vmul.f32 0.03125, %v5639_v2 }
0x13e6   :  { %v9401_v51 = vsub.f32 %v5618_v29, %v5650_v26 }
0x13e7   :  { %v9403_v42 = vsub.f32 %v5617_v27, %v5649_v41 }
0x13e8   :  { %v5666_v24 = vmul.f32 %v9401_v51, %v9401_v51 }
0x13e9   :  { %v5665_v13 = vmul.f32 %v9403_v42, %v9403_v42 }
0x13ea   :  { %v5688_v15 = vsel %vm115_vm0, %v5666_v24, 0.0 }
0x13eb   :  { %5689 = vadd.xlane.f32.xlu1 %v5688_v15  ;;  %v5685_v45 = vsel %vm115_vm0, %v5665_v13, 0.0 }
0x13ec   :  { %5686 = vadd.xlane.f32.xlu0 %v5685_v45 }
0x145c   :  { %v5672_v7 = vpop.xlane.xlu1 %5671 }
0x145d   :  { %v5692_v33 = vmul.f32 0.03125, %v5672_v7  ;;  %v5669_v23 = vpop.xlane.xlu0 %5668 }
0x145e   :  { %v5691_v43 = vmul.f32 0.03125, %v5669_v23 }
0x145f   :  { %v5700_v0 = vadd.f32 1e-05, %v5692_v33 }
0x1460   :  { %v5699_v28 = vadd.f32 1e-05, %v5691_v43 }
0x1461   :  { %7692 = vrsqrt.f32 %v5700_v0  ;;  %v5678_v37 = vpop.xlane.xlu1 %5677 }
0x1462   :  { %7694 = vrsqrt.f32 %v5699_v28  ;;  %v5694_v31 = vmul.f32 0.03125, %v5678_v37  ;;  %v5675_v55 = vpop.xlane.xlu0 %5674 }
0x1463   :  { %v5693_v10 = vmul.f32 0.03125, %v5675_v55 }
0x1464   :  { %v5702_v36 = vadd.f32 1e-05, %v5694_v31 }
0x1465   :  { %v5701_v29 = vadd.f32 1e-05, %v5693_v10 }
0x1466   :  { %7696 = vrsqrt.f32 %v5702_v36 }
0x1467   :  { %7698 = vrsqrt.f32 %v5701_v29 }
0x1468   :  { %v5684_v27 = vpop.xlane.xlu1 %5683 }
0x1469   :  { %v5696_v62 = vmul.f32 0.03125, %v5684_v27  ;;  %v5681_v30 = vpop.xlane.xlu0 %5680 }
0x146a   :  { %v5695_v22 = vmul.f32 0.03125, %v5681_v30 }
0x146b   :  { %v7693_v14 = vpop.eup %7692  ;;  %v5704_v59 = vadd.f32 1e-05, %v5696_v62 }
0x146c   :  { %v7695_v49 = vpop.eup %7694  ;;  %v5716_v3 = vmul.f32 %v7693_v14, %v9371_v53  ;;  %v5703_v38 = vadd.f32 1e-05, %v5695_v22 }
0x146d   :  { %v5715_v40 = vmul.f32 %v7695_v49, %v9373_v63  ;;  %7700 = vrsqrt.f32 %v5704_v59 }
0x146e   :  { %v5728_v58 = vmul.f32 %v6562_v44, %v5716_v3  ;;  %7702 = vrsqrt.f32 %v5703_v38 }
0x146f   :  { %v5727_v57 = vmul.f32 %v6562_v44, %v5715_v40 }
0x1470   :  { %v7697_v47 = vpop.eup %7696  ;;  %v5740_v19 = vadd.f32 %v6563_v16, %v5728_v58  ;;  %v6573_v58 = vld [vmem:[%s9656_s12 + $0x1] ss:$0 sm:$0xff] }
0x1471   :  { %v5739_v12 = vadd.f32 %v6563_v16, %v5727_v57  ;;  %v7699_v52 = vpop.eup %7698  ;;  %v5718_v53 = vmul.f32 %v7697_v47, %v9381_v8 }
0x1472   :  { %v5717_v63 = vmul.f32 %v7699_v52, %v9383_v56 }
0x1473   :  { %7278 = vmatprep.mubr.msk.f32.mxu1 %vm115_vm0, %v5739_v12  ;;  %v5730_v9 = vmul.f32 %v6562_v44, %v5718_v53 }
0x1474   :  { %7279 = vmatmul.mubr.msk.f32.vlgmr.msra.gmra.mrb[84].mxu1 %vm115_vm0, %v5740_v19  ;;  %v5729_v17 = vmul.f32 %v6562_v44, %v5717_v63 }
0x1475   :  { %v5742_v5 = vadd.f32 %v6563_v16, %v5730_v9 }
0x1476   :  { %v5741_v46 = vadd.f32 %v6563_v16, %v5729_v17 }
0x1477   :  { %v7701_v61 = vpop.eup %7700 }
0x1478   :  { %v7703_v21 = vpop.eup %7702  ;;  %7281 = vmatprep.mubr.msk.f32.mxu1 %vm115_vm0, %v5741_v46  ;;  %v5720_v60 = vmul.f32 %v7701_v61, %v9391_v48  ;;  %v5690_v50 = vpop.xlane.xlu1 %5689 }
0x1479   :  { %7282 = vmatmul.mubr.msk.f32.gmra.mrb[86].mxu1 %vm115_vm0, %v5742_v5  ;;  %v5719_v54 = vmul.f32 %v7703_v21, %v9393_v34  ;;  %v5698_v1 = vmul.f32 0.03125, %v5690_v50  ;;  %v5687_v26 = vpop.xlane.xlu0 %5686 }
0x147a   :  { %v5732_v8 = vmul.f32 %v6562_v44, %v5720_v60  ;;  %v5697_v56 = vmul.f32 0.03125, %v5687_v26 }
0x147b   :  { %v5731_v2 = vmul.f32 %v6562_v44, %v5719_v54  ;;  %v5706_v41 = vadd.f32 1e-05, %v5698_v1 }
0x147c   :  { %v5705_v13 = vadd.f32 1e-05, %v5697_v56  ;;  %v5744_v15 = vadd.f32 %v6563_v16, %v5732_v8 }
0x147d   :  { %v5743_v24 = vadd.f32 %v6563_v16, %v5731_v2  ;;  %7704 = vrsqrt.f32 %v5706_v41 }
0x147e   :  { %7706 = vrsqrt.f32 %v5705_v13 }
0x147f   :  { %7284 = vmatprep.mubr.msk.f32.mxu1 %vm115_vm0, %v5743_v24 }
0x1480   :  { %7285 = vmatmul.mubr.msk.f32.gmra.mrb[88].mxu1 %vm115_vm0, %v5744_v15 }
0x1487   :  { %v7705_v48 = vpop.eup %7704 }
0x1488   :  { %v7707_v45 = vpop.eup %7706  ;;  %v5722_v34 = vmul.f32 %v7705_v48, %v9401_v51  ;;  %v6564_v51 = vld [vmem:[%s9656_s12] ss:$0 sm:$0xff]  ;;  %s7835_s12 = smov 4  }
0x1489   :  { %v5721_v35 = vmul.f32 %v7707_v45, %v9403_v42 }
0x148a   :  { %v5734_v11 = vmul.f32 %v6562_v44, %v5722_v34 }
0x148b   :  { %v5733_v6 = vmul.f32 %v6562_v44, %v5721_v35 }
0x148c   :  { %v5746_v4 = vadd.f32 %v6563_v16, %v5734_v11 }
0x148d   :  { %v5745_v18 = vadd.f32 %v6563_v16, %v5733_v6  ;;  %v7834_v16 = vmov 4  }
0x148e   :  { %7467 = vset.pattern.permute.xlu1 %v7834_v16  ;;  %7466 = vset.pattern.permute.xlu0 %v7834_v16 }
0x148f   :  { %7287 = vmatprep.mubr.msk.f32.mxu1 %vm115_vm0, %v5745_v18 }
0x1490   :  { %7288 = vmatmul.mubr.msk.f32.gmra.mrb[90].mxu1 %vm115_vm0, %v5746_v4 }
0x1547   :  { %v7280_v42 = vpop.f32.mrb[84].mxu1 }
0x1548   :  { %v5852_v32 = vadd.f32 %v7280_v42, %v6564_v51  ;;  %v5846_v7 = vpop.f32.mrb[85].mxu1 }
0x1549   :  { %v5847_v33 = vadd.f32 %v6564_v51, %v5846_v7 }
0x154a   :  { %v5886_v43 = vmax.f32 %v5852_v32, 0.0 }
0x154b   :  { %v5885_v23 = vmax.f32 %v5847_v33, 0.0 }
0x154c   :  { %v7283_v0 = vpop.f32.mrb[86].mxu1 }
0x154d   :  { %7298 = vmatprep.mubr.msk.f32.mxu0 %vm115_vm0, %v5885_v23  ;;  %v5862_v28 = vadd.f32 %v7283_v0, %v6564_v51  ;;  %v5856_v37 = vpop.f32.mrb[87].mxu1 }
0x154e   :  { %7299 = vmatmul.mubr.msk.f32.vlgmr.msra.gmra.mrb[84].mxu0 %vm115_vm0, %v5886_v43  ;;  %v5857_v31 = vadd.f32 %v6564_v51, %v5856_v37 }
0x154f   :  { %v5888_v10 = vmax.f32 %v5862_v28, 0.0 }
0x1550   :  { %v5887_v55 = vmax.f32 %v5857_v31, 0.0 }
0x1552   :  { %7301 = vmatprep.mubr.msk.f32.mxu0 %vm115_vm0, %v5887_v55 }
0x1553   :  { %v7286_v36 = vpop.f32.mrb[88].mxu1  ;;  %7302 = vmatmul.mubr.msk.f32.gmra.mrb[86].mxu0 %vm115_vm0, %v5888_v10 }
0x1554   :  { %v5872_v29 = vadd.f32 %v7286_v36, %v6564_v51  ;;  %v5866_v27 = vpop.f32.mrb[89].mxu1 }
0x1555   :  { %v5867_v14 = vadd.f32 %v6564_v51, %v5866_v27 }
0x1556   :  { %v5890_v62 = vmax.f32 %v5872_v29, 0.0 }
0x1557   :  { %v5889_v44 = vmax.f32 %v5867_v14, 0.0 }
0x1559   :  { %7304 = vmatprep.mubr.msk.f32.mxu0 %vm115_vm0, %v5889_v44 }
0x155a   :  { %7305 = vmatmul.mubr.msk.f32.gmra.mrb[88].mxu0 %vm115_vm0, %v5890_v62 }
0x1563   :  { %v7289_v30 = vpop.f32.mrb[90].mxu1 }
0x1564   :  { %v5882_v49 = vadd.f32 %v7289_v30, %v6564_v51  ;;  %v5876_v3 = vpop.f32.mrb[91].mxu1 }
0x1565   :  { %v5877_v22 = vadd.f32 %v6564_v51, %v5876_v3 }
0x1566   :  { %v5892_v40 = vmax.f32 %v5882_v49, 0.0 }
0x1567   :  { %v5891_v59 = vmax.f32 %v5877_v22, 0.0 }
0x1569   :  { %7307 = vmatprep.mubr.msk.f32.mxu0 %vm115_vm0, %v5891_v59 }
0x156a   :  { %7308 = vmatmul.mubr.msk.f32.gmra.mrb[90].mxu0 %vm115_vm0, %v5892_v40 }
0x1621   :  { %v7300_v38 = vpop.f32.mrb[84].mxu0 }
0x1622   :  { %v5998_v57 = vadd.f32 %v7300_v38, %v6573_v58  ;;  %v5992_v12 = vpop.f32.mrb[85].mxu0 }
0x1623   :  { %v5993_v47 = vadd.f32 %v6573_v58, %v5992_v12 }
0x1624   :  { %v6083_v19 = vsel %vm6079_vm13, %v5998_v57, 0.0 }
0x1625   :  { %6084 = vadd.xlane.f32.xlu1 %v6083_v19  ;;  %v6080_v52 = vsel %vm6079_vm13, %v5993_v47, 0.0 }
0x1626   :  { %6081 = vadd.xlane.f32.xlu0 %v6080_v52  ;;  %v7303_v53 = vpop.f32.mrb[86].mxu0 }
0x1627   :  { %v6008_v63 = vadd.f32 %v7303_v53, %v6573_v58  ;;  %v6002_v9 = vpop.f32.mrb[87].mxu0 }
0x1628   :  { %v6003_v17 = vadd.f32 %v6573_v58, %v6002_v9 }
0x1629   :  { %v6089_v46 = vsel %vm6079_vm13, %v6008_v63, 0.0 }
0x162a   :  { %6090 = vadd.xlane.f32.xlu1 %v6089_v46  ;;  %v6086_v61 = vsel %vm6079_vm13, %v6003_v17, 0.0 }
0x162b   :  { %6087 = vadd.xlane.f32.xlu0 %v6086_v61 }
0x162d   :  { %v7306_v5 = vpop.f32.mrb[88].mxu0 }
0x162e   :  { %v9463_v21 = vadd.f32 %v7306_v5, %v6573_v58  ;;  %v6012_v60 = vpop.f32.mrb[89].mxu0 }
0x162f   :  { %v9465_v54 = vadd.f32 %v6573_v58, %v6012_v60 }
0x1630   :  { %v6095_v50 = vsel %vm6079_vm13, %v9463_v21, 0.0 }
0x1631   :  { %6096 = vadd.xlane.f32.xlu1 %v6095_v50  ;;  %v6092_v8 = vsel %vm6079_vm13, %v9465_v54, 0.0 }
0x1632   :  { %6093 = vadd.xlane.f32.xlu0 %v6092_v8 }
0x163d   :  { %v7309_v1 = vpop.f32.mrb[90].mxu0 }
0x163e   :  { %v9471_v26 = vadd.f32 %v7309_v1, %v6573_v58  ;;  %v6022_v2 = vpop.f32.mrb[91].mxu0 }
0x163f   :  { %v9473_v56 = vadd.f32 %v6573_v58, %v6022_v2 }
0x1640   :  { %v6101_v41 = vsel %vm6079_vm13, %v9471_v26, 0.0 }
0x1641   :  { %6102 = vadd.xlane.f32.xlu1 %v6101_v41  ;;  %v6098_v24 = vsel %vm6079_vm13, %v9473_v56, 0.0 }
0x1642   :  { %6099 = vadd.xlane.f32.xlu0 %v6098_v24 }
0x1652   :  { %6038 = vperm.xlu1 %7467, %v5998_v57  }
0x1656   :  { %6043 = vperm.xlu1 %7467, %v6003_v17  }
0x1658   :  { %6033 = vperm.xlu0 %7466, %v5993_v47  }
0x165a   :  { %6048 = vperm.xlu1 %7467, %v6008_v63  }
0x165e   :  { %6053 = vperm.xlu1 %7467, %v9465_v54  }
0x1662   :  { %6058 = vperm.xlu1 %7467, %v9463_v21  }
0x1666   :  { %6063 = vperm.xlu1 %7467, %v9473_v56  }
0x166a   :  { %6068 = vperm.xlu1 %7467, %v9471_v26  }
0x16b2   :  { %v6085_v13 = vpop.xlane.xlu1 %6084 }
0x16b3   :  { %v6082_v15 = vpop.xlane.xlu0 %6081  ;;  %v6106_v25 = vmul.f32 0.25, %v6085_v13 }
0x16b4   :  { %v6105_v32 = vmul.f32 0.25, %v6082_v15 }
0x16b7   :  { %v6091_v48 = vpop.xlane.xlu1 %6090 }
0x16b8   :  { %v6088_v45 = vpop.xlane.xlu0 %6087  ;;  %v6108_v23 = vmul.f32 0.25, %v6091_v48 }
0x16b9   :  { %v6107_v33 = vmul.f32 0.25, %v6088_v45 }
0x16be   :  { %v6097_v34 = vpop.xlane.xlu1 %6096 }
0x16bf   :  { %v6094_v35 = vpop.xlane.xlu0 %6093  ;;  %v6110_v28 = vmul.f32 0.25, %v6097_v34 }
0x16c0   :  { %v6109_v14 = vmul.f32 0.25, %v6094_v35 }
0x16ce   :  { %v6103_v11 = vpop.xlane.xlu1 %6102 }
0x16cf   :  { %v6100_v18 = vpop.xlane.xlu0 %6099  ;;  %v9494_v44 = vmul.f32 0.25, %v6103_v11 }
0x16d0   :  { %v6111_v49 = vmul.f32 0.25, %v6100_v18 }
0x16d2   :  { %v6039_v6 = vpop.permute.xlu1 %6038 }
0x16d3   :  { %v6072_v4 = vadd.f32 %v6039_v6, %v5998_v57 }
0x16d5   :  { %v9483_v20 = vsub.f32 %v6072_v4, %v6106_v25 }
0x16d6   :  { %v6044_v39 = vpop.permute.xlu1 %6043 }
0x16d7   :  { %v6073_v51 = vadd.f32 %v6044_v39, %v6003_v17  ;;  %v6034_v42 = vpop.permute.xlu0 %6033  ;;  %v6203_v55 = vrot.slane %v9483_v20, 3  ;;  %v6169_v30 = vrot.slane %v9483_v20, 1  ;;  %v6186_v59 = vrot.slane %v9483_v20, 2 }
0x16d8   :  { %v6071_v7 = vadd.f32 %v6034_v42, %v5993_v47  ;;  %v6237_v57 = vrot.slane %v9483_v20, 5  ;;  %v6254_v34 = vrot.slane %v9483_v20, 6  ;;  %v6129_v4 = vrot.slane %v9483_v20, 7 }
0x16d9   :  { %v9487_v37 = vsub.f32 %v6073_v51, %v6107_v33 }
0x16da   :  { %v9485_v43 = vsub.f32 %v6071_v7, %v6105_v32  ;;  %v6049_v0 = vpop.permute.xlu1 %6048 }
0x16db   :  { %v6074_v31 = vadd.f32 %v6049_v0, %v6008_v63  ;;  %v6205_v38 = vrot.slane %v9487_v37, 2  ;;  %v6153_v47 = vrot.slane %v9487_v37, 7  ;;  %v6188_v9 = vrot.slane %v9487_v37, 1 }
0x16dc   :  { %v6168_v10 = vrot.slane %v9485_v43, 2  ;;  %v6151_v36 = vrot.slane %v9485_v43, 1  ;;  %v6202_v29 = vrot.slane %v9485_v43, 4  ;;  %v6185_v27 = vrot.slane %v9485_v43, 3 }
0x16dd   :  { %v9496_v62 = vsub.f32 %v6074_v31, %v6108_v23  ;;  %v6236_v40 = vrot.slane %v9485_v43, 6  ;;  %v6239_v17 = vrot.slane %v9487_v37, 4 }
0x16de   :  { %v6054_v3 = vpop.permute.xlu1 %6053  ;;  %v6204_v22 = vsel %vm6130_vm15, %v6203_v55, %v6202_v29  ;;  %v6170_v58 = vsel %vm6130_vm15, %v6169_v30, %v6168_v10  ;;  %v6152_v12 = vsel %vm6130_vm15, %v9483_v20, %v6151_v36  ;;  %v6187_v52 = vsel %vm6130_vm15, %v6186_v59, %v6185_v27 }
0x16df   :  { %v6075_v16 = vadd.f32 %v6054_v3, %v9465_v54  ;;  %v6207_v19 = vrot.slane %v9496_v62, 1  ;;  %v6206_v63 = vsel %vm6133_vm1, %v6205_v38, %v6204_v22  ;;  %v6171_v61 = vsel %vm6133_vm1, %v9487_v37, %v6170_v58 }
0x16e0   :  { %v6172_v5 = vrot.slane %v9496_v62, 7  ;;  %v6238_v60 = vsel %vm6130_vm15, %v6237_v57, %v6236_v40  ;;  %v6219_v54 = vrot.slane %v9485_v43, 5  ;;  %v6154_v8 = vsel %vm6133_vm1, %v6153_v47, %v6152_v12 }
0x16e1   :  { %v9511_v53 = vsub.f32 %v6075_v16, %v6109_v14  ;;  %v6155_v1 = vrot.slane %v9496_v62, 6  ;;  %v6189_v2 = vsel %vm6133_vm1, %v6188_v9, %v6187_v52  ;;  %v6208_v13 = vsel %vm6136_vm2, %v6207_v19, %v6206_v63 }
0x16e2   :  { %v6059_v46 = vpop.permute.xlu1 %6058  ;;  %v6241_v15 = vrot.slane %v9496_v62, 3  ;;  %v6240_v45 = vsel %vm6133_vm1, %v6239_v17, %v6238_v60  ;;  %v6173_v11 = vsel %vm6136_vm2, %v6172_v5, %v6171_v61  ;;  %v6190_v6 = vsel %vm6136_vm2, %v9496_v62, %v6189_v2 }
0x16e3   :  { %v6076_v50 = vadd.f32 %v6059_v46, %v9463_v21  ;;  %v6174_v41 = vrot.slane %v9511_v53, 6  ;;  %v6157_v24 = vrot.slane %v9511_v53, 5  ;;  %v6220_v21 = vrot.slane %v9483_v20, 4 }
0x16e4   :  { %v6191_v18 = vrot.slane %v9511_v53, 7  ;;  %v6156_v39 = vsel %vm6136_vm2, %v6155_v1, %v6154_v8  ;;  %v6209_v51 = vsel %vm6139_vm3, %v9511_v53, %v6208_v13  ;;  %v6243_v42 = vrot.slane %v9511_v53, 2 }
0x16e5   :  { %v9529_v48 = vsub.f32 %v6076_v50, %v6110_v28  ;;  %v6175_v32 = vsel %vm6139_vm3, %v6174_v41, %v6173_v11  ;;  %v6158_v7 = vsel %vm6139_vm3, %v6157_v24, %v6156_v39  ;;  %v6242_v33 = vsel %vm6136_vm2, %v6241_v15, %v6240_v45 }
0x16e6   :  { %v6064_v35 = vpop.permute.xlu1 %6063  ;;  %v6221_v23 = vsel %vm6130_vm15, %v6220_v21, %v6219_v54  ;;  %v6192_v10 = vsel %vm6139_vm3, %v6191_v18, %v6190_v6  ;;  %v6222_v27 = vrot.slane %v9487_v37, 3  ;;  %v6244_v30 = vsel %vm6139_vm3, %v6243_v42, %v6242_v33 }
0x16e7   :  { %v6077_v25 = vadd.f32 %v6064_v35, %v9473_v56  ;;  %v6176_v56 = vrot.slane %v9529_v48, 5  ;;  %v6159_v28 = vrot.slane %v9529_v48, 4  ;;  %v6210_v31 = vrot.slane %v9529_v48, 7 }
0x16e8   :  { %v6193_v36 = vrot.slane %v9529_v48, 6  ;;  %v6245_v29 = vrot.slane %v9529_v48, 1  ;;  %v6253_v3 = vrot.slane %v9485_v43, 7  ;;  %v6223_v40 = vsel %vm6133_vm1, %v6222_v27, %v6221_v23 }
0x16e9   :  { %v9548_v0 = vsub.f32 %v6077_v25, %v6111_v49  ;;  %v6224_v49 = vrot.slane %v9496_v62, 2  ;;  %v6226_v16 = vrot.slane %v9511_v53, 1  ;;  %v6177_v38 = vsel %vm6142_vm4, %v6176_v56, %v6175_v32 }
0x16ea   :  { %v6069_v55 = vpop.permute.xlu1 %6068  ;;  %v6211_v57 = vsel %vm6142_vm4, %v6210_v31, %v6209_v51  ;;  %v6194_v47 = vsel %vm6142_vm4, %v6193_v36, %v6192_v10  ;;  %v6246_v52 = vsel %vm6142_vm4, %v6245_v29, %v6244_v30  ;;  %v6255_v17 = vsel %vm6130_vm15, %v6254_v34, %v6253_v3 }
0x16eb   :  { %v6078_v14 = vadd.f32 %v6069_v55, %v9471_v26  ;;  %v6178_v22 = vrot.slane %v9548_v0, 4  ;;  %v6161_v59 = vrot.slane %v9548_v0, 3  ;;  %v6160_v26 = vsel %vm6142_vm4, %v6159_v28, %v6158_v7 }
0x16ec   :  { %v6212_v12 = vrot.slane %v9548_v0, 6  ;;  %v6195_v19 = vrot.slane %v9548_v0, 5  ;;  %v6229_v1 = vrot.slane %v9548_v0, 7  ;;  %v6256_v24 = vrot.slane %v9487_v37, 5 }
0x16ed   :  { %v9566_v58 = vsub.f32 %v6078_v14, %v9494_v44  ;;  %v6225_v44 = vsel %vm6136_vm2, %v6224_v49, %v6223_v40  ;;  %v6179_v46 = vsel %vm6145_vm5, %v6178_v22, %v6177_v38  ;;  %v6162_v61 = vsel %vm6145_vm5, %v6161_v59, %v6160_v26 }
0x16ee   :  { %v6227_v60 = vsel %vm6139_vm3, %v6226_v16, %v6225_v44  ;;  %v6213_v2 = vsel %vm6145_vm5, %v6212_v12, %v6211_v57  ;;  %v6196_v41 = vsel %vm6145_vm5, %v6195_v19, %v6194_v47  ;;  %v6258_v13 = vrot.slane %v9496_v62, 4 }
0x16ef   :  { %v6180_v63 = vrot.slane %v9566_v58, 3  ;;  %v6163_v9 = vrot.slane %v9566_v58, 2  ;;  %v6214_v5 = vrot.slane %v9566_v58, 5  ;;  %v6197_v8 = vrot.slane %v9566_v58, 4 }
0x16f0   :  { %v6248_v15 = vrot.slane %v9566_v58, 7  ;;  %v6231_v45 = vrot.slane %v9566_v58, 6  ;;  %v6132_v21 = vrot.slane %v9487_v37, 6  ;;  %v6135_v34 = vrot.slane %v9496_v62, 5 }
0x16f1   :  { %v6181_v54 = vsel %vm6148_vm6, %v6180_v63, %v6179_v46  ;;  %v6164_v50 = vsel %vm6148_vm6, %v6163_v9, %v6162_v61  ;;  %v6215_v35 = vsel %vm6148_vm6, %v6214_v5, %v6213_v2  ;;  %v6257_v11 = vsel %vm6133_vm1, %v6256_v24, %v6255_v17 }
0x16f2   :  { %6182 = vrot.lane.b32.xlu0 %v6181_v54, %s7829_s26  ;;  %6165 = vrot.lane.b32.xlu1 %v6164_v50, %s7835_s12  ;;  %v6260_v6 = vrot.slane %v9511_v53, 3  ;;  %v6138_v18 = vrot.slane %v9511_v53, 4  ;;  %v6198_v25 = vsel %vm6148_vm6, %v6197_v8, %v6196_v41  ;;  %v6262_v39 = vrot.slane %v9529_v48, 2  ;;  %s7836_s26 = smov 16  }
0x16f3   :  { %v6141_v51 = vrot.slane %v9529_v48, 3  ;;  %v6131_v37 = vsel %vm6130_vm15, %v6129_v4, %v9485_v43  ;;  %v6264_v62 = vrot.slane %v9548_v0, 1  ;;  %v6144_v42 = vrot.slane %v9548_v0, 2 }
0x16f4   :  { %v6134_v53 = vsel %vm6133_vm1, %v6132_v21, %v6131_v37  ;;  %v6228_v32 = vsel %vm6142_vm4, %v9529_v48, %v6227_v60  ;;  %v6259_v7 = vsel %vm6136_vm2, %v6258_v13, %v6257_v11  ;;  %v6147_v33 = vrot.slane %v9566_v58, 1 }
0x16f5   :  { %v6137_v20 = vsel %vm6136_vm2, %v6135_v34, %v6134_v53  ;;  %v6247_v43 = vsel %vm6145_vm5, %v9548_v0, %v6246_v52  ;;  %v6230_v4 = vsel %vm6145_vm5, %v6229_v1, %v6228_v32  ;;  %v6261_v23 = vsel %vm6139_vm3, %v6260_v6, %v6259_v7 }
0x16f6   :  { %6216 = vrot.lane.b32.xlu0 %v6215_v35, %s7836_s26  ;;  %6199 = vrot.lane.b32.xlu1 %v6198_v25, %s7837_s23  ;;  %v6140_v56 = vsel %vm6139_vm3, %v6138_v18, %v6137_v20  ;;  %v6249_v28 = vsel %vm6148_vm6, %v6248_v15, %v6247_v43  ;;  %v6232_v31 = vsel %vm6148_vm6, %v6231_v45, %v6230_v4 }
0x16f7   :  { %v6263_v48 = vsel %vm6142_vm4, %v6262_v39, %v6261_v23  ;;  %v6143_v55 = vsel %vm6142_vm4, %v6141_v51, %v6140_v56 }
0x16f8   :  { %v6265_v0 = vsel %vm6145_vm5, %v6264_v62, %v6263_v48  ;;  %v6146_v10 = vsel %vm6145_vm5, %v6144_v42, %v6143_v55 }
0x16f9   :  { %v6149_v36 = vsel %vm6148_vm6, %v6147_v33, %v6146_v10  ;;  %v6266_v29 = vsel %vm6148_vm6, %v9566_v58, %v6265_v0 }
0x16fa   :  { %6250 = vrot.lane.b32.xlu0 %v6249_v28, %s7838_s6  ;;  %6233 = vrot.lane.b32.xlu1 %v6232_v31, %s7839_s18 }
0x16fe   :  { %6267 = vrot.lane.b32.xlu1 %v6266_v29, %s7840_s24 }
0x1764   :  { %v6183_v27 = vpop.permute.xlu0 %6182  ;;  %v6166_v14 = vpop.permute.xlu1 %6165 }
0x1765   :  { %v6270_v30 = vsel %vm6079_vm13, %v6149_v36, %v6166_v14 }
0x1766   :  { %v6271_v22 = vsel %vm1598_vm10, %v6270_v30, %v6183_v27 }
0x1768   :  { %v6217_v49 = vpop.permute.xlu0 %6216  ;;  %v6200_v3 = vpop.permute.xlu1 %6199 }
0x1769   :  { %v6273_v59 = vsel %vm6272_vm7, %v6271_v22, %v6200_v3 }
0x176a   :  { %v6275_v16 = vsel %vm6274_vm8, %v6273_v59, %v6217_v49 }
0x176c   :  { %v6234_v40 = vpop.permute.xlu1 %6233  ;;  %v6251_v38 = vpop.permute.xlu0 %6250 }
0x176d   :  { %v6277_v26 = vsel %vm6276_vm9, %v6275_v16, %v6234_v40 }
0x176e   :  { %v6279_v57 = vsel %vm6278_vm11, %v6277_v26, %v6251_v38 }
0x1770   :  { %v6268_v58 = vpop.permute.xlu1 %6267 }
0x1771   :  { %v6281_v12 = vsel %vm6280_vm12, %v6279_v57, %v6268_v58 }
0x1772   :  { %6282 = vst.msk [vmem:[#allocation10] sm:$0xff] %vm115_vm0, %v6281_v12 }
0x1773   :  { %7807 = shalt.err (!%p7804_p8)
}
0x1774   :  { %s7808_s29 = scalar_lea.hbm %s9657_s13, 128 }
0x1775   :  { %p7809_p9 = scmp.ne.s32.totalorder %s9657_s13, %s7808_s29  ;;  %p7812_p10 = scmp.lt.u32.totalorder %s7808_s29, %s9657_s13 }
0x1777   :  { %p7814_p11 = pnand %p7812_p10, %p7809_p9 }
0x1779   :  { %7817 = shalt.err (!%p7814_p11)
}
0x177a   :  { %6292 = dma.vmem_to_hbm [thread:$0]  %s6290_s10, 128, %s9657_s13, [#allocation4]  }
0x177b   :  { %7824 = dma.done.wait [#allocation4], 128  }
0x177c   :  { %7825 = vsyncadd [#allocation4], 4294967168 }
0x177d   :  { %6296 = vsyncpa [#allocation3], 1 }
0x177e   :  { %6297 = vsyncpa [#allocation6], 1 }
0x177f   :  { %6298 = vsyncpa [#allocation9], 1 }
0x1780   :  { %6299 = vsyncpa [#allocation4], 1 }

</bundles_post_ra>
